<compile_context>
chip_gen: v7x
topology: tpu7x:2x2x1
jax: 0.10.0
libtpu: 0.0.40
codegen_flags: <defaults>
</compile_context>

<pallas_src>
import jax
import jax.numpy as jnp
from jax.experimental import pallas as pl
from jax.experimental.pallas import tpu as pltpu


# ----------------------------------------------------------------------------
# Config (small, deterministic, consistent with the module's __init__)
# ----------------------------------------------------------------------------
class Cfg:
    WORD_EMBED_SIZE = 64
    HIDDEN_SIZE = 128
    FLAT_MLP_SIZE = 128
    FLAT_GLIMPSES = 1          # fused AttFlat path assumes a single glimpse
    FLAT_OUT_SIZE = 256
    FRAME_FEAT_SIZE = 128
    CLIP_FEAT_SIZE = 128
    DROPOUT_R = 0.1            # inference mode -> dropout is identity
    N_READ_HEADS_DNC = 2
    WORD_LENGTH_DNC = 64
    CELL_COUNT_DNC = 8


TOKEN_SIZE = 50
ANSWER_SIZE = 16
BATCH = 2
T_QUES = 8
T_FRAME = 8
T_CLIP = 4


# ----------------------------------------------------------------------------
# Single fused Pallas kernel
# ----------------------------------------------------------------------------
def _net1_fused_kernel(
    # activations / masks
    lang_emb_ref,     # (B, Tq, E)   f32
    frame_ref,        # (B, Tf, F)   f32
    clip_ref,         # (B, Tc, F)   f32   (Tc padded to Tf on host)
    lang_mask_ref,    # (B, Tq, 1)   f32, 1.0 where padded (seq on sublanes)
    frame_mask_ref,   # (B, Tf, 1)
    clip_mask_ref,    # (B, Tc, 1)
    # LSTM parameters
    w_ih_ref,         # (E, 4H)      bf16
    w_hh_ref,         # (H, 4H)      bf16
    lstm_b_ref,       # (1, 4H)      f32   (= b_ih + b_hh)
    # visual feature projections
    frame_w_ref, frame_b_ref,   # (F, H) bf16, (1, H) f32
    clip_w_ref, clip_b_ref,     # (F, H) bf16, (1, H) f32
    # AttFlat params stacked over streams [lang, frame, clip]
    att_w1_ref,       # (3, H, M)    bf16
    att_b1_ref,       # (3, 1, M)    f32
    att_w2_ref,       # (3, 1, M)    f32   (VPU operand -> keep f32 for v5e)
    att_b2_ref,       # (3,)         f32   per-stream scalar bias (SMEM)
    att_wm_ref,       # (3H, FLAT_OUT) bf16  (merge weights concatenated)
    att_bm_ref,       # (1, FLAT_OUT)  f32   (merge biases pre-summed)
    # tail params
    pn_g_ref, pn_b_ref,          # (1, FLAT_OUT)
    pnd_g_ref, pnd_b_ref,        # (1, FLAT_OUT + RV)
    ld_w_ref, ld_b_ref,          # (FLAT_OUT + RV, FLAT_OUT) bf16, (1, FLAT_OUT)
    proj_w_ref, proj_b_ref,      # (FLAT_OUT, ANSWER) bf16, (1, ANSWER)
    # output
    o_ref,                       # (B, ANSWER)
):
    f32 = jnp.float32
    bf16 = jnp.bfloat16
    B, Tq, E = lang_emb_ref.shape
    H = w_hh_ref.shape[0]
    Tf = frame_ref.shape[1]
    Tc = clip_ref.shape[1]
    F_dim = frame_ref.shape[2]

    # ---- LSTM: input projection as a single 2D MXU pass (M = B*Tq) ----------
    xp = jnp.dot(lang_emb_ref[...].reshape(B * Tq, E).astype(bf16),
                 w_ih_ref[...], preferred_element_type=f32)
    xp = (xp + lstm_b_ref[...]).reshape(B, Tq, 4 * H)        # (B, Tq, 4H)

    # fully unrolled recurrence (Tq = 8); hidden state stays in registers
    # TODO(synk): if the bundle dump shows Mosaic re-pushing w_hh per step,
    # drive the MXU explicitly (matmul_push_rhs once + matmul_acc_lhs/step).
    w_hh = w_hh_ref[...]
    h = jnp.zeros((B, H), f32)
    c = jnp.zeros((B, H), f32)
    hs = []
    for t in range(Tq):                                      # static unroll
        gates = xp[:, t, :] + jnp.dot(h.astype(bf16), w_hh,
                                      preferred_element_type=f32)
        i_g = jax.nn.sigmoid(gates[:, 0 * H:1 * H])
        f_g = jax.nn.sigmoid(gates[:, 1 * H:2 * H])
        g_g = jnp.tanh(gates[:, 2 * H:3 * H])
        o_g = jax.nn.sigmoid(gates[:, 3 * H:4 * H])
        c = f_g * c + i_g * g_g
        h = o_g * jnp.tanh(c)
        hs.append(h)
    lang_feat = jnp.stack(hs, axis=1)                        # (B, Tq, H)

    # ---- frame / clip linear projections as single 2D matmuls ---------------
    frame_h = (jnp.dot(frame_ref[...].reshape(B * Tf, F_dim).astype(bf16),
                       frame_w_ref[...], preferred_element_type=f32)
               + frame_b_ref[...]).reshape(B, Tf, H)
    clip_h = (jnp.dot(clip_ref[...].reshape(B * Tc, F_dim).astype(bf16),
                      clip_w_ref[...], preferred_element_type=f32)
              + clip_b_ref[...]).reshape(B, Tc, H)

    # TODO(synk): VLC backbone definition not provided; identity pass-through.

    # ---- AttFlat pooling (FLAT_GLIMPSES == 1), sequence kept on sublanes ----
    def attflat_pool(x, mask_ref, s):
        Bx, S, Hx = x.shape
        # MLP: FC(relu) + Linear   (dropout = identity at inference)
        h1 = jnp.dot(x.reshape(Bx * S, Hx).astype(bf16), att_w1_ref[s],
                     preferred_element_type=f32) + att_b1_ref[s]
        h1 = jnp.maximum(h1, 0.0).reshape(Bx, S, -1)         # (B, S, M)
        # G == 1 glimpse logits: lane reduce -> (B, S, 1), S stays on sublanes
        att = (jnp.sum(h1 * att_w2_ref[s], axis=-1, keepdims=True)
               + att_b2_ref[s])
        # masked_fill(mask, -1e9) + softmax over the sequence (sublane) axis
        att = jnp.where(mask_ref[...] > 0.5, -1000000000.0, att)
        att = att - jnp.max(att, axis=1, keepdims=True)
        att = jnp.exp(att)
        att = att * pl.reciprocal(jnp.sum(att, axis=1, keepdims=True),
                                  approx=True)
        # weighted sum over the sequence (pure VPU lane-broadcast + reduce)
        return jnp.sum(att * x, axis=1)                      # (B, H)

    x_lang = attflat_pool(lang_feat, lang_mask_ref, 0)
    x_frame = attflat_pool(frame_h, frame_mask_ref, 1)
    x_clip = attflat_pool(clip_h, clip_mask_ref, 2)

    # ---- fused merge-linears + stream sum: one (B,3H)x(3H,OUT) matmul -------
    x_cat = jnp.concatenate([x_lang, x_frame, x_clip], axis=-1)   # (B, 3H)
    sum3 = (jnp.dot(x_cat.astype(bf16), att_wm_ref[...],
                    preferred_element_type=f32) + att_bm_ref[...])  # (B, OUT)

    # ---- tail: layernorms, DNC(identity) branch, final projection -----------
    def layernorm(x, g, b):
        u = jnp.mean(x, axis=-1, keepdims=True)
        v = jnp.mean((x - u) ** 2, axis=-1, keepdims=True)
        return (x - u) * jax.lax.rsqrt(v + 1e-5) * g + b     # torch default eps

    proj0 = layernorm(sum3, pn_g_ref[...], pn_b_ref[...])

    # TODO(synk): DNC module definition not provided; identity sequence output
    # (sum over the 3 stacked streams == sum3) and zero read-vectors.
    rv_dim = pnd_g_ref.shape[-1] - sum3.shape[-1]
    proj1 = jnp.concatenate([sum3, jnp.zeros((B, rv_dim), f32)], axis=-1)
    proj1 = layernorm(proj1, pnd_g_ref[...], pnd_b_ref[...])
    proj1 = jnp.maximum(
        jnp.dot(proj1.astype(bf16), ld_w_ref[...],
                preferred_element_type=f32) + ld_b_ref[...],
        0.0)

    logits = (jnp.dot((proj0 + proj1).astype(bf16), proj_w_ref[...],
                      preferred_element_type=f32) + proj_b_ref[...])
    o_ref[...] = jax.nn.sigmoid(logits)


# ----------------------------------------------------------------------------
# Wrapper
# ----------------------------------------------------------------------------
def make_mask(feature):
    """(B, S, F) -> (B, S) float mask: 1.0 where the feature row is all-zero."""
    return (jnp.sum(jnp.abs(feature), axis=-1) == 0).astype(jnp.float32)


def net1_forward(params, frame_feat, clip_feat, ques_ix, C=Cfg):
    B, Tq = ques_ix.shape
    Tf = frame_feat.shape[1]
    H = C.HIDDEN_SIZE

    # pad the clip stream to the frame length so it shares (B, 8, 128) tiles;
    # the zero rows are masked exactly like real padding (zero-cost win).
    Tc = clip_feat.shape[1]
    if Tc < Tf:
        clip_feat = jnp.pad(clip_feat, ((0, 0), (0, Tf - Tc), (0, 0)))

    # masks with the sequence on the sublane axis: (B, S, 1)
    lang_mask = make_mask(ques_ix[..., None].astype(jnp.float32))[..., None]
    frame_mask = make_mask(frame_feat)[..., None]
    clip_mask = make_mask(clip_feat)[..., None]

    # embedding gather stays in plain JAX (single XLA gather at this size)
    lang_emb = jnp.take(params['embedding'], ques_ix, axis=0)    # (B, Tq, E)

    vmem = lambda: pl.BlockSpec(memory_space=pltpu.MemorySpace.VMEM)
    smem = lambda: pl.BlockSpec(memory_space=pltpu.MemorySpace.SMEM)
    row = lambda b: b.reshape(1, -1)     # biases as (1, N) rows for lane broadcast
    bf = lambda w: w.astype(jnp.bfloat16)   # MXU weight operands only

    # fuse the three merge-linears: concat weights along rows, sum the biases
    att_wm_cat = bf(params['att_wm'].reshape(
        3 * H * C.FLAT_GLIMPSES, C.FLAT_OUT_SIZE))               # (3H, OUT)
    att_bm_sum = jnp.sum(params['att_bm'], axis=0)               # (1, OUT)

    packed = [
        (lang_emb, vmem()),
        (frame_feat, vmem()),
        (clip_feat, vmem()),
        (lang_mask, vmem()),
        (frame_mask, vmem()),
        (clip_mask, vmem()),
        (bf(params['lstm_w_ih']), vmem()),
        (bf(params['lstm_w_hh']), vmem()),
        (row(params['lstm_b']), vmem()),
        (bf(params['frame_w']), vmem()),
        (row(params['frame_b']), vmem()),
        (bf(params['clip_w']), vmem()),
        (row(params['clip_b']), vmem()),
        (bf(params['att_w1']), vmem()),
        (params['att_b1'], vmem()),
        (params['att_w2'], vmem()),          # f32: VPU operand (v5e-safe)
        (params['att_b2'], smem()),          # per-stream scalar bias -> SMEM
        (att_wm_cat, vmem()),
        (att_bm_sum, vmem()),
        (row(params['proj_norm_g']), vmem()),
        (row(params['proj_norm_b']), vmem()),
        (row(params['proj_norm_dnc_g']), vmem()),
        (row(params['proj_norm_dnc_b']), vmem()),
        (bf(params['linear_dnc_w']), vmem()),
        (row(params['linear_dnc_b']), vmem()),
        (bf(params['proj_w']), vmem()),
        (row(params['proj_b']), vmem()),
    ]
    inputs, in_specs = zip(*packed)

    return pl.pallas_call(
        _net1_fused_kernel,
        in_specs=list(in_specs),
        out_specs=pl.BlockSpec(memory_space=pltpu.MemorySpace.VMEM),
        out_shape=jax.ShapeDtypeStruct((B, ANSWER_SIZE), jnp.float32),
    )(*inputs)


# ----------------------------------------------------------------------------
# Parameter init (deterministic, synthetic)
# ----------------------------------------------------------------------------
def init_params(key, C):
    ks = iter(jax.random.split(key, 64))

    def nrm(shape, scale=0.05):
        return (scale * jax.random.normal(next(ks), shape)).astype(jnp.float32)

    assert C.FLAT_GLIMPSES == 1   # fused AttFlat path assumes a single glimpse
    dnc_dim = C.FLAT_OUT_SIZE + C.N_READ_HEADS_DNC * C.WORD_LENGTH_DNC
    return {
        'embedding': nrm((TOKEN_SIZE, C.WORD_EMBED_SIZE), 0.1),
        'lstm_w_ih': nrm((C.WORD_EMBED_SIZE, 4 * C.HIDDEN_SIZE)),
        'lstm_w_hh': nrm((C.HIDDEN_SIZE, 4 * C.HIDDEN_SIZE)),
        'lstm_b': jnp.zeros((4 * C.HIDDEN_SIZE,), jnp.float32),   # = b_ih + b_hh
        'frame_w': nrm((C.FRAME_FEAT_SIZE, C.HIDDEN_SIZE)),
        'frame_b': jnp.zeros((C.HIDDEN_SIZE,), jnp.float32),
        'clip_w': nrm((C.CLIP_FEAT_SIZE, C.HIDDEN_SIZE)),
        'clip_b': jnp.zeros((C.HIDDEN_SIZE,), jnp.float32),
        # AttFlat params stacked over the 3 streams [lang, frame, clip]
        'att_w1': nrm((3, C.HIDDEN_SIZE, C.FLAT_MLP_SIZE)),
        'att_b1': jnp.zeros((3, 1, C.FLAT_MLP_SIZE), jnp.float32),
        'att_w2': nrm((3, 1, C.FLAT_MLP_SIZE)),           # (M, G=1) squeezed
        'att_b2': jnp.zeros((3,), jnp.float32),
        'att_wm': nrm((3, C.HIDDEN_SIZE * C.FLAT_GLIMPSES, C.FLAT_OUT_SIZE)),
        'att_bm': jnp.zeros((3, 1, C.FLAT_OUT_SIZE), jnp.float32),
        'proj_norm_g': jnp.ones((C.FLAT_OUT_SIZE,), jnp.float32),
        'proj_norm_b': jnp.zeros((C.FLAT_OUT_SIZE,), jnp.float32),
        'proj_norm_dnc_g': jnp.ones((dnc_dim,), jnp.float32),
        'proj_norm_dnc_b': jnp.zeros((dnc_dim,), jnp.float32),
        'linear_dnc_w': nrm((dnc_dim, C.FLAT_OUT_SIZE)),
        'linear_dnc_b': jnp.zeros((C.FLAT_OUT_SIZE,), jnp.float32),
        'proj_w': nrm((C.FLAT_OUT_SIZE, ANSWER_SIZE)),
        'proj_b': jnp.zeros((ANSWER_SIZE,), jnp.float32),
    }


# ----------------------------------------------------------------------------
# Main
# ----------------------------------------------------------------------------
if __name__ == "__main__":
    key = jax.random.PRNGKey(0)
    k_p, k_f, k_c, k_q = jax.random.split(key, 4)

    params = init_params(k_p, Cfg)

    frame_feat = jax.random.normal(
        k_f, (BATCH, T_FRAME, Cfg.FRAME_FEAT_SIZE), jnp.float32)
    clip_feat = jax.random.normal(
        k_c, (BATCH, T_CLIP, Cfg.CLIP_FEAT_SIZE), jnp.float32)
    ques_ix = jax.random.randint(k_q, (BATCH, T_QUES), 1, TOKEN_SIZE)

    # introduce padding so the masks are exercised
    ques_ix = ques_ix.at[0, -2:].set(0)
    frame_feat = frame_feat.at[:, -1, :].set(0.0)
    clip_feat = clip_feat.at[:, -1, :].set(0.0)

    out = jax.jit(net1_forward)(params, frame_feat, clip_feat, ques_ix)
    out = jax.block_until_ready(out)

    assert out.shape == (BATCH, ANSWER_SIZE)
    assert bool(jnp.all(jnp.isfinite(out)))
    assert bool(jnp.all((out >= 0.0) & (out <= 1.0)))
    print("KERNEL_OK")
</pallas_src>

<mosaic_0001>
module attributes {stable_mosaic.version = 11 : i64} {
  func.func @_net1_fused_kernel(%arg0: memref<2x8x64xf32, #tpu.memory_space<vmem>>, %arg1: memref<2x8x128xf32, #tpu.memory_space<vmem>>, %arg2: memref<2x8x128xf32, #tpu.memory_space<vmem>>, %arg3: memref<2x8x1xf32, #tpu.memory_space<vmem>>, %arg4: memref<2x8x1xf32, #tpu.memory_space<vmem>>, %arg5: memref<2x8x1xf32, #tpu.memory_space<vmem>>, %arg6: memref<64x512xbf16, #tpu.memory_space<vmem>>, %arg7: memref<128x512xbf16, #tpu.memory_space<vmem>>, %arg8: memref<1x512xf32, #tpu.memory_space<vmem>>, %arg9: memref<128x128xbf16, #tpu.memory_space<vmem>>, %arg10: memref<1x128xf32, #tpu.memory_space<vmem>>, %arg11: memref<128x128xbf16, #tpu.memory_space<vmem>>, %arg12: memref<1x128xf32, #tpu.memory_space<vmem>>, %arg13: memref<3x128x128xbf16, #tpu.memory_space<vmem>>, %arg14: memref<3x1x128xf32, #tpu.memory_space<vmem>>, %arg15: memref<3x1x128xf32, #tpu.memory_space<vmem>>, %arg16: memref<3xf32, #tpu.memory_space<smem>>, %arg17: memref<384x256xbf16, #tpu.memory_space<vmem>>, %arg18: memref<1x256xf32, #tpu.memory_space<vmem>>, %arg19: memref<1x256xf32, #tpu.memory_space<vmem>>, %arg20: memref<1x256xf32, #tpu.memory_space<vmem>>, %arg21: memref<1x384xf32, #tpu.memory_space<vmem>>, %arg22: memref<1x384xf32, #tpu.memory_space<vmem>>, %arg23: memref<384x256xbf16, #tpu.memory_space<vmem>>, %arg24: memref<1x256xf32, #tpu.memory_space<vmem>>, %arg25: memref<256x16xbf16, #tpu.memory_space<vmem>>, %arg26: memref<1x16xf32, #tpu.memory_space<vmem>>, %arg27: memref<2x16xf32, #tpu.memory_space<vmem>>) attributes {dimension_semantics = [], scalar_prefetch = 0 : i64, scratch_operands = 0 : i64, tpu.core_type = #tpu.core_type<tc>} {
    %c0 = arith.constant 0 : index
    %c0_0 = arith.constant 0 : index
    %c0_1 = arith.constant 0 : index
    %0 = vector.load %arg0[%c0, %c0_0, %c0_1] : memref<2x8x64xf32, #tpu.memory_space<vmem>>, vector<2x8x64xf32>
    %1 = vector.shape_cast %0 : vector<2x8x64xf32> to vector<16x64xf32>
    %2 = arith.truncf %1 : vector<16x64xf32> to vector<16x64xbf16>
    %c0_2 = arith.constant 0 : index
    %c0_3 = arith.constant 0 : index
    %3 = vector.load %arg6[%c0_2, %c0_3] : memref<64x512xbf16, #tpu.memory_space<vmem>>, vector<64x512xbf16>
    %cst = arith.constant dense<0.000000e+00> : vector<16x512xf32>
    %4 = tpu.matmul %2, %3, %cst {dimension_numbers = #tpu.dot_dimension_numbers<[1], [0], [0], [1], [0, 0, 1, 1], [], []>} : vector<16x64xbf16>, vector<64x512xbf16>, vector<16x512xf32> -> vector<16x512xf32>
    %c0_4 = arith.constant 0 : index
    %c0_5 = arith.constant 0 : index
    %5 = vector.load %arg8[%c0_4, %c0_5] : memref<1x512xf32, #tpu.memory_space<vmem>>, vector<1x512xf32>
    %6 = vector.broadcast %5 : vector<1x512xf32> to vector<16x512xf32>
    %7 = arith.addf %4, %6 : vector<16x512xf32>
    %8 = vector.shape_cast %7 : vector<16x512xf32> to vector<2x8x512xf32>
    %c0_6 = arith.constant 0 : index
    %c0_7 = arith.constant 0 : index
    %9 = vector.load %arg7[%c0_6, %c0_7] : memref<128x512xbf16, #tpu.memory_space<vmem>>, vector<128x512xbf16>
    %cst_8 = arith.constant 0.000000e+00 : f32
    %10 = vector.broadcast %cst_8 : f32 to vector<2x128xf32>
    %cst_9 = arith.constant 0.000000e+00 : f32
    %11 = vector.broadcast %cst_9 : f32 to vector<2x128xf32>
    %12 = vector.extract_strided_slice %8 {offsets = [0, 0, 0], sizes = [2, 1, 512], strides = [1, 1, 1]} : vector<2x8x512xf32> to vector<2x1x512xf32>
    %13 = vector.shape_cast %12 : vector<2x1x512xf32> to vector<2x512xf32>
    %14 = arith.truncf %10 : vector<2x128xf32> to vector<2x128xbf16>
    %cst_10 = arith.constant dense<0.000000e+00> : vector<2x512xf32>
    %15 = tpu.matmul %14, %9, %cst_10 {dimension_numbers = #tpu.dot_dimension_numbers<[1], [0], [0], [1], [0, 0, 1, 1], [], []>} : vector<2x128xbf16>, vector<128x512xbf16>, vector<2x512xf32> -> vector<2x512xf32>
    %16 = arith.addf %13, %15 : vector<2x512xf32>
    %17 = vector.extract_strided_slice %16 {offsets = [0, 0], sizes = [2, 128], strides = [1, 1]} : vector<2x512xf32> to vector<2x128xf32>
    %18 = arith.negf %17 : vector<2x128xf32>
    %19 = math.exp %18 : vector<2x128xf32>
    %cst_11 = arith.constant 1.000000e+00 : f32
    %20 = vector.broadcast %cst_11 : f32 to vector<2x128xf32>
    %21 = arith.addf %20, %19 : vector<2x128xf32>
    %22 = arith.divf %20, %21 : vector<2x128xf32>
    %23 = vector.extract_strided_slice %16 {offsets = [0, 128], sizes = [2, 128], strides = [1, 1]} : vector<2x512xf32> to vector<2x128xf32>
    %24 = arith.negf %23 : vector<2x128xf32>
    %25 = math.exp %24 : vector<2x128xf32>
    %cst_12 = arith.constant 1.000000e+00 : f32
    %26 = vector.broadcast %cst_12 : f32 to vector<2x128xf32>
    %27 = arith.addf %26, %25 : vector<2x128xf32>
    %28 = arith.divf %26, %27 : vector<2x128xf32>
    %29 = vector.extract_strided_slice %16 {offsets = [0, 256], sizes = [2, 128], strides = [1, 1]} : vector<2x512xf32> to vector<2x128xf32>
    %30 = math.tanh %29 : vector<2x128xf32>
    %31 = vector.extract_strided_slice %16 {offsets = [0, 384], sizes = [2, 128], strides = [1, 1]} : vector<2x512xf32> to vector<2x128xf32>
    %32 = arith.negf %31 : vector<2x128xf32>
    %33 = math.exp %32 : vector<2x128xf32>
    %cst_13 = arith.constant 1.000000e+00 : f32
    %34 = vector.broadcast %cst_13 : f32 to vector<2x128xf32>
    %35 = arith.addf %34, %33 : vector<2x128xf32>
    %36 = arith.divf %34, %35 : vector<2x128xf32>
    %37 = arith.mulf %28, %11 : vector<2x128xf32>
    %38 = arith.mulf %22, %30 : vector<2x128xf32>
    %39 = arith.addf %37, %38 : vector<2x128xf32>
    %40 = math.tanh %39 : vector<2x128xf32>
    %41 = arith.mulf %36, %40 : vector<2x128xf32>
    %42 = vector.extract_strided_slice %8 {offsets = [0, 1, 0], sizes = [2, 1, 512], strides = [1, 1, 1]} : vector<2x8x512xf32> to vector<2x1x512xf32>
    %43 = vector.shape_cast %42 : vector<2x1x512xf32> to vector<2x512xf32>
    %44 = arith.truncf %41 : vector<2x128xf32> to vector<2x128xbf16>
    %cst_14 = arith.constant dense<0.000000e+00> : vector<2x512xf32>
    %45 = tpu.matmul %44, %9, %cst_14 {dimension_numbers = #tpu.dot_dimension_numbers<[1], [0], [0], [1], [0, 0, 1, 1], [], []>} : vector<2x128xbf16>, vector<128x512xbf16>, vector<2x512xf32> -> vector<2x512xf32>
    %46 = arith.addf %43, %45 : vector<2x512xf32>
    %47 = vector.extract_strided_slice %46 {offsets = [0, 0], sizes = [2, 128], strides = [1, 1]} : vector<2x512xf32> to vector<2x128xf32>
    %48 = arith.negf %47 : vector<2x128xf32>
    %49 = math.exp %48 : vector<2x128xf32>
    %cst_15 = arith.constant 1.000000e+00 : f32
    %50 = vector.broadcast %cst_15 : f32 to vector<2x128xf32>
    %51 = arith.addf %50, %49 : vector<2x128xf32>
    %52 = arith.divf %50, %51 : vector<2x128xf32>
    %53 = vector.extract_strided_slice %46 {offsets = [0, 128], sizes = [2, 128], strides = [1, 1]} : vector<2x512xf32> to vector<2x128xf32>
    %54 = arith.negf %53 : vector<2x128xf32>
    %55 = math.exp %54 : vector<2x128xf32>
    %cst_16 = arith.constant 1.000000e+00 : f32
    %56 = vector.broadcast %cst_16 : f32 to vector<2x128xf32>
    %57 = arith.addf %56, %55 : vector<2x128xf32>
    %58 = arith.divf %56, %57 : vector<2x128xf32>
    %59 = vector.extract_strided_slice %46 {offsets = [0, 256], sizes = [2, 128], strides = [1, 1]} : vector<2x512xf32> to vector<2x128xf32>
    %60 = math.tanh %59 : vector<2x128xf32>
    %61 = vector.extract_strided_slice %46 {offsets = [0, 384], sizes = [2, 128], strides = [1, 1]} : vector<2x512xf32> to vector<2x128xf32>
    %62 = arith.negf %61 : vector<2x128xf32>
    %63 = math.exp %62 : vector<2x128xf32>
    %cst_17 = arith.constant 1.000000e+00 : f32
    %64 = vector.broadcast %cst_17 : f32 to vector<2x128xf32>
    %65 = arith.addf %64, %63 : vector<2x128xf32>
    %66 = arith.divf %64, %65 : vector<2x128xf32>
    %67 = arith.mulf %58, %39 : vector<2x128xf32>
    %68 = arith.mulf %52, %60 : vector<2x128xf32>
    %69 = arith.addf %67, %68 : vector<2x128xf32>
    %70 = math.tanh %69 : vector<2x128xf32>
    %71 = arith.mulf %66, %70 : vector<2x128xf32>
    %72 = vector.extract_strided_slice %8 {offsets = [0, 2, 0], sizes = [2, 1, 512], strides = [1, 1, 1]} : vector<2x8x512xf32> to vector<2x1x512xf32>
    %73 = vector.shape_cast %72 : vector<2x1x512xf32> to vector<2x512xf32>
    %74 = arith.truncf %71 : vector<2x128xf32> to vector<2x128xbf16>
    %cst_18 = arith.constant dense<0.000000e+00> : vector<2x512xf32>
    %75 = tpu.matmul %74, %9, %cst_18 {dimension_numbers = #tpu.dot_dimension_numbers<[1], [0], [0], [1], [0, 0, 1, 1], [], []>} : vector<2x128xbf16>, vector<128x512xbf16>, vector<2x512xf32> -> vector<2x512xf32>
    %76 = arith.addf %73, %75 : vector<2x512xf32>
    %77 = vector.extract_strided_slice %76 {offsets = [0, 0], sizes = [2, 128], strides = [1, 1]} : vector<2x512xf32> to vector<2x128xf32>
    %78 = arith.negf %77 : vector<2x128xf32>
    %79 = math.exp %78 : vector<2x128xf32>
    %cst_19 = arith.constant 1.000000e+00 : f32
    %80 = vector.broadcast %cst_19 : f32 to vector<2x128xf32>
    %81 = arith.addf %80, %79 : vector<2x128xf32>
    %82 = arith.divf %80, %81 : vector<2x128xf32>
    %83 = vector.extract_strided_slice %76 {offsets = [0, 128], sizes = [2, 128], strides = [1, 1]} : vector<2x512xf32> to vector<2x128xf32>
    %84 = arith.negf %83 : vector<2x128xf32>
    %85 = math.exp %84 : vector<2x128xf32>
    %cst_20 = arith.constant 1.000000e+00 : f32
    %86 = vector.broadcast %cst_20 : f32 to vector<2x128xf32>
    %87 = arith.addf %86, %85 : vector<2x128xf32>
    %88 = arith.divf %86, %87 : vector<2x128xf32>
    %89 = vector.extract_strided_slice %76 {offsets = [0, 256], sizes = [2, 128], strides = [1, 1]} : vector<2x512xf32> to vector<2x128xf32>
    %90 = math.tanh %89 : vector<2x128xf32>
    %91 = vector.extract_strided_slice %76 {offsets = [0, 384], sizes = [2, 128], strides = [1, 1]} : vector<2x512xf32> to vector<2x128xf32>
    %92 = arith.negf %91 : vector<2x128xf32>
    %93 = math.exp %92 : vector<2x128xf32>
    %cst_21 = arith.constant 1.000000e+00 : f32
    %94 = vector.broadcast %cst_21 : f32 to vector<2x128xf32>
    %95 = arith.addf %94, %93 : vector<2x128xf32>
    %96 = arith.divf %94, %95 : vector<2x128xf32>
    %97 = arith.mulf %88, %69 : vector<2x128xf32>
    %98 = arith.mulf %82, %90 : vector<2x128xf32>
    %99 = arith.addf %97, %98 : vector<2x128xf32>
    %100 = math.tanh %99 : vector<2x128xf32>
    %101 = arith.mulf %96, %100 : vector<2x128xf32>
    %102 = vector.extract_strided_slice %8 {offsets = [0, 3, 0], sizes = [2, 1, 512], strides = [1, 1, 1]} : vector<2x8x512xf32> to vector<2x1x512xf32>
    %103 = vector.shape_cast %102 : vector<2x1x512xf32> to vector<2x512xf32>
    %104 = arith.truncf %101 : vector<2x128xf32> to vector<2x128xbf16>
    %cst_22 = arith.constant dense<0.000000e+00> : vector<2x512xf32>
    %105 = tpu.matmul %104, %9, %cst_22 {dimension_numbers = #tpu.dot_dimension_numbers<[1], [0], [0], [1], [0, 0, 1, 1], [], []>} : vector<2x128xbf16>, vector<128x512xbf16>, vector<2x512xf32> -> vector<2x512xf32>
    %106 = arith.addf %103, %105 : vector<2x512xf32>
    %107 = vector.extract_strided_slice %106 {offsets = [0, 0], sizes = [2, 128], strides = [1, 1]} : vector<2x512xf32> to vector<2x128xf32>
    %108 = arith.negf %107 : vector<2x128xf32>
    %109 = math.exp %108 : vector<2x128xf32>
    %cst_23 = arith.constant 1.000000e+00 : f32
    %110 = vector.broadcast %cst_23 : f32 to vector<2x128xf32>
    %111 = arith.addf %110, %109 : vector<2x128xf32>
    %112 = arith.divf %110, %111 : vector<2x128xf32>
    %113 = vector.extract_strided_slice %106 {offsets = [0, 128], sizes = [2, 128], strides = [1, 1]} : vector<2x512xf32> to vector<2x128xf32>
    %114 = arith.negf %113 : vector<2x128xf32>
    %115 = math.exp %114 : vector<2x128xf32>
    %cst_24 = arith.constant 1.000000e+00 : f32
    %116 = vector.broadcast %cst_24 : f32 to vector<2x128xf32>
    %117 = arith.addf %116, %115 : vector<2x128xf32>
    %118 = arith.divf %116, %117 : vector<2x128xf32>
    %119 = vector.extract_strided_slice %106 {offsets = [0, 256], sizes = [2, 128], strides = [1, 1]} : vector<2x512xf32> to vector<2x128xf32>
    %120 = math.tanh %119 : vector<2x128xf32>
    %121 = vector.extract_strided_slice %106 {offsets = [0, 384], sizes = [2, 128], strides = [1, 1]} : vector<2x512xf32> to vector<2x128xf32>
    %122 = arith.negf %121 : vector<2x128xf32>
    %123 = math.exp %122 : vector<2x128xf32>
    %cst_25 = arith.constant 1.000000e+00 : f32
    %124 = vector.broadcast %cst_25 : f32 to vector<2x128xf32>
    %125 = arith.addf %124, %123 : vector<2x128xf32>
    %126 = arith.divf %124, %125 : vector<2x128xf32>
    %127 = arith.mulf %118, %99 : vector<2x128xf32>
    %128 = arith.mulf %112, %120 : vector<2x128xf32>
    %129 = arith.addf %127, %128 : vector<2x128xf32>
    %130 = math.tanh %129 : vector<2x128xf32>
    %131 = arith.mulf %126, %130 : vector<2x128xf32>
    %132 = vector.extract_strided_slice %8 {offsets = [0, 4, 0], sizes = [2, 1, 512], strides = [1, 1, 1]} : vector<2x8x512xf32> to vector<2x1x512xf32>
    %133 = vector.shape_cast %132 : vector<2x1x512xf32> to vector<2x512xf32>
    %134 = arith.truncf %131 : vector<2x128xf32> to vector<2x128xbf16>
    %cst_26 = arith.constant dense<0.000000e+00> : vector<2x512xf32>
    %135 = tpu.matmul %134, %9, %cst_26 {dimension_numbers = #tpu.dot_dimension_numbers<[1], [0], [0], [1], [0, 0, 1, 1], [], []>} : vector<2x128xbf16>, vector<128x512xbf16>, vector<2x512xf32> -> vector<2x512xf32>
    %136 = arith.addf %133, %135 : vector<2x512xf32>
    %137 = vector.extract_strided_slice %136 {offsets = [0, 0], sizes = [2, 128], strides = [1, 1]} : vector<2x512xf32> to vector<2x128xf32>
    %138 = arith.negf %137 : vector<2x128xf32>
    %139 = math.exp %138 : vector<2x128xf32>
    %cst_27 = arith.constant 1.000000e+00 : f32
    %140 = vector.broadcast %cst_27 : f32 to vector<2x128xf32>
    %141 = arith.addf %140, %139 : vector<2x128xf32>
    %142 = arith.divf %140, %141 : vector<2x128xf32>
    %143 = vector.extract_strided_slice %136 {offsets = [0, 128], sizes = [2, 128], strides = [1, 1]} : vector<2x512xf32> to vector<2x128xf32>
    %144 = arith.negf %143 : vector<2x128xf32>
    %145 = math.exp %144 : vector<2x128xf32>
    %cst_28 = arith.constant 1.000000e+00 : f32
    %146 = vector.broadcast %cst_28 : f32 to vector<2x128xf32>
    %147 = arith.addf %146, %145 : vector<2x128xf32>
    %148 = arith.divf %146, %147 : vector<2x128xf32>
    %149 = vector.extract_strided_slice %136 {offsets = [0, 256], sizes = [2, 128], strides = [1, 1]} : vector<2x512xf32> to vector<2x128xf32>
    %150 = math.tanh %149 : vector<2x128xf32>
    %151 = vector.extract_strided_slice %136 {offsets = [0, 384], sizes = [2, 128], strides = [1, 1]} : vector<2x512xf32> to vector<2x128xf32>
    %152 = arith.negf %151 : vector<2x128xf32>
    %153 = math.exp %152 : vector<2x128xf32>
    %cst_29 = arith.constant 1.000000e+00 : f32
    %154 = vector.broadcast %cst_29 : f32 to vector<2x128xf32>
    %155 = arith.addf %154, %153 : vector<2x128xf32>
    %156 = arith.divf %154, %155 : vector<2x128xf32>
    %157 = arith.mulf %148, %129 : vector<2x128xf32>
    %158 = arith.mulf %142, %150 : vector<2x128xf32>
    %159 = arith.addf %157, %158 : vector<2x128xf32>
    %160 = math.tanh %159 : vector<2x128xf32>
    %161 = arith.mulf %156, %160 : vector<2x128xf32>
    %162 = vector.extract_strided_slice %8 {offsets = [0, 5, 0], sizes = [2, 1, 512], strides = [1, 1, 1]} : vector<2x8x512xf32> to vector<2x1x512xf32>
    %163 = vector.shape_cast %162 : vector<2x1x512xf32> to vector<2x512xf32>
    %164 = arith.truncf %161 : vector<2x128xf32> to vector<2x128xbf16>
    %cst_30 = arith.constant dense<0.000000e+00> : vector<2x512xf32>
    %165 = tpu.matmul %164, %9, %cst_30 {dimension_numbers = #tpu.dot_dimension_numbers<[1], [0], [0], [1], [0, 0, 1, 1], [], []>} : vector<2x128xbf16>, vector<128x512xbf16>, vector<2x512xf32> -> vector<2x512xf32>
    %166 = arith.addf %163, %165 : vector<2x512xf32>
    %167 = vector.extract_strided_slice %166 {offsets = [0, 0], sizes = [2, 128], strides = [1, 1]} : vector<2x512xf32> to vector<2x128xf32>
    %168 = arith.negf %167 : vector<2x128xf32>
    %169 = math.exp %168 : vector<2x128xf32>
    %cst_31 = arith.constant 1.000000e+00 : f32
    %170 = vector.broadcast %cst_31 : f32 to vector<2x128xf32>
    %171 = arith.addf %170, %169 : vector<2x128xf32>
    %172 = arith.divf %170, %171 : vector<2x128xf32>
    %173 = vector.extract_strided_slice %166 {offsets = [0, 128], sizes = [2, 128], strides = [1, 1]} : vector<2x512xf32> to vector<2x128xf32>
    %174 = arith.negf %173 : vector<2x128xf32>
    %175 = math.exp %174 : vector<2x128xf32>
    %cst_32 = arith.constant 1.000000e+00 : f32
    %176 = vector.broadcast %cst_32 : f32 to vector<2x128xf32>
    %177 = arith.addf %176, %175 : vector<2x128xf32>
    %178 = arith.divf %176, %177 : vector<2x128xf32>
    %179 = vector.extract_strided_slice %166 {offsets = [0, 256], sizes = [2, 128], strides = [1, 1]} : vector<2x512xf32> to vector<2x128xf32>
    %180 = math.tanh %179 : vector<2x128xf32>
    %181 = vector.extract_strided_slice %166 {offsets = [0, 384], sizes = [2, 128], strides = [1, 1]} : vector<2x512xf32> to vector<2x128xf32>
    %182 = arith.negf %181 : vector<2x128xf32>
    %183 = math.exp %182 : vector<2x128xf32>
    %cst_33 = arith.constant 1.000000e+00 : f32
    %184 = vector.broadcast %cst_33 : f32 to vector<2x128xf32>
    %185 = arith.addf %184, %183 : vector<2x128xf32>
    %186 = arith.divf %184, %185 : vector<2x128xf32>
    %187 = arith.mulf %178, %159 : vector<2x128xf32>
    %188 = arith.mulf %172, %180 : vector<2x128xf32>
    %189 = arith.addf %187, %188 : vector<2x128xf32>
    %190 = math.tanh %189 : vector<2x128xf32>
    %191 = arith.mulf %186, %190 : vector<2x128xf32>
    %192 = vector.extract_strided_slice %8 {offsets = [0, 6, 0], sizes = [2, 1, 512], strides = [1, 1, 1]} : vector<2x8x512xf32> to vector<2x1x512xf32>
    %193 = vector.shape_cast %192 : vector<2x1x512xf32> to vector<2x512xf32>
    %194 = arith.truncf %191 : vector<2x128xf32> to vector<2x128xbf16>
    %cst_34 = arith.constant dense<0.000000e+00> : vector<2x512xf32>
    %195 = tpu.matmul %194, %9, %cst_34 {dimension_numbers = #tpu.dot_dimension_numbers<[1], [0], [0], [1], [0, 0, 1, 1], [], []>} : vector<2x128xbf16>, vector<128x512xbf16>, vector<2x512xf32> -> vector<2x512xf32>
    %196 = arith.addf %193, %195 : vector<2x512xf32>
    %197 = vector.extract_strided_slice %196 {offsets = [0, 0], sizes = [2, 128], strides = [1, 1]} : vector<2x512xf32> to vector<2x128xf32>
    %198 = arith.negf %197 : vector<2x128xf32>
    %199 = math.exp %198 : vector<2x128xf32>
    %cst_35 = arith.constant 1.000000e+00 : f32
    %200 = vector.broadcast %cst_35 : f32 to vector<2x128xf32>
    %201 = arith.addf %200, %199 : vector<2x128xf32>
    %202 = arith.divf %200, %201 : vector<2x128xf32>
    %203 = vector.extract_strided_slice %196 {offsets = [0, 128], sizes = [2, 128], strides = [1, 1]} : vector<2x512xf32> to vector<2x128xf32>
    %204 = arith.negf %203 : vector<2x128xf32>
    %205 = math.exp %204 : vector<2x128xf32>
    %cst_36 = arith.constant 1.000000e+00 : f32
    %206 = vector.broadcast %cst_36 : f32 to vector<2x128xf32>
    %207 = arith.addf %206, %205 : vector<2x128xf32>
    %208 = arith.divf %206, %207 : vector<2x128xf32>
    %209 = vector.extract_strided_slice %196 {offsets = [0, 256], sizes = [2, 128], strides = [1, 1]} : vector<2x512xf32> to vector<2x128xf32>
    %210 = math.tanh %209 : vector<2x128xf32>
    %211 = vector.extract_strided_slice %196 {offsets = [0, 384], sizes = [2, 128], strides = [1, 1]} : vector<2x512xf32> to vector<2x128xf32>
    %212 = arith.negf %211 : vector<2x128xf32>
    %213 = math.exp %212 : vector<2x128xf32>
    %cst_37 = arith.constant 1.000000e+00 : f32
    %214 = vector.broadcast %cst_37 : f32 to vector<2x128xf32>
    %215 = arith.addf %214, %213 : vector<2x128xf32>
    %216 = arith.divf %214, %215 : vector<2x128xf32>
    %217 = arith.mulf %208, %189 : vector<2x128xf32>
    %218 = arith.mulf %202, %210 : vector<2x128xf32>
    %219 = arith.addf %217, %218 : vector<2x128xf32>
    %220 = math.tanh %219 : vector<2x128xf32>
    %221 = arith.mulf %216, %220 : vector<2x128xf32>
    %222 = vector.extract_strided_slice %8 {offsets = [0, 7, 0], sizes = [2, 1, 512], strides = [1, 1, 1]} : vector<2x8x512xf32> to vector<2x1x512xf32>
    %223 = vector.shape_cast %222 : vector<2x1x512xf32> to vector<2x512xf32>
    %224 = arith.truncf %221 : vector<2x128xf32> to vector<2x128xbf16>
    %cst_38 = arith.constant dense<0.000000e+00> : vector<2x512xf32>
    %225 = tpu.matmul %224, %9, %cst_38 {dimension_numbers = #tpu.dot_dimension_numbers<[1], [0], [0], [1], [0, 0, 1, 1], [], []>} : vector<2x128xbf16>, vector<128x512xbf16>, vector<2x512xf32> -> vector<2x512xf32>
    %226 = arith.addf %223, %225 : vector<2x512xf32>
    %227 = vector.extract_strided_slice %226 {offsets = [0, 0], sizes = [2, 128], strides = [1, 1]} : vector<2x512xf32> to vector<2x128xf32>
    %228 = arith.negf %227 : vector<2x128xf32>
    %229 = math.exp %228 : vector<2x128xf32>
    %cst_39 = arith.constant 1.000000e+00 : f32
    %230 = vector.broadcast %cst_39 : f32 to vector<2x128xf32>
    %231 = arith.addf %230, %229 : vector<2x128xf32>
    %232 = arith.divf %230, %231 : vector<2x128xf32>
    %233 = vector.extract_strided_slice %226 {offsets = [0, 128], sizes = [2, 128], strides = [1, 1]} : vector<2x512xf32> to vector<2x128xf32>
    %234 = arith.negf %233 : vector<2x128xf32>
    %235 = math.exp %234 : vector<2x128xf32>
    %cst_40 = arith.constant 1.000000e+00 : f32
    %236 = vector.broadcast %cst_40 : f32 to vector<2x128xf32>
    %237 = arith.addf %236, %235 : vector<2x128xf32>
    %238 = arith.divf %236, %237 : vector<2x128xf32>
    %239 = vector.extract_strided_slice %226 {offsets = [0, 256], sizes = [2, 128], strides = [1, 1]} : vector<2x512xf32> to vector<2x128xf32>
    %240 = math.tanh %239 : vector<2x128xf32>
    %241 = vector.extract_strided_slice %226 {offsets = [0, 384], sizes = [2, 128], strides = [1, 1]} : vector<2x512xf32> to vector<2x128xf32>
    %242 = arith.negf %241 : vector<2x128xf32>
    %243 = math.exp %242 : vector<2x128xf32>
    %cst_41 = arith.constant 1.000000e+00 : f32
    %244 = vector.broadcast %cst_41 : f32 to vector<2x128xf32>
    %245 = arith.addf %244, %243 : vector<2x128xf32>
    %246 = arith.divf %244, %245 : vector<2x128xf32>
    %247 = arith.mulf %238, %219 : vector<2x128xf32>
    %248 = arith.mulf %232, %240 : vector<2x128xf32>
    %249 = arith.addf %247, %248 : vector<2x128xf32>
    %250 = math.tanh %249 : vector<2x128xf32>
    %251 = arith.mulf %246, %250 : vector<2x128xf32>
    %252 = vector.shape_cast %41 : vector<2x128xf32> to vector<2x1x128xf32>
    %253 = vector.shape_cast %71 : vector<2x128xf32> to vector<2x1x128xf32>
    %254 = vector.shape_cast %101 : vector<2x128xf32> to vector<2x1x128xf32>
    %255 = vector.shape_cast %131 : vector<2x128xf32> to vector<2x1x128xf32>
    %256 = vector.shape_cast %161 : vector<2x128xf32> to vector<2x1x128xf32>
    %257 = vector.shape_cast %191 : vector<2x128xf32> to vector<2x1x128xf32>
    %258 = vector.shape_cast %221 : vector<2x128xf32> to vector<2x1x128xf32>
    %259 = vector.shape_cast %251 : vector<2x128xf32> to vector<2x1x128xf32>
    %260 = tpu.concatenate %252, %253, %254, %255, %256, %257, %258, %259 in 1 : vector<2x1x128xf32>, vector<2x1x128xf32>, vector<2x1x128xf32>, vector<2x1x128xf32>, vector<2x1x128xf32>, vector<2x1x128xf32>, vector<2x1x128xf32>, vector<2x1x128xf32> -> vector<2x8x128xf32>
    %c0_42 = arith.constant 0 : index
    %c0_43 = arith.constant 0 : index
    %c0_44 = arith.constant 0 : index
    %261 = vector.load %arg1[%c0_42, %c0_43, %c0_44] : memref<2x8x128xf32, #tpu.memory_space<vmem>>, vector<2x8x128xf32>
    %262 = vector.shape_cast %261 : vector<2x8x128xf32> to vector<16x128xf32>
    %263 = arith.truncf %262 : vector<16x128xf32> to vector<16x128xbf16>
    %c0_45 = arith.constant 0 : index
    %c0_46 = arith.constant 0 : index
    %264 = vector.load %arg9[%c0_45, %c0_46] : memref<128x128xbf16, #tpu.memory_space<vmem>>, vector<128x128xbf16>
    %cst_47 = arith.constant dense<0.000000e+00> : vector<16x128xf32>
    %265 = tpu.matmul %263, %264, %cst_47 {dimension_numbers = #tpu.dot_dimension_numbers<[1], [0], [0], [1], [0, 0, 1, 1], [], []>} : vector<16x128xbf16>, vector<128x128xbf16>, vector<16x128xf32> -> vector<16x128xf32>
    %c0_48 = arith.constant 0 : index
    %c0_49 = arith.constant 0 : index
    %266 = vector.load %arg10[%c0_48, %c0_49] : memref<1x128xf32, #tpu.memory_space<vmem>>, vector<1x128xf32>
    %267 = vector.broadcast %266 : vector<1x128xf32> to vector<16x128xf32>
    %268 = arith.addf %265, %267 : vector<16x128xf32>
    %269 = vector.shape_cast %268 : vector<16x128xf32> to vector<2x8x128xf32>
    %c0_50 = arith.constant 0 : index
    %c0_51 = arith.constant 0 : index
    %c0_52 = arith.constant 0 : index
    %270 = vector.load %arg2[%c0_50, %c0_51, %c0_52] : memref<2x8x128xf32, #tpu.memory_space<vmem>>, vector<2x8x128xf32>
    %271 = vector.shape_cast %270 : vector<2x8x128xf32> to vector<16x128xf32>
    %272 = arith.truncf %271 : vector<16x128xf32> to vector<16x128xbf16>
    %c0_53 = arith.constant 0 : index
    %c0_54 = arith.constant 0 : index
    %273 = vector.load %arg11[%c0_53, %c0_54] : memref<128x128xbf16, #tpu.memory_space<vmem>>, vector<128x128xbf16>
    %cst_55 = arith.constant dense<0.000000e+00> : vector<16x128xf32>
    %274 = tpu.matmul %272, %273, %cst_55 {dimension_numbers = #tpu.dot_dimension_numbers<[1], [0], [0], [1], [0, 0, 1, 1], [], []>} : vector<16x128xbf16>, vector<128x128xbf16>, vector<16x128xf32> -> vector<16x128xf32>
    %c0_56 = arith.constant 0 : index
    %c0_57 = arith.constant 0 : index
    %275 = vector.load %arg12[%c0_56, %c0_57] : memref<1x128xf32, #tpu.memory_space<vmem>>, vector<1x128xf32>
    %276 = vector.broadcast %275 : vector<1x128xf32> to vector<16x128xf32>
    %277 = arith.addf %274, %276 : vector<16x128xf32>
    %278 = vector.shape_cast %277 : vector<16x128xf32> to vector<2x8x128xf32>
    %279 = vector.shape_cast %260 : vector<2x8x128xf32> to vector<16x128xf32>
    %280 = arith.truncf %279 : vector<16x128xf32> to vector<16x128xbf16>
    %c0_58 = arith.constant 0 : index
    %c0_59 = arith.constant 0 : index
    %c0_60 = arith.constant 0 : index
    %281 = vector.load %arg13[%c0_58, %c0_59, %c0_60] : memref<3x128x128xbf16, #tpu.memory_space<vmem>>, vector<1x128x128xbf16>
    %282 = vector.shape_cast %281 : vector<1x128x128xbf16> to vector<128x128xbf16>
    %cst_61 = arith.constant dense<0.000000e+00> : vector<16x128xf32>
    %283 = tpu.matmul %280, %282, %cst_61 {dimension_numbers = #tpu.dot_dimension_numbers<[1], [0], [0], [1], [0, 0, 1, 1], [], []>} : vector<16x128xbf16>, vector<128x128xbf16>, vector<16x128xf32> -> vector<16x128xf32>
    %c0_62 = arith.constant 0 : index
    %c0_63 = arith.constant 0 : index
    %c0_64 = arith.constant 0 : index
    %284 = vector.load %arg14[%c0_62, %c0_63, %c0_64] : memref<3x1x128xf32, #tpu.memory_space<vmem>>, vector<1x1x128xf32>
    %285 = vector.shape_cast %284 : vector<1x1x128xf32> to vector<1x128xf32>
    %286 = vector.broadcast %285 : vector<1x128xf32> to vector<16x128xf32>
    %287 = arith.addf %283, %286 : vector<16x128xf32>
    %cst_65 = arith.constant 0.000000e+00 : f32
    %288 = vector.broadcast %cst_65 : f32 to vector<16x128xf32>
    %289 = arith.maximumf %287, %288 : vector<16x128xf32>
    %290 = vector.shape_cast %289 : vector<16x128xf32> to vector<2x8x128xf32>
    %c0_66 = arith.constant 0 : index
    %c0_67 = arith.constant 0 : index
    %c0_68 = arith.constant 0 : index
    %291 = vector.load %arg15[%c0_66, %c0_67, %c0_68] : memref<3x1x128xf32, #tpu.memory_space<vmem>>, vector<1x1x128xf32>
    %292 = vector.shape_cast %291 : vector<1x1x128xf32> to vector<1x128xf32>
    %293 = vector.shape_cast %292 : vector<1x128xf32> to vector<1x1x128xf32>
    %294 = vector.broadcast %293 : vector<1x1x128xf32> to vector<2x8x128xf32>
    %295 = arith.mulf %290, %294 : vector<2x8x128xf32>
    %cst_69 = arith.constant dense<0.000000e+00> : vector<2x8xf32>
    %296 = vector.multi_reduction <add>, %295, %cst_69 [2] : vector<2x8x128xf32> to vector<2x8xf32>
    %297 = vector.shape_cast %296 : vector<2x8xf32> to vector<2x8x1xf32>
    %c0_70 = arith.constant 0 : index
    %298 = memref.load %arg16[%c0_70] : memref<3xf32, #tpu.memory_space<smem>>
    %299 = vector.broadcast %298 : f32 to vector<2x8x1xf32>
    %300 = arith.addf %297, %299 : vector<2x8x1xf32>
    %c0_71 = arith.constant 0 : index
    %c0_72 = arith.constant 0 : index
    %c0_73 = arith.constant 0 : index
    %301 = vector.load %arg3[%c0_71, %c0_72, %c0_73] : memref<2x8x1xf32, #tpu.memory_space<vmem>>, vector<2x8x1xf32>
    %cst_74 = arith.constant 5.000000e-01 : f32
    %302 = vector.broadcast %cst_74 : f32 to vector<2x8x1xf32>
    %303 = arith.cmpf ogt, %301, %302 : vector<2x8x1xf32>
    %cst_75 = arith.constant -1.000000e+09 : f32
    %304 = vector.broadcast %cst_75 : f32 to vector<2x8x1xf32>
    %305 = arith.select %303, %304, %300 : vector<2x8x1xi1>, vector<2x8x1xf32>
    %cst_76 = arith.constant dense<0xFF800000> : vector<2x1xf32>
    %306 = vector.multi_reduction <maximumf>, %305, %cst_76 [1] : vector<2x8x1xf32> to vector<2x1xf32>
    %307 = vector.shape_cast %306 : vector<2x1xf32> to vector<2x1x1xf32>
    %308 = vector.broadcast %307 : vector<2x1x1xf32> to vector<2x8x1xf32>
    %309 = arith.subf %305, %308 : vector<2x8x1xf32>
    %310 = math.exp %309 : vector<2x8x1xf32>
    %cst_77 = arith.constant dense<0.000000e+00> : vector<2x1xf32>
    %311 = vector.multi_reduction <add>, %310, %cst_77 [1] : vector<2x8x1xf32> to vector<2x1xf32>
    %312 = vector.shape_cast %311 : vector<2x1xf32> to vector<2x1x1xf32>
    %313 = tpu.reciprocal %312 {approx = true} : vector<2x1x1xf32> -> vector<2x1x1xf32>
    %314 = vector.broadcast %313 : vector<2x1x1xf32> to vector<2x8x1xf32>
    %315 = arith.mulf %310, %314 : vector<2x8x1xf32>
    %316 = vector.broadcast %315 : vector<2x8x1xf32> to vector<2x8x128xf32>
    %317 = arith.mulf %316, %260 : vector<2x8x128xf32>
    %cst_78 = arith.constant dense<0.000000e+00> : vector<2x128xf32>
    %318 = vector.multi_reduction <add>, %317, %cst_78 [1] : vector<2x8x128xf32> to vector<2x128xf32>
    %319 = vector.shape_cast %269 : vector<2x8x128xf32> to vector<16x128xf32>
    %320 = arith.truncf %319 : vector<16x128xf32> to vector<16x128xbf16>
    %c1 = arith.constant 1 : index
    %c0_79 = arith.constant 0 : index
    %c0_80 = arith.constant 0 : index
    %321 = vector.load %arg13[%c1, %c0_79, %c0_80] : memref<3x128x128xbf16, #tpu.memory_space<vmem>>, vector<1x128x128xbf16>
    %322 = vector.shape_cast %321 : vector<1x128x128xbf16> to vector<128x128xbf16>
    %cst_81 = arith.constant dense<0.000000e+00> : vector<16x128xf32>
    %323 = tpu.matmul %320, %322, %cst_81 {dimension_numbers = #tpu.dot_dimension_numbers<[1], [0], [0], [1], [0, 0, 1, 1], [], []>} : vector<16x128xbf16>, vector<128x128xbf16>, vector<16x128xf32> -> vector<16x128xf32>
    %c1_82 = arith.constant 1 : index
    %c0_83 = arith.constant 0 : index
    %c0_84 = arith.constant 0 : index
    %324 = vector.load %arg14[%c1_82, %c0_83, %c0_84] : memref<3x1x128xf32, #tpu.memory_space<vmem>>, vector<1x1x128xf32>
    %325 = vector.shape_cast %324 : vector<1x1x128xf32> to vector<1x128xf32>
    %326 = vector.broadcast %325 : vector<1x128xf32> to vector<16x128xf32>
    %327 = arith.addf %323, %326 : vector<16x128xf32>
    %cst_85 = arith.constant 0.000000e+00 : f32
    %328 = vector.broadcast %cst_85 : f32 to vector<16x128xf32>
    %329 = arith.maximumf %327, %328 : vector<16x128xf32>
    %330 = vector.shape_cast %329 : vector<16x128xf32> to vector<2x8x128xf32>
    %c1_86 = arith.constant 1 : index
    %c0_87 = arith.constant 0 : index
    %c0_88 = arith.constant 0 : index
    %331 = vector.load %arg15[%c1_86, %c0_87, %c0_88] : memref<3x1x128xf32, #tpu.memory_space<vmem>>, vector<1x1x128xf32>
    %332 = vector.shape_cast %331 : vector<1x1x128xf32> to vector<1x128xf32>
    %333 = vector.shape_cast %332 : vector<1x128xf32> to vector<1x1x128xf32>
    %334 = vector.broadcast %333 : vector<1x1x128xf32> to vector<2x8x128xf32>
    %335 = arith.mulf %330, %334 : vector<2x8x128xf32>
    %cst_89 = arith.constant dense<0.000000e+00> : vector<2x8xf32>
    %336 = vector.multi_reduction <add>, %335, %cst_89 [2] : vector<2x8x128xf32> to vector<2x8xf32>
    %337 = vector.shape_cast %336 : vector<2x8xf32> to vector<2x8x1xf32>
    %c1_90 = arith.constant 1 : index
    %338 = memref.load %arg16[%c1_90] : memref<3xf32, #tpu.memory_space<smem>>
    %339 = vector.broadcast %338 : f32 to vector<2x8x1xf32>
    %340 = arith.addf %337, %339 : vector<2x8x1xf32>
    %c0_91 = arith.constant 0 : index
    %c0_92 = arith.constant 0 : index
    %c0_93 = arith.constant 0 : index
    %341 = vector.load %arg4[%c0_91, %c0_92, %c0_93] : memref<2x8x1xf32, #tpu.memory_space<vmem>>, vector<2x8x1xf32>
    %cst_94 = arith.constant 5.000000e-01 : f32
    %342 = vector.broadcast %cst_94 : f32 to vector<2x8x1xf32>
    %343 = arith.cmpf ogt, %341, %342 : vector<2x8x1xf32>
    %cst_95 = arith.constant -1.000000e+09 : f32
    %344 = vector.broadcast %cst_95 : f32 to vector<2x8x1xf32>
    %345 = arith.select %343, %344, %340 : vector<2x8x1xi1>, vector<2x8x1xf32>
    %cst_96 = arith.constant dense<0xFF800000> : vector<2x1xf32>
    %346 = vector.multi_reduction <maximumf>, %345, %cst_96 [1] : vector<2x8x1xf32> to vector<2x1xf32>
    %347 = vector.shape_cast %346 : vector<2x1xf32> to vector<2x1x1xf32>
    %348 = vector.broadcast %347 : vector<2x1x1xf32> to vector<2x8x1xf32>
    %349 = arith.subf %345, %348 : vector<2x8x1xf32>
    %350 = math.exp %349 : vector<2x8x1xf32>
    %cst_97 = arith.constant dense<0.000000e+00> : vector<2x1xf32>
    %351 = vector.multi_reduction <add>, %350, %cst_97 [1] : vector<2x8x1xf32> to vector<2x1xf32>
    %352 = vector.shape_cast %351 : vector<2x1xf32> to vector<2x1x1xf32>
    %353 = tpu.reciprocal %352 {approx = true} : vector<2x1x1xf32> -> vector<2x1x1xf32>
    %354 = vector.broadcast %353 : vector<2x1x1xf32> to vector<2x8x1xf32>
    %355 = arith.mulf %350, %354 : vector<2x8x1xf32>
    %356 = vector.broadcast %355 : vector<2x8x1xf32> to vector<2x8x128xf32>
    %357 = arith.mulf %356, %269 : vector<2x8x128xf32>
    %cst_98 = arith.constant dense<0.000000e+00> : vector<2x128xf32>
    %358 = vector.multi_reduction <add>, %357, %cst_98 [1] : vector<2x8x128xf32> to vector<2x128xf32>
    %359 = vector.shape_cast %278 : vector<2x8x128xf32> to vector<16x128xf32>
    %360 = arith.truncf %359 : vector<16x128xf32> to vector<16x128xbf16>
    %c2 = arith.constant 2 : index
    %c0_99 = arith.constant 0 : index
    %c0_100 = arith.constant 0 : index
    %361 = vector.load %arg13[%c2, %c0_99, %c0_100] : memref<3x128x128xbf16, #tpu.memory_space<vmem>>, vector<1x128x128xbf16>
    %362 = vector.shape_cast %361 : vector<1x128x128xbf16> to vector<128x128xbf16>
    %cst_101 = arith.constant dense<0.000000e+00> : vector<16x128xf32>
    %363 = tpu.matmul %360, %362, %cst_101 {dimension_numbers = #tpu.dot_dimension_numbers<[1], [0], [0], [1], [0, 0, 1, 1], [], []>} : vector<16x128xbf16>, vector<128x128xbf16>, vector<16x128xf32> -> vector<16x128xf32>
    %c2_102 = arith.constant 2 : index
    %c0_103 = arith.constant 0 : index
    %c0_104 = arith.constant 0 : index
    %364 = vector.load %arg14[%c2_102, %c0_103, %c0_104] : memref<3x1x128xf32, #tpu.memory_space<vmem>>, vector<1x1x128xf32>
    %365 = vector.shape_cast %364 : vector<1x1x128xf32> to vector<1x128xf32>
    %366 = vector.broadcast %365 : vector<1x128xf32> to vector<16x128xf32>
    %367 = arith.addf %363, %366 : vector<16x128xf32>
    %cst_105 = arith.constant 0.000000e+00 : f32
    %368 = vector.broadcast %cst_105 : f32 to vector<16x128xf32>
    %369 = arith.maximumf %367, %368 : vector<16x128xf32>
    %370 = vector.shape_cast %369 : vector<16x128xf32> to vector<2x8x128xf32>
    %c2_106 = arith.constant 2 : index
    %c0_107 = arith.constant 0 : index
    %c0_108 = arith.constant 0 : index
    %371 = vector.load %arg15[%c2_106, %c0_107, %c0_108] : memref<3x1x128xf32, #tpu.memory_space<vmem>>, vector<1x1x128xf32>
    %372 = vector.shape_cast %371 : vector<1x1x128xf32> to vector<1x128xf32>
    %373 = vector.shape_cast %372 : vector<1x128xf32> to vector<1x1x128xf32>
    %374 = vector.broadcast %373 : vector<1x1x128xf32> to vector<2x8x128xf32>
    %375 = arith.mulf %370, %374 : vector<2x8x128xf32>
    %cst_109 = arith.constant dense<0.000000e+00> : vector<2x8xf32>
    %376 = vector.multi_reduction <add>, %375, %cst_109 [2] : vector<2x8x128xf32> to vector<2x8xf32>
    %377 = vector.shape_cast %376 : vector<2x8xf32> to vector<2x8x1xf32>
    %c2_110 = arith.constant 2 : index
    %378 = memref.load %arg16[%c2_110] : memref<3xf32, #tpu.memory_space<smem>>
    %379 = vector.broadcast %378 : f32 to vector<2x8x1xf32>
    %380 = arith.addf %377, %379 : vector<2x8x1xf32>
    %c0_111 = arith.constant 0 : index
    %c0_112 = arith.constant 0 : index
    %c0_113 = arith.constant 0 : index
    %381 = vector.load %arg5[%c0_111, %c0_112, %c0_113] : memref<2x8x1xf32, #tpu.memory_space<vmem>>, vector<2x8x1xf32>
    %cst_114 = arith.constant 5.000000e-01 : f32
    %382 = vector.broadcast %cst_114 : f32 to vector<2x8x1xf32>
    %383 = arith.cmpf ogt, %381, %382 : vector<2x8x1xf32>
    %cst_115 = arith.constant -1.000000e+09 : f32
    %384 = vector.broadcast %cst_115 : f32 to vector<2x8x1xf32>
    %385 = arith.select %383, %384, %380 : vector<2x8x1xi1>, vector<2x8x1xf32>
    %cst_116 = arith.constant dense<0xFF800000> : vector<2x1xf32>
    %386 = vector.multi_reduction <maximumf>, %385, %cst_116 [1] : vector<2x8x1xf32> to vector<2x1xf32>
    %387 = vector.shape_cast %386 : vector<2x1xf32> to vector<2x1x1xf32>
    %388 = vector.broadcast %387 : vector<2x1x1xf32> to vector<2x8x1xf32>
    %389 = arith.subf %385, %388 : vector<2x8x1xf32>
    %390 = math.exp %389 : vector<2x8x1xf32>
    %cst_117 = arith.constant dense<0.000000e+00> : vector<2x1xf32>
    %391 = vector.multi_reduction <add>, %390, %cst_117 [1] : vector<2x8x1xf32> to vector<2x1xf32>
    %392 = vector.shape_cast %391 : vector<2x1xf32> to vector<2x1x1xf32>
    %393 = tpu.reciprocal %392 {approx = true} : vector<2x1x1xf32> -> vector<2x1x1xf32>
    %394 = vector.broadcast %393 : vector<2x1x1xf32> to vector<2x8x1xf32>
    %395 = arith.mulf %390, %394 : vector<2x8x1xf32>
    %396 = vector.broadcast %395 : vector<2x8x1xf32> to vector<2x8x128xf32>
    %397 = arith.mulf %396, %278 : vector<2x8x128xf32>
    %cst_118 = arith.constant dense<0.000000e+00> : vector<2x128xf32>
    %398 = vector.multi_reduction <add>, %397, %cst_118 [1] : vector<2x8x128xf32> to vector<2x128xf32>
    %399 = tpu.concatenate %318, %358, %398 in 1 : vector<2x128xf32>, vector<2x128xf32>, vector<2x128xf32> -> vector<2x384xf32>
    %400 = arith.truncf %399 : vector<2x384xf32> to vector<2x384xbf16>
    %c0_119 = arith.constant 0 : index
    %c0_120 = arith.constant 0 : index
    %401 = vector.load %arg17[%c0_119, %c0_120] : memref<384x256xbf16, #tpu.memory_space<vmem>>, vector<384x256xbf16>
    %cst_121 = arith.constant dense<0.000000e+00> : vector<2x256xf32>
    %402 = tpu.matmul %400, %401, %cst_121 {dimension_numbers = #tpu.dot_dimension_numbers<[1], [0], [0], [1], [0, 0, 1, 1], [], []>} : vector<2x384xbf16>, vector<384x256xbf16>, vector<2x256xf32> -> vector<2x256xf32>
    %c0_122 = arith.constant 0 : index
    %c0_123 = arith.constant 0 : index
    %403 = vector.load %arg18[%c0_122, %c0_123] : memref<1x256xf32, #tpu.memory_space<vmem>>, vector<1x256xf32>
    %404 = vector.broadcast %403 : vector<1x256xf32> to vector<2x256xf32>
    %405 = arith.addf %402, %404 : vector<2x256xf32>
    %c0_124 = arith.constant 0 : index
    %c0_125 = arith.constant 0 : index
    %406 = vector.load %arg19[%c0_124, %c0_125] : memref<1x256xf32, #tpu.memory_space<vmem>>, vector<1x256xf32>
    %c0_126 = arith.constant 0 : index
    %c0_127 = arith.constant 0 : index
    %407 = vector.load %arg20[%c0_126, %c0_127] : memref<1x256xf32, #tpu.memory_space<vmem>>, vector<1x256xf32>
    %cst_128 = arith.constant dense<0.000000e+00> : vector<2xf32>
    %408 = vector.multi_reduction <add>, %405, %cst_128 [1] : vector<2x256xf32> to vector<2xf32>
    %409 = vector.shape_cast %408 : vector<2xf32> to vector<2x1xf32>
    %cst_129 = arith.constant 2.560000e+02 : f32
    %410 = vector.broadcast %cst_129 : f32 to vector<2x1xf32>
    %411 = arith.divf %409, %410 : vector<2x1xf32>
    %412 = vector.broadcast %411 : vector<2x1xf32> to vector<2x256xf32>
    %413 = arith.subf %405, %412 : vector<2x256xf32>
    %414 = arith.mulf %413, %413 : vector<2x256xf32>
    %cst_130 = arith.constant dense<0.000000e+00> : vector<2xf32>
    %415 = vector.multi_reduction <add>, %414, %cst_130 [1] : vector<2x256xf32> to vector<2xf32>
    %416 = vector.shape_cast %415 : vector<2xf32> to vector<2x1xf32>
    %cst_131 = arith.constant 2.560000e+02 : f32
    %417 = vector.broadcast %cst_131 : f32 to vector<2x1xf32>
    %418 = arith.divf %416, %417 : vector<2x1xf32>
    %419 = vector.broadcast %411 : vector<2x1xf32> to vector<2x256xf32>
    %420 = arith.subf %405, %419 : vector<2x256xf32>
    %cst_132 = arith.constant 9.99999974E-6 : f32
    %421 = vector.broadcast %cst_132 : f32 to vector<2x1xf32>
    %422 = arith.addf %418, %421 : vector<2x1xf32>
    %423 = math.rsqrt %422 : vector<2x1xf32>
    %424 = vector.broadcast %423 : vector<2x1xf32> to vector<2x256xf32>
    %425 = arith.mulf %420, %424 : vector<2x256xf32>
    %426 = vector.broadcast %406 : vector<1x256xf32> to vector<2x256xf32>
    %427 = arith.mulf %425, %426 : vector<2x256xf32>
    %428 = vector.broadcast %407 : vector<1x256xf32> to vector<2x256xf32>
    %429 = arith.addf %427, %428 : vector<2x256xf32>
    %cst_133 = arith.constant 0.000000e+00 : f32
    %430 = vector.broadcast %cst_133 : f32 to vector<2x128xf32>
    %431 = tpu.concatenate %405, %430 in 1 : vector<2x256xf32>, vector<2x128xf32> -> vector<2x384xf32>
    %c0_134 = arith.constant 0 : index
    %c0_135 = arith.constant 0 : index
    %432 = vector.load %arg21[%c0_134, %c0_135] : memref<1x384xf32, #tpu.memory_space<vmem>>, vector<1x384xf32>
    %c0_136 = arith.constant 0 : index
    %c0_137 = arith.constant 0 : index
    %433 = vector.load %arg22[%c0_136, %c0_137] : memref<1x384xf32, #tpu.memory_space<vmem>>, vector<1x384xf32>
    %cst_138 = arith.constant dense<0.000000e+00> : vector<2xf32>
    %434 = vector.multi_reduction <add>, %431, %cst_138 [1] : vector<2x384xf32> to vector<2xf32>
    %435 = vector.shape_cast %434 : vector<2xf32> to vector<2x1xf32>
    %cst_139 = arith.constant 3.840000e+02 : f32
    %436 = vector.broadcast %cst_139 : f32 to vector<2x1xf32>
    %437 = arith.divf %435, %436 : vector<2x1xf32>
    %438 = vector.broadcast %437 : vector<2x1xf32> to vector<2x384xf32>
    %439 = arith.subf %431, %438 : vector<2x384xf32>
    %440 = arith.mulf %439, %439 : vector<2x384xf32>
    %cst_140 = arith.constant dense<0.000000e+00> : vector<2xf32>
    %441 = vector.multi_reduction <add>, %440, %cst_140 [1] : vector<2x384xf32> to vector<2xf32>
    %442 = vector.shape_cast %441 : vector<2xf32> to vector<2x1xf32>
    %cst_141 = arith.constant 3.840000e+02 : f32
    %443 = vector.broadcast %cst_141 : f32 to vector<2x1xf32>
    %444 = arith.divf %442, %443 : vector<2x1xf32>
    %445 = vector.broadcast %437 : vector<2x1xf32> to vector<2x384xf32>
    %446 = arith.subf %431, %445 : vector<2x384xf32>
    %cst_142 = arith.constant 9.99999974E-6 : f32
    %447 = vector.broadcast %cst_142 : f32 to vector<2x1xf32>
    %448 = arith.addf %444, %447 : vector<2x1xf32>
    %449 = math.rsqrt %448 : vector<2x1xf32>
    %450 = vector.broadcast %449 : vector<2x1xf32> to vector<2x384xf32>
    %451 = arith.mulf %446, %450 : vector<2x384xf32>
    %452 = vector.broadcast %432 : vector<1x384xf32> to vector<2x384xf32>
    %453 = arith.mulf %451, %452 : vector<2x384xf32>
    %454 = vector.broadcast %433 : vector<1x384xf32> to vector<2x384xf32>
    %455 = arith.addf %453, %454 : vector<2x384xf32>
    %456 = arith.truncf %455 : vector<2x384xf32> to vector<2x384xbf16>
    %c0_143 = arith.constant 0 : index
    %c0_144 = arith.constant 0 : index
    %457 = vector.load %arg23[%c0_143, %c0_144] : memref<384x256xbf16, #tpu.memory_space<vmem>>, vector<384x256xbf16>
    %cst_145 = arith.constant dense<0.000000e+00> : vector<2x256xf32>
    %458 = tpu.matmul %456, %457, %cst_145 {dimension_numbers = #tpu.dot_dimension_numbers<[1], [0], [0], [1], [0, 0, 1, 1], [], []>} : vector<2x384xbf16>, vector<384x256xbf16>, vector<2x256xf32> -> vector<2x256xf32>
    %c0_146 = arith.constant 0 : index
    %c0_147 = arith.constant 0 : index
    %459 = vector.load %arg24[%c0_146, %c0_147] : memref<1x256xf32, #tpu.memory_space<vmem>>, vector<1x256xf32>
    %460 = vector.broadcast %459 : vector<1x256xf32> to vector<2x256xf32>
    %461 = arith.addf %458, %460 : vector<2x256xf32>
    %cst_148 = arith.constant 0.000000e+00 : f32
    %462 = vector.broadcast %cst_148 : f32 to vector<2x256xf32>
    %463 = arith.maximumf %461, %462 : vector<2x256xf32>
    %464 = arith.addf %429, %463 : vector<2x256xf32>
    %465 = arith.truncf %464 : vector<2x256xf32> to vector<2x256xbf16>
    %c0_149 = arith.constant 0 : index
    %c0_150 = arith.constant 0 : index
    %466 = vector.load %arg25[%c0_149, %c0_150] : memref<256x16xbf16, #tpu.memory_space<vmem>>, vector<256x16xbf16>
    %cst_151 = arith.constant dense<0.000000e+00> : vector<2x16xf32>
    %467 = tpu.matmul %465, %466, %cst_151 {dimension_numbers = #tpu.dot_dimension_numbers<[1], [0], [0], [1], [0, 0, 1, 1], [], []>} : vector<2x256xbf16>, vector<256x16xbf16>, vector<2x16xf32> -> vector<2x16xf32>
    %c0_152 = arith.constant 0 : index
    %c0_153 = arith.constant 0 : index
    %468 = vector.load %arg26[%c0_152, %c0_153] : memref<1x16xf32, #tpu.memory_space<vmem>>, vector<1x16xf32>
    %469 = vector.broadcast %468 : vector<1x16xf32> to vector<2x16xf32>
    %470 = arith.addf %467, %469 : vector<2x16xf32>
    %471 = arith.negf %470 : vector<2x16xf32>
    %472 = math.exp %471 : vector<2x16xf32>
    %cst_154 = arith.constant 1.000000e+00 : f32
    %473 = vector.broadcast %cst_154 : f32 to vector<2x16xf32>
    %474 = arith.addf %473, %472 : vector<2x16xf32>
    %475 = arith.divf %473, %474 : vector<2x16xf32>
    %c0_155 = arith.constant 0 : index
    %c0_156 = arith.constant 0 : index
    %476 = vector.load %arg27[%c0_155, %c0_156] : memref<2x16xf32, #tpu.memory_space<vmem>>, vector<2x16xf32>
    tpu.vector_store %arg27[%c0_155, %c0_156], %475 {strides = array<i32>} : memref<2x16xf32, #tpu.memory_space<vmem>>, vector<2x16xf32>,
    return
  }
}

</mosaic_0001>

<bundles_post_ra>
// kernel: net1_forward.1
= control target key start
LH: loop header
LB: loop body
LE: loop exit
PB: predicated region body
PF: predicated region fallthrough
CT: control target
= control target key end

     0   :  { %s6653_s0 = inlined_call_operand.vmem [shape: f32[2,8,64], index: 0, kind: input, shape index: {}]   ;;  %s6654_s1 = inlined_call_operand.vmem [shape: f32[2,8,128], index: 1, kind: input, shape index: {}]   ;;  %s6655_s2 = inlined_call_operand.vmem [shape: f32[2,8,128], index: 2, kind: input, shape index: {}]   ;;  %s6656_s3 = inlined_call_operand.vmem [shape: f32[2,8,1], index: 3, kind: input, shape index: {}]   ;;  %s6657_s4 = inlined_call_operand.vmem [shape: f32[2,8,1], index: 4, kind: input, shape index: {}]   ;;  %s6658_s5 = inlined_call_operand.vmem [shape: f32[2,8,1], index: 5, kind: input, shape index: {}]   ;;  %s6659_s6 = inlined_call_operand.vmem [shape: bf16[64,512], index: 6, kind: input, shape index: {}]   ;;  %s6660_s7 = inlined_call_operand.vmem [shape: bf16[128,512], index: 7, kind: input, shape index: {}]   ;;  %s6661_s8 = inlined_call_operand.vmem [shape: f32[1,512], index: 8, kind: input, shape index: {}]   ;;  %s6662_s9 = inlined_call_operand.vmem [shape: bf16[128,128], index: 9, kind: input, shape index: {}]   ;;  %s6663_s10 = inlined_call_operand.vmem [shape: f32[1,128], index: 10, kind: input, shape index: {}]   ;;  %s6664_s11 = inlined_call_operand.vmem [shape: bf16[128,128], index: 11, kind: input, shape index: {}]   ;;  %s6665_s12 = inlined_call_operand.vmem [shape: f32[1,128], index: 12, kind: input, shape index: {}]   ;;  %s6666_s13 = inlined_call_operand.vmem [shape: bf16[3,128,128], index: 13, kind: input, shape index: {}]   ;;  %s6667_s14 = inlined_call_operand.vmem [shape: f32[3,1,128], index: 14, kind: input, shape index: {}]   ;;  %s6668_s15 = inlined_call_operand.vmem [shape: f32[3,1,128], index: 15, kind: input, shape index: {}]   ;;  %s6669_s16 = inlined_call_operand.vmem [shape: f32[3], index: 16, kind: input, shape index: {}]   ;;  %s6670_s17 = inlined_call_operand.vmem [shape: bf16[384,256], index: 17, kind: input, shape index: {}]   ;;  %s6671_s18 = inlined_call_operand.vmem [shape: f32[1,256], index: 18, kind: input, shape index: {}]   ;;  %s6672_s19 = inlined_call_operand.vmem [shape: f32[1,256], index: 19, kind: input, shape index: {}]   ;;  %s6673_s20 = inlined_call_operand.vmem [shape: f32[1,256], index: 20, kind: input, shape index: {}]   ;;  %s6674_s21 = inlined_call_operand.vmem [shape: f32[1,384], index: 21, kind: input, shape index: {}]   ;;  %s6675_s22 = inlined_call_operand.vmem [shape: f32[1,384], index: 22, kind: input, shape index: {}]   ;;  %s6676_s23 = inlined_call_operand.vmem [shape: bf16[384,256], index: 23, kind: input, shape index: {}]   ;;  %s6677_s24 = inlined_call_operand.vmem [shape: f32[1,256], index: 24, kind: input, shape index: {}]   ;;  %s6678_s25 = inlined_call_operand.vmem [shape: bf16[256,16], index: 25, kind: input, shape index: {}]   ;;  %s6679_s26 = inlined_call_operand.vmem [shape: f32[1,16], index: 26, kind: input, shape index: {}]   ;;  %s6680_s27 = inlined_call_operand.hbm [shape: f32[2,16], index: 27, kind: output, shape index: {}]  }
   0x1   :  { %6703 = sst [smem:[#allocation13_spill]] %s6653_s0 }
   0x2   :  { %6704 = sst [smem:[#allocation14_spill]] %s6654_s1 }
   0x3   :  { %6705 = sst [smem:[#allocation15_spill]] %s6655_s2 }
   0x4   :  { %6706 = sst [smem:[#allocation16_spill]] %s6656_s3 }
   0x5   :  { %6707 = sst [smem:[#allocation17_spill]] %s6657_s4 }
   0x6   :  { %6708 = sst [smem:[#allocation18_spill]] %s6658_s5 }
   0x7   :  { %6709 = sst [smem:[#allocation19_spill]] %s6659_s6 }
   0x8   :  { %6710 = sst [smem:[#allocation20_spill]] %s6660_s7 }
   0x9   :  { %6711 = sst [smem:[#allocation21_spill]] %s6661_s8 }
   0xa   :  { %6712 = sst [smem:[#allocation22_spill]] %s6662_s9 }
   0xb   :  { %6713 = sst [smem:[#allocation23_spill]] %s6663_s10 }
   0xc   :  { %6714 = sst [smem:[#allocation24_spill]] %s6664_s11 }
   0xd   :  { %32 = vsyncpa [#allocation4], 0 }
   0xe   :  { %33 = vsyncpa [#allocation3], 0  ;;  %s72_s8 = sshll.u32 %s6669_s16, 4  ;;  %s73_s8 = int_to_ptr.vmem [resolvable:$true] %s72_s8 }
   0xf   :  { %s4911_s30 = scalar_lea.vmem %s73_s8, 16  ;;  %p4916_p1 = scmp.lt.s32.totalorder %s73_s8, %s73_s8 }
  0x10   :  { %p4912_p0 = scmp.ne.s32.totalorder %s73_s8, %s4911_s30  ;;  %p4917_p2 = scmp.lt.s32.totalorder %s4911_s30, %s4911_s30 }
  0x12   :  { %p4918_p3 = por %p4917_p2, %p4916_p1 }
  0x14   :  { %p4919_p4 = pnand %p4918_p3, %p4912_p0 }
  0x16   :  { %4922 = shalt.err (!%p4919_p4)
}
  0x17   :  { %s4949_s9 = smov [#allocation2]  }
  0x18   :  { %75 = dma.vmem_to_smem %s73_s8, 16, %s4949_s9, [#allocation4]  }
  0x19   :  { %4945 = dma.done.wait [#allocation4], 16  }
  0x1a   :  { %4946 = vsyncadd [#allocation4], 4294967280 }
  0x1b   :  { %99 = sfence }
  0x1c   :  { %s6715_s0 = sld [smem:[#allocation19_spill]]  ;;  %v6691_v2 = vmov 0   ;;  %s6716_s16 = sld [smem:[#allocation13_spill]]  ;;  %vm222_vm0 = vcmask 523264   ;;  %v122_v60 = vlaneseq  ;;  %vm665_vm1 = vcmask 1041409  }
  0x1d   :  { %258 = vmatprep.mubr.bf16.mxu0 %v6691_v2  ;;  %301 = vmatprep.mubr.bf16.mxu1 %v6691_v2  ;;  %s6717_s3 = sld [smem:[#allocation20_spill]]  ;;  %s6719_s30 = sld [smem:[#allocation21_spill]]  ;;  %vm1878_vm2 = vcmask 1040384   ;;  %vm1881_vm3 = vcmask 1041408   ;;  %vm1884_vm4 = vcmask 1042432   ;;  %vm1887_vm5 = vcmask 1043456  }
  0x1e   :  { %4317 = vset.pattern.permute.xlu0 %v6691_v2  ;;  %4318 = vset.pattern.permute.xlu1 %v6691_v2  ;;  %v123_v61 = vshrl.u32 %v122_v60, 7  ;;  %vm1890_vm6 = vcmask 1044480   ;;  %vm1893_vm7 = vcmask 1045504   ;;  %s6730_s11 = sld [smem:[#allocation24_spill]]  ;;  %vm4952_vm8 = vmmov 0   ;;  %s6731_s2 = sld [smem:[#allocation14_spill]] }
  0x1f   :  { %s6732_s5 = sld [smem:[#allocation15_spill]]  ;;  %vm1896_vm9 = vcmask 1046528   ;;  %s6734_s10 = sld [smem:[#allocation17_spill]]  ;;  %vm2267_vm11 = vcmask 7168  }
  0x20   :  { %v5387_v62 = vsub.s32 0, %v123_v61  ;;  %s6736_s1 = sld [smem:[#allocation18_spill]] }
  0x22   :  { %v4319_v0 = vld [vmem:[%s6715_s0 + $0x4] ss:$16 sps:$4 sm:$0xff]   ;;  %v4321_v1 = vld [vmem:[%s6715_s0 + $0xc] ss:$16 sps:$4 sm:$0xff]   ;;  %v4323_v3 = vld [vmem:[%s6715_s0] ss:$16 sps:$4 sm:$0xff]  }
  0x23   :  { %226 = vmatprep.subr.bf16.mxu0 %v4319_v0  ;;  %v4324_v4 = vld [vmem:[%s6715_s0 + $0x8] ss:$16 sps:$4 sm:$0xff]   ;;  %269 = vmatprep.subr.bf16.mxu1 %v4321_v1  ;;  %v4325_v5 = vld [vmem:[%s6715_s0 + $0x24] ss:$16 sps:$4 sm:$0xff]   ;;  %v4327_v6 = vld [vmem:[%s6715_s0 + $0x2c] ss:$16 sps:$4 sm:$0xff]  }
  0x24   :  { %227 = vmatpush1.bf16.msra.mxu0 %v4323_v3  ;;  %270 = vmatpush1.bf16.msra.mxu1 %v4324_v4  ;;  %v4329_v7 = vld [vmem:[%s6715_s0 + $0x20] ss:$16 sps:$4 sm:$0xff]   ;;  %v4330_v8 = vld [vmem:[%s6715_s0 + $0x28] ss:$16 sps:$4 sm:$0xff]   ;;  %v4331_v9 = vld [vmem:[%s6715_s0 + $0x44] ss:$16 sps:$4 sm:$0xff]  }
  0x25   :  { %228 = vmatprep.subr.bf16.mxu0 %v4325_v5  ;;  %271 = vmatprep.subr.bf16.mxu1 %v4327_v6  ;;  %v4333_v10 = vld [vmem:[%s6715_s0 + $0x4c] ss:$16 sps:$4 sm:$0xff]   ;;  %v4335_v11 = vld [vmem:[%s6715_s0 + $0x40] ss:$16 sps:$4 sm:$0xff]   ;;  %v4336_v12 = vld [vmem:[%s6715_s0 + $0x48] ss:$16 sps:$4 sm:$0xff]  }
  0x26   :  { %v4337_v13 = vld [vmem:[%s6715_s0 + $0x64] ss:$16 sps:$4 sm:$0xff]   ;;  %v4339_v14 = vld [vmem:[%s6715_s0 + $0x6c] ss:$16 sps:$4 sm:$0xff]   ;;  %v4341_v15 = vld [vmem:[%s6715_s0 + $0x60] ss:$16 sps:$4 sm:$0xff]  }
  0x27   :  { %v4342_v16 = vld [vmem:[%s6715_s0 + $0x68] ss:$16 sps:$4 sm:$0xff]   ;;  %v101_v17 = vld [vmem:[%s6716_s16] sm:$0xff]  ;;  %v5163_v20 = vld [vmem:[%s6717_s3 + $0xc] ss:$16 sps:$4 sm:$0xff]   ;;  %6718 = vst [vmem:[#allocation8_spill] sm:$0xff] %v5387_v62 }
  0x28   :  { %229 = vmatpush1.bf16.msra.mxu0 %v4329_v7  ;;  %272 = vmatpush1.bf16.msra.mxu1 %v4330_v8  ;;  %v102_v18 = vld [vmem:[%s6716_s16 + $0x8] sm:$0xff]  ;;  %v5158_v19 = vld [vmem:[%s6717_s3 + $0x4] ss:$16 sps:$4 sm:$0xff]   ;;  %v5168_v22 = vld [vmem:[%s6717_s3] ss:$16 sps:$4 sm:$0xff]   ;;  %v5392_v0 = vsub.s32 1, %v123_v61 }
  0x29   :  { %230 = vmatprep.subr.bf16.mxu0 %v4331_v9  ;;  %273 = vmatprep.subr.bf16.mxu1 %v4333_v10  ;;  %v103_v21 = vpack.c.bf16 %v102_v18, %v101_v17  ;;  %v5173_v23 = vld [vmem:[%s6717_s3 + $0x8] ss:$16 sps:$4 sm:$0xff]   ;;  %v5178_v24 = vld [vmem:[%s6717_s3 + $0x24] ss:$16 sps:$4 sm:$0xff]   ;;  %v5185_v25 = vld [vmem:[%s6717_s3 + $0x2c] ss:$16 sps:$4 sm:$0xff]  }
  0x2a   :  { %v5190_v26 = vld [vmem:[%s6717_s3 + $0x20] ss:$16 sps:$4 sm:$0xff]   ;;  %v5197_v27 = vld [vmem:[%s6717_s3 + $0x28] ss:$16 sps:$4 sm:$0xff]   ;;  %v5204_v28 = vld [vmem:[%s6717_s3 + $0x44] ss:$16 sps:$4 sm:$0xff]  }
  0x2b   :  { %v5209_v29 = vld [vmem:[%s6717_s3 + $0x4c] ss:$16 sps:$4 sm:$0xff]   ;;  %v5216_v30 = vld [vmem:[%s6717_s3 + $0x40] ss:$16 sps:$4 sm:$0xff]   ;;  %v5223_v31 = vld [vmem:[%s6717_s3 + $0x48] ss:$16 sps:$4 sm:$0xff]  }
  0x2c   :  { %231 = vmatpush1.bf16.msra.mxu0 %v4335_v11  ;;  %274 = vmatpush1.bf16.msra.mxu1 %v4336_v12  ;;  %v5228_v32 = vld [vmem:[%s6717_s3 + $0x64] ss:$16 sps:$4 sm:$0xff]   ;;  %v5235_v33 = vld [vmem:[%s6717_s3 + $0x6c] ss:$16 sps:$4 sm:$0xff]   ;;  %v5240_v34 = vld [vmem:[%s6717_s3 + $0x60] ss:$16 sps:$4 sm:$0xff]  }
  0x2d   :  { %232 = vmatprep.subr.bf16.mxu0 %v4337_v13  ;;  %275 = vmatprep.subr.bf16.mxu1 %v4339_v14  ;;  %v5247_v35 = vld [vmem:[%s6717_s3 + $0x68] ss:$16 sps:$4 sm:$0xff]   ;;  %v5254_v36 = vld [vmem:[%s6717_s3 + $0x84] ss:$16 sps:$4 sm:$0xff]   ;;  %v5259_v37 = vld [vmem:[%s6717_s3 + $0x8c] ss:$16 sps:$4 sm:$0xff]  }
  0x2e   :  { %v5264_v38 = vld [vmem:[%s6717_s3 + $0x80] ss:$16 sps:$4 sm:$0xff]   ;;  %v5271_v39 = vld [vmem:[%s6717_s3 + $0x88] ss:$16 sps:$4 sm:$0xff]   ;;  %v5276_v40 = vld [vmem:[%s6717_s3 + $0xa4] ss:$16 sps:$4 sm:$0xff]  }
  0x2f   :  { %v5281_v41 = vld [vmem:[%s6717_s3 + $0xac] ss:$16 sps:$4 sm:$0xff]   ;;  %v5288_v42 = vld [vmem:[%s6717_s3 + $0xa0] ss:$16 sps:$4 sm:$0xff]   ;;  %v5293_v43 = vld [vmem:[%s6717_s3 + $0xa8] ss:$16 sps:$4 sm:$0xff]  }
  0x30   :  { %233 = vmatpush1.bf16.msra.mxu0 %v4341_v15  ;;  %276 = vmatpush1.bf16.msra.mxu1 %v4342_v16  ;;  %v5298_v44 = vld [vmem:[%s6717_s3 + $0xc4] ss:$16 sps:$4 sm:$0xff]   ;;  %v5303_v45 = vld [vmem:[%s6717_s3 + $0xcc] ss:$16 sps:$4 sm:$0xff]   ;;  %v5312_v46 = vld [vmem:[%s6717_s3 + $0xc0] ss:$16 sps:$4 sm:$0xff]  }
  0x31   :  { %504 = vmatprep.subr.bf16.mxu0 %v5158_v19  ;;  %545 = vmatprep.subr.bf16.mxu1 %v5163_v20  ;;  %v5317_v47 = vld [vmem:[%s6717_s3 + $0xc8] ss:$16 sps:$4 sm:$0xff]   ;;  %v5322_v48 = vld [vmem:[%s6717_s3 + $0xe4] ss:$16 sps:$4 sm:$0xff]   ;;  %v5327_v49 = vld [vmem:[%s6717_s3 + $0xec] ss:$16 sps:$4 sm:$0xff]  }
  0x32   :  { %v5336_v50 = vld [vmem:[%s6717_s3 + $0xe0] ss:$16 sps:$4 sm:$0xff]   ;;  %v5341_v51 = vld [vmem:[%s6717_s3 + $0xe8] ss:$16 sps:$4 sm:$0xff]   ;;  %6720 = vst [vmem:[#allocation9_spill] sm:$0xff] %v5392_v0  ;;  %v136_v4 = vsub.s32 3, %v123_v61 }
  0x33   :  { %3851 = vmatmul.mubr.msk.bf16.vlgmr.msra.gmra.mrb[0].mxu0 %vm222_vm0, %v103_v21  ;;  %3852 = vmatmul.mubr.msk.bf16.vlgmr.msra.gmra.mrb[0].mxu1 %vm222_vm0, %v103_v21  ;;  %v120_v63 = vld [vmem:[%s6719_s30] sm:$0xf]  ;;  %v5402_v10 = vsub.s32 2, %v123_v61  ;;  %s6729_s16 = sld [smem:[#allocation22_spill]]  ;;  %s3989_s0 = sld [smem:[#allocation2 + $0x1]] }
  0x34   :  { %505 = vmatpush1.bf16.msra.mxu0 %v5168_v22  ;;  %546 = vmatpush1.bf16.msra.mxu1 %v5173_v23  ;;  %v125_v1 = vrot.slane %v120_v63, %v5387_v62  ;;  %v129_v3 = vrot.slane %v120_v63, %v5392_v0  ;;  %v137_v16 = vrot.slane %v120_v63, %v136_v4 }
  0x35   :  { %506 = vmatprep.subr.bf16.mxu0 %v5178_v24  ;;  %547 = vmatprep.subr.bf16.mxu1 %v5185_v25  ;;  %6721 = vst [vmem:[#allocation10_spill] sm:$0xff] %v5402_v10 }
  0x36   :  { %536 = vmatprep.mubr.bf16.mxu0 %v6691_v2  ;;  %577 = vmatprep.mubr.bf16.mxu1 %v6691_v2 }
  0x38   :  { %507 = vmatpush1.bf16.msra.mxu0 %v5190_v26  ;;  %548 = vmatpush1.bf16.msra.mxu1 %v5197_v27 }
  0x39   :  { %508 = vmatprep.subr.bf16.mxu0 %v5204_v28  ;;  %549 = vmatprep.subr.bf16.mxu1 %v5209_v29 }
  0x3c   :  { %509 = vmatpush1.bf16.msra.mxu0 %v5216_v30  ;;  %550 = vmatpush1.bf16.msra.mxu1 %v5223_v31 }
  0x3d   :  { %510 = vmatprep.subr.bf16.mxu0 %v5228_v32  ;;  %551 = vmatprep.subr.bf16.mxu1 %v5235_v33 }
  0x40   :  { %511 = vmatpush1.bf16.msra.mxu0 %v5240_v34  ;;  %552 = vmatpush1.bf16.msra.mxu1 %v5247_v35 }
  0x41   :  { %512 = vmatprep.subr.bf16.mxu0 %v5254_v36  ;;  %553 = vmatprep.subr.bf16.mxu1 %v5259_v37 }
  0x44   :  { %513 = vmatpush1.bf16.msra.mxu0 %v5264_v38  ;;  %554 = vmatpush1.bf16.msra.mxu1 %v5271_v39 }
  0x45   :  { %514 = vmatprep.subr.bf16.mxu0 %v5276_v40  ;;  %555 = vmatprep.subr.bf16.mxu1 %v5281_v41 }
  0x48   :  { %515 = vmatpush1.bf16.msra.mxu0 %v5288_v42  ;;  %556 = vmatpush1.bf16.msra.mxu1 %v5293_v43 }
  0x49   :  { %516 = vmatprep.subr.bf16.mxu0 %v5298_v44  ;;  %557 = vmatprep.subr.bf16.mxu1 %v5303_v45 }
  0x4c   :  { %517 = vmatpush1.bf16.msra.mxu0 %v5312_v46  ;;  %558 = vmatpush1.bf16.msra.mxu1 %v5317_v47 }
  0x4d   :  { %518 = vmatprep.subr.bf16.mxu0 %v5322_v48  ;;  %559 = vmatprep.subr.bf16.mxu1 %v5327_v49 }
  0x50   :  { %519 = vmatpush1.bf16.msra.mxu0 %v5336_v50  ;;  %560 = vmatpush1.bf16.msra.mxu1 %v5341_v51 }
  0x51   :  { %669 = vmatprep.subr.bf16.mxu0 %v5158_v19  ;;  %710 = vmatprep.subr.bf16.mxu1 %v5163_v20 }
  0x53   :  { %537 = vmatmul.mubr.bf16.vlgmr.msra.gmra.mrb[4].mxu0 %v6691_v2  ;;  %578 = vmatmul.mubr.bf16.vlgmr.msra.gmra.mrb[4].mxu1 %v6691_v2 }
  0x54   :  { %670 = vmatpush1.bf16.msra.mxu0 %v5168_v22  ;;  %711 = vmatpush1.bf16.msra.mxu1 %v5173_v23 }
  0x55   :  { %671 = vmatprep.subr.bf16.mxu0 %v5178_v24  ;;  %712 = vmatprep.subr.bf16.mxu1 %v5185_v25 }
  0x56   :  { %701 = vmatprep.mubr.bf16.mxu0 %v6691_v2  ;;  %742 = vmatprep.mubr.bf16.mxu1 %v6691_v2 }
  0x58   :  { %672 = vmatpush1.bf16.msra.mxu0 %v5190_v26  ;;  %713 = vmatpush1.bf16.msra.mxu1 %v5197_v27 }
  0x59   :  { %673 = vmatprep.subr.bf16.mxu0 %v5204_v28  ;;  %714 = vmatprep.subr.bf16.mxu1 %v5209_v29 }
  0x5c   :  { %674 = vmatpush1.bf16.msra.mxu0 %v5216_v30  ;;  %715 = vmatpush1.bf16.msra.mxu1 %v5223_v31 }
  0x5d   :  { %675 = vmatprep.subr.bf16.mxu0 %v5228_v32  ;;  %716 = vmatprep.subr.bf16.mxu1 %v5235_v33 }
  0x60   :  { %676 = vmatpush1.bf16.msra.mxu0 %v5240_v34  ;;  %717 = vmatpush1.bf16.msra.mxu1 %v5247_v35 }
  0x61   :  { %677 = vmatprep.subr.bf16.mxu0 %v5254_v36  ;;  %718 = vmatprep.subr.bf16.mxu1 %v5259_v37 }
  0x64   :  { %678 = vmatpush1.bf16.msra.mxu0 %v5264_v38  ;;  %719 = vmatpush1.bf16.msra.mxu1 %v5271_v39 }
  0x65   :  { %679 = vmatprep.subr.bf16.mxu0 %v5276_v40  ;;  %720 = vmatprep.subr.bf16.mxu1 %v5281_v41 }
  0x68   :  { %680 = vmatpush1.bf16.msra.mxu0 %v5288_v42  ;;  %721 = vmatpush1.bf16.msra.mxu1 %v5293_v43 }
  0x69   :  { %681 = vmatprep.subr.bf16.mxu0 %v5298_v44  ;;  %722 = vmatprep.subr.bf16.mxu1 %v5303_v45 }
  0x6c   :  { %682 = vmatpush1.bf16.msra.mxu0 %v5312_v46  ;;  %723 = vmatpush1.bf16.msra.mxu1 %v5317_v47 }
  0x6d   :  { %683 = vmatprep.subr.bf16.mxu0 %v5322_v48  ;;  %724 = vmatprep.subr.bf16.mxu1 %v5327_v49 }
  0x70   :  { %684 = vmatpush1.bf16.msra.mxu0 %v5336_v50  ;;  %725 = vmatpush1.bf16.msra.mxu1 %v5341_v51 }
  0x71   :  { %839 = vmatprep.subr.bf16.mxu0 %v5158_v19  ;;  %880 = vmatprep.subr.bf16.mxu1 %v5163_v20 }
 0x106   :  { %v260_v52 = vpop.f32.mrb[0].mxu0  ;;  %v303_v53 = vpop.f32.mrb[0].mxu1 }
 0x107   :  { %v262_v54 = vpop.f32.mrb[1].mxu0  ;;  %v305_v55 = vpop.f32.mrb[1].mxu1  ;;  %v5396_v5 = vadd.f32 %v260_v52, %v125_v1 }
 0x108   :  { %v264_v56 = vpop.f32.mrb[2].mxu0  ;;  %v307_v57 = vpop.f32.mrb[2].mxu1  ;;  %v5398_v6 = vadd.f32 %v262_v54, %v129_v3 }
 0x109   :  { %v266_v58 = vpop.f32.mrb[3].mxu0  ;;  %v309_v59 = vpop.f32.mrb[3].mxu1  ;;  %v5400_v9 = vadd.f32 %v264_v56, %v125_v1 }
 0x10a   :  { %v5405_v15 = vadd.f32 %v266_v58, %v129_v3  ;;  %v5411_v3 = vadd.f32 %v305_v55, %v137_v16  ;;  %v5413_v62 = vadd.f32 %v309_v59, %v137_v16 }
 0x126   :  { %v538_v7 = vpop.f32.mrb[4].mxu0  ;;  %v579_v8 = vpop.f32.mrb[4].mxu1 }
 0x127   :  { %v590_v11 = vrot.slane %v538_v7, 1  ;;  %v602_v12 = vadd.f32 %v538_v7, %v5396_v5  ;;  %v540_v13 = vpop.f32.mrb[5].mxu0  ;;  %v581_v14 = vpop.f32.mrb[5].mxu1  ;;  %v133_v7 = vrot.slane %v120_v63, %v5402_v10 }
 0x128   :  { %v591_v17 = vrot.slane %v540_v13, 1  ;;  %v603_v18 = vadd.f32 %v540_v13, %v5398_v6  ;;  %v542_v21 = vpop.f32.mrb[6].mxu0  ;;  %v583_v52 = vpop.f32.mrb[6].mxu1  ;;  %v593_v58 = vrot.slane %v581_v14, 1 }
 0x129   :  { %v606_v54 = vadd.f32 %v590_v11, %v5400_v9  ;;  %v3885_v60 = vmul.f32 -1.442695, %v602_v12  ;;  %v543_v56 = vpop.f32.mrb[7].mxu0  ;;  %v584_v1 = vpop.f32.mrb[7].mxu1  ;;  %v605_v11 = vadd.f32 %v581_v14, %v5411_v3  ;;  %v5416_v12 = vadd.f32 %v303_v53, %v133_v7 }
 0x12a   :  { %v607_v61 = vadd.f32 %v591_v17, %v5405_v15  ;;  %v3887_v2 = vmul.f32 -1.442695, %v603_v18  ;;  %v609_v13 = vadd.f32 %v593_v58, %v5413_v62  ;;  %v592_v17 = vrot.slane %v579_v8, 1 }
 0x12b   :  { %4591 = vpow2.f32 %v3885_v60  ;;  %v3886_v0 = vmul.f32 -1.442695, %v606_v54  ;;  %v604_v63 = vadd.f32 %v579_v8, %v5416_v12  ;;  %v3889_v18 = vmul.f32 -1.442695, %v605_v11 }
 0x12c   :  { %v3888_v4 = vmul.f32 -1.442695, %v607_v61  ;;  %v5420_v21 = vadd.f32 %v307_v57, %v133_v7  ;;  %v3890_v55 = vmul.f32 -1.442695, %v609_v13 }
 0x12d   :  { %4593 = vpow2.f32 %v3886_v0 }
 0x12e   :  { %4595 = vpow2.f32 %v3887_v2  ;;  %v608_v59 = vadd.f32 %v592_v17, %v5420_v21 }
 0x12f   :  { %4597 = vpow2.f32 %v3888_v4 }
 0x130   :  { %4599 = vtanh.f32 %v604_v63 }
 0x131   :  { %4601 = vpow2.f32 %v3889_v18 }
 0x132   :  { %4603 = vpow2.f32 %v3890_v55 }
 0x135   :  { %v4592_v52 = vpop.eup %4591 }
 0x136   :  { %v616_v0 = vadd.f32 1.0, %v4592_v52 }
 0x137   :  { %v4594_v2 = vpop.eup %4593 }
 0x138   :  { %v4596_v53 = vpop.eup %4595  ;;  %v617_v14 = vadd.f32 1.0, %v4594_v2  ;;  %4605 = vrcp.f32 %v616_v0 }
 0x139   :  { %v4598_v16 = vpop.eup %4597  ;;  %4607 = vtanh.f32 %v608_v59  ;;  %v628_v54 = vadd.f32 1.0, %v4596_v53 }
 0x13a   :  { %4609 = vrcp.f32 %v617_v14  ;;  %v629_v8 = vadd.f32 1.0, %v4598_v16  ;;  %v4600_v57 = vpop.eup %4599 }
 0x13b   :  { %4611 = vrcp.f32 %v628_v54  ;;  %v4602_v60 = vpop.eup %4601 }
 0x13c   :  { %4613 = vrcp.f32 %v629_v8  ;;  %v4604_v56 = vpop.eup %4603  ;;  %v642_v4 = vadd.f32 1.0, %v4602_v60 }
 0x13d   :  { %v643_v17 = vadd.f32 1.0, %v4604_v56 }
 0x13e   :  { %4615 = vrcp.f32 %v642_v4 }
 0x13f   :  { %4617 = vrcp.f32 %v643_v17 }
 0x142   :  { %v4606_v1 = vpop.eup %4605 }
 0x143   :  { %v4608_v61 = vpop.eup %4607  ;;  %v650_v7 = vmul.f32 %v4606_v1, %v4600_v57 }
 0x144   :  { %v4610_v58 = vpop.eup %4609 }
 0x145   :  { %v4612_v11 = vpop.eup %4611  ;;  %v651_v13 = vmul.f32 %v4610_v58, %v4608_v61  ;;  %v6722_v58 = vmov 0  }
 0x146   :  { %v4614_v63 = vpop.eup %4613  ;;  %v648_v18 = vmul.f32 0.0, %v4612_v11 }
 0x147   :  { %v649_v55 = vmul.f32 0.0, %v4614_v63 }
 0x148   :  { %v5423_v52 = vadd.f32 %v650_v7, %v648_v18  ;;  %v4616_v0 = vpop.eup %4615 }
 0x149   :  { %v5425_v59 = vadd.f32 %v651_v13, %v649_v55  ;;  %v4618_v2 = vpop.eup %4617 }
 0x14a   :  { %4619 = vtanh.f32 %v5423_v52 }
 0x14b   :  { %4621 = vtanh.f32 %v5425_v59 }
 0x154   :  { %v4620_v53 = vpop.eup %4619 }
 0x155   :  { %v4622_v14 = vpop.eup %4621  ;;  %v5429_v16 = vmul.f32 %v4620_v53, %v4616_v0 }
 0x156   :  { %v5431_v54 = vmul.f32 %v4622_v14, %v4618_v2 }
 0x157   :  { %v658_v8 = vpack.c.bf16 %v5429_v16, %v5429_v16 }
 0x158   :  { %v659_v57 = vpack.c.bf16 %v5431_v54, %v5431_v54 }
 0x159   :  { %v662_v56 = vunpack.c.l.b16 %v658_v8 }
 0x15a   :  { %v663_v60 = vunpack.c.l.b16 %v659_v57 }
 0x15c   :  { %v664_v1 = vrot.slane %v663_v60, 7 }
 0x15e   :  { %v666_v61 = vsel %vm665_vm1, %v664_v1, %v662_v56  ;;  %v815_v1 = vrot.slane %v5423_v52, 7 }
 0x15f   :  { %v667_v7 = vpack.c.b16 %v666_v61, %v666_v61 }
 0x161   :  { %702 = vmatmul.mubr.bf16.vlgmr.msra.gmra.mrb[8].mxu0 %v667_v7  ;;  %743 = vmatmul.mubr.bf16.vlgmr.msra.gmra.mrb[8].mxu1 %v667_v7 }
 0x162   :  { %840 = vmatpush1.bf16.msra.mxu0 %v5168_v22  ;;  %881 = vmatpush1.bf16.msra.mxu1 %v5173_v23 }
 0x163   :  { %841 = vmatprep.subr.bf16.mxu0 %v5178_v24  ;;  %882 = vmatprep.subr.bf16.mxu1 %v5185_v25 }
 0x164   :  { %871 = vmatprep.mubr.bf16.mxu0 %v6722_v58  ;;  %912 = vmatprep.mubr.bf16.mxu1 %v6722_v58 }
 0x166   :  { %842 = vmatpush1.bf16.msra.mxu0 %v5190_v26  ;;  %883 = vmatpush1.bf16.msra.mxu1 %v5197_v27 }
 0x167   :  { %843 = vmatprep.subr.bf16.mxu0 %v5204_v28  ;;  %884 = vmatprep.subr.bf16.mxu1 %v5209_v29 }
 0x16a   :  { %844 = vmatpush1.bf16.msra.mxu0 %v5216_v30  ;;  %885 = vmatpush1.bf16.msra.mxu1 %v5223_v31 }
 0x16b   :  { %845 = vmatprep.subr.bf16.mxu0 %v5228_v32  ;;  %886 = vmatprep.subr.bf16.mxu1 %v5235_v33 }
 0x16e   :  { %846 = vmatpush1.bf16.msra.mxu0 %v5240_v34  ;;  %887 = vmatpush1.bf16.msra.mxu1 %v5247_v35 }
 0x16f   :  { %847 = vmatprep.subr.bf16.mxu0 %v5254_v36  ;;  %888 = vmatprep.subr.bf16.mxu1 %v5259_v37 }
 0x172   :  { %848 = vmatpush1.bf16.msra.mxu0 %v5264_v38  ;;  %889 = vmatpush1.bf16.msra.mxu1 %v5271_v39 }
 0x173   :  { %849 = vmatprep.subr.bf16.mxu0 %v5276_v40  ;;  %890 = vmatprep.subr.bf16.mxu1 %v5281_v41 }
 0x176   :  { %850 = vmatpush1.bf16.msra.mxu0 %v5288_v42  ;;  %891 = vmatpush1.bf16.msra.mxu1 %v5293_v43 }
 0x177   :  { %851 = vmatprep.subr.bf16.mxu0 %v5298_v44  ;;  %892 = vmatprep.subr.bf16.mxu1 %v5303_v45 }
 0x17a   :  { %852 = vmatpush1.bf16.msra.mxu0 %v5312_v46  ;;  %893 = vmatpush1.bf16.msra.mxu1 %v5317_v47 }
 0x17b   :  { %853 = vmatprep.subr.bf16.mxu0 %v5322_v48  ;;  %894 = vmatprep.subr.bf16.mxu1 %v5327_v49 }
 0x17e   :  { %854 = vmatpush1.bf16.msra.mxu0 %v5336_v50  ;;  %895 = vmatpush1.bf16.msra.mxu1 %v5341_v51 }
 0x17f   :  { %1014 = vmatprep.subr.bf16.mxu0 %v5158_v19  ;;  %1055 = vmatprep.subr.bf16.mxu1 %v5163_v20 }
 0x234   :  { %v703_v22 = vpop.f32.mrb[8].mxu0  ;;  %v744_v23 = vpop.f32.mrb[8].mxu1 }
 0x235   :  { %v755_v24 = vrot.slane %v703_v22, 7  ;;  %v771_v25 = vadd.f32 %v703_v22, %v5400_v9  ;;  %v705_v26 = vpop.f32.mrb[9].mxu0  ;;  %v746_v27 = vpop.f32.mrb[9].mxu1  ;;  %v757_v41 = vrot.slane %v744_v23, 7  ;;  %v773_v42 = vadd.f32 %v744_v23, %v5420_v21 }
 0x236   :  { %v756_v28 = vrot.slane %v705_v26, 7  ;;  %v772_v29 = vadd.f32 %v705_v26, %v5405_v15  ;;  %v707_v30 = vpop.f32.mrb[10].mxu0  ;;  %v748_v31 = vpop.f32.mrb[10].mxu1  ;;  %v758_v20 = vrot.slane %v746_v27, 7  ;;  %v774_v40 = vadd.f32 %v746_v27, %v5413_v62 }
 0x237   :  { %v767_v32 = vadd.f32 %v755_v24, %v5396_v5  ;;  %v3892_v33 = vmul.f32 -1.442695, %v771_v25  ;;  %v708_v34 = vpop.f32.mrb[11].mxu0  ;;  %v749_v35 = vpop.f32.mrb[11].mxu1  ;;  %v769_v4 = vadd.f32 %v757_v41, %v5416_v12  ;;  %v816_v22 = vrot.slane %v5425_v59, 7 }
 0x238   :  { %v768_v19 = vadd.f32 %v756_v28, %v5398_v6  ;;  %v3894_v37 = vmul.f32 -1.442695, %v772_v29  ;;  %v770_v39 = vadd.f32 %v758_v20, %v5411_v3  ;;  %v3896_v44 = vmul.f32 -1.442695, %v774_v40  ;;  %v5506_v40 = vld [vmem:[%s6717_s3 + $0x8] ss:$16 sps:$4 sm:$0xff]  }
 0x239   :  { %v3891_v36 = vmul.f32 -1.442695, %v767_v32  ;;  %4623 = vpow2.f32 %v3892_v33  ;;  %v5512_v41 = vld [vmem:[%s6717_s3 + $0x24] ss:$16 sps:$4 sm:$0xff]  }
 0x23a   :  { %v3893_v38 = vmul.f32 -1.442695, %v768_v19  ;;  %v3895_v43 = vmul.f32 -1.442695, %v770_v39  ;;  %v5500_v39 = vld [vmem:[%s6717_s3] ss:$16 sps:$4 sm:$0xff]  }
 0x23b   :  { %4625 = vpow2.f32 %v3891_v36 }
 0x23c   :  { %4627 = vpow2.f32 %v3893_v38 }
 0x23d   :  { %4629 = vpow2.f32 %v3894_v37 }
 0x23e   :  { %4631 = vtanh.f32 %v773_v42  ;;  %v5518_v42 = vld [vmem:[%s6717_s3 + $0x2c] ss:$16 sps:$4 sm:$0xff]  }
 0x23f   :  { %4633 = vpow2.f32 %v3895_v43  ;;  %v5526_v43 = vld [vmem:[%s6717_s3 + $0x20] ss:$16 sps:$4 sm:$0xff]  }
 0x240   :  { %4635 = vpow2.f32 %v3896_v44  ;;  %v5532_v44 = vld [vmem:[%s6717_s3 + $0x28] ss:$16 sps:$4 sm:$0xff]  }
 0x243   :  { %v4624_v45 = vpop.eup %4623 }
 0x244   :  { %v782_v11 = vadd.f32 1.0, %v4624_v45  ;;  %v5538_v45 = vld [vmem:[%s6717_s3 + $0x44] ss:$16 sps:$4 sm:$0xff]  }
 0x245   :  { %v4626_v13 = vpop.eup %4625 }
 0x246   :  { %v4628_v17 = vpop.eup %4627  ;;  %v781_v63 = vadd.f32 1.0, %v4626_v13  ;;  %4637 = vrcp.f32 %v782_v11  ;;  %v5550_v11 = vld [vmem:[%s6717_s3 + $0x40] ss:$16 sps:$4 sm:$0xff]   ;;  %v5556_v13 = vld [vmem:[%s6717_s3 + $0x48] ss:$16 sps:$4 sm:$0xff]  }
 0x247   :  { %v4630_v18 = vpop.eup %4629  ;;  %4639 = vtanh.f32 %v769_v4  ;;  %v793_v55 = vadd.f32 1.0, %v4628_v17  ;;  %v5544_v4 = vld [vmem:[%s6717_s3 + $0x4c] ss:$16 sps:$4 sm:$0xff]   ;;  %v5562_v17 = vld [vmem:[%s6717_s3 + $0x64] ss:$16 sps:$4 sm:$0xff]  }
 0x248   :  { %4641 = vrcp.f32 %v781_v63  ;;  %v794_v0 = vadd.f32 1.0, %v4630_v18  ;;  %v4632_v2 = vpop.eup %4631  ;;  %v5568_v63 = vld [vmem:[%s6717_s3 + $0x6c] ss:$16 sps:$4 sm:$0xff]   ;;  %v5574_v18 = vld [vmem:[%s6717_s3 + $0x60] ss:$16 sps:$4 sm:$0xff]  }
 0x249   :  { %4643 = vrcp.f32 %v793_v55  ;;  %v4634_v53 = vpop.eup %4633  ;;  %v5580_v55 = vld [vmem:[%s6717_s3 + $0x68] ss:$16 sps:$4 sm:$0xff]  }
 0x24a   :  { %4645 = vrcp.f32 %v794_v0  ;;  %v4636_v14 = vpop.eup %4635  ;;  %v807_v61 = vadd.f32 1.0, %v4634_v53  ;;  %v5586_v0 = vld [vmem:[%s6717_s3 + $0x84] ss:$16 sps:$4 sm:$0xff]   ;;  %v5598_v53 = vld [vmem:[%s6717_s3 + $0x80] ss:$16 sps:$4 sm:$0xff]  }
 0x24b   :  { %v808_v24 = vadd.f32 1.0, %v4636_v14  ;;  %v5604_v14 = vld [vmem:[%s6717_s3 + $0x88] ss:$16 sps:$4 sm:$0xff]  }
 0x24c   :  { %4647 = vrcp.f32 %v807_v61  ;;  %v5640_v61 = vld [vmem:[%s6717_s3 + $0xcc] ss:$16 sps:$4 sm:$0xff]  }
 0x24d   :  { %4649 = vrcp.f32 %v808_v24 }
 0x250   :  { %v4638_v8 = vpop.eup %4637 }
 0x251   :  { %v4640_v57 = vpop.eup %4639  ;;  %v822_v60 = vmul.f32 %v4638_v8, %v4632_v2  ;;  %v5592_v2 = vld [vmem:[%s6717_s3 + $0x8c] ss:$16 sps:$4 sm:$0xff]   ;;  %v5610_v8 = vld [vmem:[%s6717_s3 + $0xa4] ss:$16 sps:$4 sm:$0xff]  }
 0x252   :  { %v4642_v56 = vpop.eup %4641 }
 0x253   :  { %v4644_v7 = vpop.eup %4643  ;;  %v821_v23 = vmul.f32 %v4642_v56, %v4640_v57  ;;  %v5616_v57 = vld [vmem:[%s6717_s3 + $0xac] ss:$16 sps:$4 sm:$0xff]   ;;  %v5628_v56 = vld [vmem:[%s6717_s3 + $0xa8] ss:$16 sps:$4 sm:$0xff]  }
 0x254   :  { %v4646_v25 = vpop.eup %4645  ;;  %v819_v26 = vmul.f32 %v4644_v7, %v815_v1  ;;  %v5634_v1 = vld [vmem:[%s6717_s3 + $0xc4] ss:$16 sps:$4 sm:$0xff]  }
 0x255   :  { %v820_v27 = vmul.f32 %v4646_v25, %v816_v22  ;;  %v5652_v7 = vld [vmem:[%s6717_s3 + $0x4] ss:$16 sps:$4 sm:$0xff]  }
 0x256   :  { %v5482_v28 = vadd.f32 %v821_v23, %v819_v26  ;;  %v4648_v52 = vpop.eup %4647  ;;  %6723 = vst [vmem:[#allocation11_spill] sm:$0xff] %v5652_v7 }
 0x257   :  { %v5484_v29 = vadd.f32 %v822_v60, %v820_v27  ;;  %v4650_v30 = vpop.eup %4649  ;;  %v5622_v60 = vld [vmem:[%s6717_s3 + $0xa0] ss:$16 sps:$4 sm:$0xff]  }
 0x258   :  { %4651 = vtanh.f32 %v5482_v28 }
 0x259   :  { %4653 = vtanh.f32 %v5484_v29 }
 0x262   :  { %v4652_v31 = vpop.eup %4651 }
 0x263   :  { %v4654_v32 = vpop.eup %4653  ;;  %v5488_v59 = vmul.f32 %v4652_v31, %v4648_v52 }
 0x264   :  { %v5490_v33 = vmul.f32 %v4654_v32, %v4650_v30 }
 0x265   :  { %v829_v34 = vpack.c.bf16 %v5488_v59, %v5488_v59 }
 0x266   :  { %v830_v35 = vpack.c.bf16 %v5490_v33, %v5490_v33 }
 0x267   :  { %v833_v19 = vunpack.c.l.b16 %v829_v34 }
 0x268   :  { %v834_v20 = vunpack.c.l.b16 %v830_v35 }
 0x269   :  { %v835_v36 = vrot.slane %v833_v19, 1 }
 0x26b   :  { %v836_v37 = vsel %vm665_vm1, %v834_v20, %v835_v36 }
 0x26c   :  { %v837_v38 = vpack.c.b16 %v836_v37, %v836_v37 }
 0x26e   :  { %872 = vmatmul.mubr.bf16.vlgmr.msra.gmra.mrb[12].mxu0 %v837_v38  ;;  %913 = vmatmul.mubr.bf16.vlgmr.msra.gmra.mrb[12].mxu1 %v837_v38 }
 0x26f   :  { %1015 = vmatpush1.bf16.msra.mxu0 %v5500_v39  ;;  %1056 = vmatpush1.bf16.msra.mxu1 %v5506_v40 }
 0x270   :  { %1016 = vmatprep.subr.bf16.mxu0 %v5512_v41  ;;  %1057 = vmatprep.subr.bf16.mxu1 %v5518_v42 }
 0x271   :  { %1046 = vmatprep.mubr.bf16.mxu0 %v6722_v58  ;;  %1087 = vmatprep.mubr.bf16.mxu1 %v6722_v58 }
 0x273   :  { %1017 = vmatpush1.bf16.msra.mxu0 %v5526_v43  ;;  %1058 = vmatpush1.bf16.msra.mxu1 %v5532_v44 }
 0x274   :  { %1018 = vmatprep.subr.bf16.mxu0 %v5538_v45  ;;  %1059 = vmatprep.subr.bf16.mxu1 %v5544_v4 }
 0x277   :  { %1019 = vmatpush1.bf16.msra.mxu0 %v5550_v11  ;;  %1060 = vmatpush1.bf16.msra.mxu1 %v5556_v13 }
 0x278   :  { %1020 = vmatprep.subr.bf16.mxu0 %v5562_v17  ;;  %1061 = vmatprep.subr.bf16.mxu1 %v5568_v63 }
 0x27b   :  { %1021 = vmatpush1.bf16.msra.mxu0 %v5574_v18  ;;  %1062 = vmatpush1.bf16.msra.mxu1 %v5580_v55 }
 0x27c   :  { %1022 = vmatprep.subr.bf16.mxu0 %v5586_v0  ;;  %1063 = vmatprep.subr.bf16.mxu1 %v5592_v2 }
 0x27f   :  { %1023 = vmatpush1.bf16.msra.mxu0 %v5598_v53  ;;  %1064 = vmatpush1.bf16.msra.mxu1 %v5604_v14 }
 0x280   :  { %1024 = vmatprep.subr.bf16.mxu0 %v5610_v8  ;;  %1065 = vmatprep.subr.bf16.mxu1 %v5616_v57 }
 0x283   :  { %1025 = vmatpush1.bf16.msra.mxu0 %v5622_v60  ;;  %1066 = vmatpush1.bf16.msra.mxu1 %v5628_v56 }
 0x284   :  { %1026 = vmatprep.subr.bf16.mxu0 %v5634_v1  ;;  %1067 = vmatprep.subr.bf16.mxu1 %v5640_v61 }
 0x287   :  { %1027 = vmatpush1.bf16.msra.mxu0 %v5312_v46  ;;  %1068 = vmatpush1.bf16.msra.mxu1 %v5317_v47  ;;  %v5658_v46 = vld [vmem:[%s6717_s3 + $0xc] ss:$16 sps:$4 sm:$0xff]  }
 0x288   :  { %1028 = vmatprep.subr.bf16.mxu0 %v5322_v48  ;;  %1069 = vmatprep.subr.bf16.mxu1 %v5327_v49  ;;  %6724 = vst [vmem:[#allocation12_spill] sm:$0xff] %v5658_v46 }
 0x28b   :  { %1029 = vmatpush1.bf16.msra.mxu0 %v5336_v50  ;;  %1070 = vmatpush1.bf16.msra.mxu1 %v5341_v51 }
 0x28c   :  { %1189 = vmatprep.subr.bf16.mxu0 %v5652_v7  ;;  %1230 = vmatprep.subr.bf16.mxu1 %v5658_v46 }
 0x341   :  { %v873_v47 = vpop.f32.mrb[12].mxu0  ;;  %v914_v48 = vpop.f32.mrb[12].mxu1 }
 0x342   :  { %v925_v49 = vrot.slane %v873_v47, 6  ;;  %v929_v50 = vrot.slane %v873_v47, 7  ;;  %v875_v22 = vpop.f32.mrb[13].mxu0  ;;  %v916_v51 = vpop.f32.mrb[13].mxu1  ;;  %v927_v47 = vrot.slane %v914_v48, 6 }
 0x343   :  { %v926_v23 = vrot.slane %v875_v22, 6  ;;  %v930_v24 = vrot.slane %v875_v22, 7  ;;  %v877_v25 = vpop.f32.mrb[14].mxu0  ;;  %v918_v26 = vpop.f32.mrb[14].mxu1  ;;  %v928_v37 = vrot.slane %v916_v51, 6  ;;  %v932_v38 = vrot.slane %v916_v51, 7 }
 0x344   :  { %v941_v27 = vadd.f32 %v925_v49, %v5396_v5  ;;  %v945_v52 = vadd.f32 %v929_v50, %v5400_v9  ;;  %v878_v30 = vpop.f32.mrb[15].mxu0  ;;  %v919_v31 = vpop.f32.mrb[15].mxu1  ;;  %v931_v22 = vrot.slane %v914_v48, 7 }
 0x345   :  { %v942_v32 = vadd.f32 %v926_v23, %v5398_v6  ;;  %v946_v34 = vadd.f32 %v930_v24, %v5405_v15  ;;  %v944_v49 = vadd.f32 %v928_v37, %v5411_v3  ;;  %v948_v50 = vadd.f32 %v932_v38, %v5413_v62 }
 0x346   :  { %v3897_v35 = vmul.f32 -1.442695, %v941_v27  ;;  %v3898_v19 = vmul.f32 -1.442695, %v945_v52  ;;  %v943_v23 = vadd.f32 %v927_v47, %v5416_v12  ;;  %v947_v24 = vadd.f32 %v931_v22, %v5420_v21 }
 0x347   :  { %v3899_v20 = vmul.f32 -1.442695, %v942_v32  ;;  %v3900_v36 = vmul.f32 -1.442695, %v946_v34  ;;  %v3901_v25 = vmul.f32 -1.442695, %v944_v49 }
 0x348   :  { %4655 = vpow2.f32 %v3897_v35  ;;  %v3902_v26 = vmul.f32 -1.442695, %v948_v50  ;;  %v989_v22 = vrot.slane %v5482_v28, 7 }
 0x349   :  { %4657 = vpow2.f32 %v3898_v19 }
 0x34a   :  { %4659 = vpow2.f32 %v3899_v20 }
 0x34b   :  { %4661 = vpow2.f32 %v3900_v36 }
 0x34c   :  { %4663 = vtanh.f32 %v943_v23 }
 0x34d   :  { %4665 = vtanh.f32 %v947_v24  ;;  %v990_v24 = vrot.slane %v5484_v29, 7 }
 0x34e   :  { %4667 = vpow2.f32 %v3901_v25 }
 0x34f   :  { %4669 = vpow2.f32 %v3902_v26 }
 0x352   :  { %v4656_v27 = vpop.eup %4655 }
 0x353   :  { %v4658_v52 = vpop.eup %4657  ;;  %v955_v51 = vadd.f32 1.0, %v4656_v27 }
 0x354   :  { %v4660_v30 = vpop.eup %4659  ;;  %v956_v48 = vadd.f32 1.0, %v4658_v52 }
 0x355   :  { %v4662_v31 = vpop.eup %4661  ;;  %4671 = vrcp.f32 %v955_v51  ;;  %v967_v32 = vadd.f32 1.0, %v4660_v30 }
 0x356   :  { %4673 = vrcp.f32 %v956_v48  ;;  %v968_v34 = vadd.f32 1.0, %v4662_v31  ;;  %v4664_v35 = vpop.eup %4663 }
 0x357   :  { %4675 = vrcp.f32 %v967_v32  ;;  %v4666_v19 = vpop.eup %4665 }
 0x358   :  { %4677 = vrcp.f32 %v968_v34  ;;  %v4668_v20 = vpop.eup %4667  ;;  %v1879_v34 = vsel %vm1878_vm2, %v5429_v16, %v5488_v59  ;;  %v5717_v16 = vld [vmem:[%s6717_s3 + $0xc0] ss:$16 sps:$4 sm:$0xff]   ;;  %v5729_v59 = vld [vmem:[%s6717_s3 + $0xe4] ss:$16 sps:$4 sm:$0xff]  }
 0x359   :  { %v4670_v36 = vpop.eup %4669  ;;  %v981_v49 = vadd.f32 1.0, %v4668_v20 }
 0x35a   :  { %v982_v25 = vadd.f32 1.0, %v4670_v36 }
 0x35b   :  { %4679 = vrcp.f32 %v981_v49 }
 0x35c   :  { %4681 = vrcp.f32 %v982_v25  ;;  %v5741_v25 = vld [vmem:[%s6717_s3 + $0xe0] ss:$16 sps:$4 sm:$0xff]  }
 0x35f   :  { %v4672_v37 = vpop.eup %4671 }
 0x360   :  { %v4674_v38 = vpop.eup %4673  ;;  %v995_v47 = vmul.f32 %v4672_v37, %v4664_v35 }
 0x361   :  { %v4676_v50 = vpop.eup %4675  ;;  %v996_v23 = vmul.f32 %v4674_v38, %v4666_v19  ;;  %v1880_v19 = vsel %vm1878_vm2, %v5431_v54, %v5490_v33  ;;  %v5723_v54 = vld [vmem:[%s6717_s3 + $0xc8] ss:$16 sps:$4 sm:$0xff]   ;;  %v5735_v33 = vld [vmem:[%s6717_s3 + $0xec] ss:$16 sps:$4 sm:$0xff]  }
 0x362   :  { %v4678_v26 = vpop.eup %4677  ;;  %v993_v27 = vmul.f32 %v4676_v50, %v989_v22 }
 0x363   :  { %v994_v52 = vmul.f32 %v4678_v26, %v990_v24  ;;  %v5747_v26 = vld [vmem:[%s6717_s3 + $0xe8] ss:$16 sps:$4 sm:$0xff]   ;;  %s6733_s3 = sld [smem:[#allocation23_spill]] }
 0x364   :  { %v5671_v51 = vadd.f32 %v995_v47, %v993_v27 }
 0x365   :  { %v5673_v30 = vadd.f32 %v996_v23, %v994_v52  ;;  %v4680_v28 = vpop.eup %4679 }
 0x366   :  { %4683 = vtanh.f32 %v5671_v51  ;;  %v4682_v48 = vpop.eup %4681 }
 0x367   :  { %4685 = vtanh.f32 %v5673_v30 }
 0x370   :  { %v4684_v31 = vpop.eup %4683 }
 0x371   :  { %v4686_v29 = vpop.eup %4685  ;;  %v1001_v32 = vmul.f32 %v4684_v31, %v4680_v28 }
 0x372   :  { %v1002_v35 = vmul.f32 %v4686_v29, %v4682_v48 }
 0x373   :  { %v1003_v20 = vpack.c.bf16 %v1001_v32, %v1001_v32  ;;  %v5682_v36 = vsel %vm1881_vm3, %v1879_v34, %v1001_v32 }
 0x374   :  { %v1004_v37 = vpack.c.bf16 %v1002_v35, %v1002_v35  ;;  %v5685_v38 = vsel %vm1881_vm3, %v1880_v19, %v1002_v35 }
 0x375   :  { %v1007_v47 = vunpack.c.l.b16 %v1003_v20 }
 0x376   :  { %v1008_v22 = vunpack.c.l.b16 %v1004_v37 }
 0x377   :  { %v1009_v49 = vrot.slane %v1007_v47, 2 }
 0x378   :  { %v1010_v50 = vrot.slane %v1008_v22, 1 }
 0x37a   :  { %v1011_v23 = vsel %vm665_vm1, %v1010_v50, %v1009_v49 }
 0x37b   :  { %v1012_v24 = vpack.c.b16 %v1011_v23, %v1011_v23 }
 0x37d   :  { %1047 = vmatmul.mubr.bf16.vlgmr.msra.gmra.mrb[16].mxu0 %v1012_v24  ;;  %1088 = vmatmul.mubr.bf16.vlgmr.msra.gmra.mrb[16].mxu1 %v1012_v24 }
 0x37e   :  { %1190 = vmatpush1.bf16.msra.mxu0 %v5500_v39  ;;  %1231 = vmatpush1.bf16.msra.mxu1 %v5506_v40 }
 0x37f   :  { %1191 = vmatprep.subr.bf16.mxu0 %v5512_v41  ;;  %1232 = vmatprep.subr.bf16.mxu1 %v5518_v42 }
 0x380   :  { %1221 = vmatprep.mubr.bf16.mxu0 %v6722_v58  ;;  %1262 = vmatprep.mubr.bf16.mxu1 %v6722_v58 }
 0x382   :  { %1192 = vmatpush1.bf16.msra.mxu0 %v5526_v43  ;;  %1233 = vmatpush1.bf16.msra.mxu1 %v5532_v44 }
 0x383   :  { %1193 = vmatprep.subr.bf16.mxu0 %v5538_v45  ;;  %1234 = vmatprep.subr.bf16.mxu1 %v5544_v4 }
 0x386   :  { %1194 = vmatpush1.bf16.msra.mxu0 %v5550_v11  ;;  %1235 = vmatpush1.bf16.msra.mxu1 %v5556_v13 }
 0x387   :  { %1195 = vmatprep.subr.bf16.mxu0 %v5562_v17  ;;  %1236 = vmatprep.subr.bf16.mxu1 %v5568_v63 }
 0x38a   :  { %1196 = vmatpush1.bf16.msra.mxu0 %v5574_v18  ;;  %1237 = vmatpush1.bf16.msra.mxu1 %v5580_v55 }
 0x38b   :  { %1197 = vmatprep.subr.bf16.mxu0 %v5586_v0  ;;  %1238 = vmatprep.subr.bf16.mxu1 %v5592_v2 }
 0x38e   :  { %1198 = vmatpush1.bf16.msra.mxu0 %v5598_v53  ;;  %1239 = vmatpush1.bf16.msra.mxu1 %v5604_v14 }
 0x38f   :  { %1199 = vmatprep.subr.bf16.mxu0 %v5610_v8  ;;  %1240 = vmatprep.subr.bf16.mxu1 %v5616_v57 }
 0x392   :  { %1200 = vmatpush1.bf16.msra.mxu0 %v5622_v60  ;;  %1241 = vmatpush1.bf16.msra.mxu1 %v5628_v56 }
 0x393   :  { %1201 = vmatprep.subr.bf16.mxu0 %v5634_v1  ;;  %1242 = vmatprep.subr.bf16.mxu1 %v5640_v61 }
 0x396   :  { %1202 = vmatpush1.bf16.msra.mxu0 %v5717_v16  ;;  %1243 = vmatpush1.bf16.msra.mxu1 %v5723_v54 }
 0x397   :  { %1203 = vmatprep.subr.bf16.mxu0 %v5729_v59  ;;  %1244 = vmatprep.subr.bf16.mxu1 %v5735_v33 }
 0x39a   :  { %1204 = vmatpush1.bf16.msra.mxu0 %v5741_v25  ;;  %1245 = vmatpush1.bf16.msra.mxu1 %v5747_v26 }
 0x39b   :  { %1364 = vmatprep.subr.bf16.mxu0 %v5652_v7  ;;  %1405 = vmatprep.subr.bf16.mxu1 %v5658_v46 }
 0x450   :  { %v1048_v27 = vpop.f32.mrb[16].mxu0  ;;  %v1089_v52 = vpop.f32.mrb[16].mxu1 }
 0x451   :  { %v1100_v28 = vrot.slane %v1048_v27, 5  ;;  %v1104_v48 = vrot.slane %v1048_v27, 6  ;;  %v1050_v31 = vpop.f32.mrb[17].mxu0  ;;  %v1091_v29 = vpop.f32.mrb[17].mxu1 }
 0x452   :  { %v1101_v32 = vrot.slane %v1050_v31, 5  ;;  %v1105_v34 = vrot.slane %v1050_v31, 6  ;;  %v1052_v35 = vpop.f32.mrb[18].mxu0  ;;  %v1093_v19 = vpop.f32.mrb[18].mxu1  ;;  %v1103_v46 = vrot.slane %v1091_v29, 5  ;;  %v1107_v7 = vrot.slane %v1091_v29, 6 }
 0x453   :  { %v1116_v20 = vadd.f32 %v1100_v28, %v5396_v5  ;;  %v1120_v37 = vadd.f32 %v1104_v48, %v5400_v9  ;;  %v1053_v47 = vpop.f32.mrb[19].mxu0  ;;  %v1094_v22 = vpop.f32.mrb[19].mxu1  ;;  %v1102_v31 = vrot.slane %v1089_v52, 5  ;;  %v1106_v35 = vrot.slane %v1089_v52, 6 }
 0x454   :  { %v1117_v49 = vadd.f32 %v1101_v32, %v5398_v6  ;;  %v1121_v50 = vadd.f32 %v1105_v34, %v5405_v15  ;;  %v1119_v28 = vadd.f32 %v1103_v46, %v5411_v3  ;;  %v1123_v48 = vadd.f32 %v1107_v7, %v5413_v62 }
 0x455   :  { %v3903_v23 = vmul.f32 -1.442695, %v1116_v20  ;;  %v3904_v24 = vmul.f32 -1.442695, %v1120_v37  ;;  %v1118_v32 = vadd.f32 %v1102_v31, %v5416_v12  ;;  %v1122_v34 = vadd.f32 %v1106_v35, %v5420_v21 }
 0x456   :  { %v3905_v10 = vmul.f32 -1.442695, %v1117_v49  ;;  %v3906_v27 = vmul.f32 -1.442695, %v1121_v50  ;;  %v3907_v19 = vmul.f32 -1.442695, %v1119_v28 }
 0x457   :  { %4687 = vpow2.f32 %v3903_v23  ;;  %v3908_v20 = vmul.f32 -1.442695, %v1123_v48  ;;  %v1164_v28 = vrot.slane %v5671_v51, 7 }
 0x458   :  { %4689 = vpow2.f32 %v3904_v24 }
 0x459   :  { %4691 = vpow2.f32 %v3905_v10 }
 0x45a   :  { %4693 = vpow2.f32 %v3906_v27 }
 0x45b   :  { %4695 = vtanh.f32 %v1118_v32 }
 0x45c   :  { %4697 = vtanh.f32 %v1122_v34 }
 0x45d   :  { %4699 = vpow2.f32 %v3907_v19  ;;  %v1165_v19 = vrot.slane %v5673_v30, 7 }
 0x45e   :  { %4701 = vpow2.f32 %v3908_v20 }
 0x461   :  { %v4688_v37 = vpop.eup %4687 }
 0x462   :  { %v4690_v47 = vpop.eup %4689  ;;  %v1130_v29 = vadd.f32 1.0, %v4688_v37 }
 0x463   :  { %v4692_v22 = vpop.eup %4691  ;;  %v1131_v52 = vadd.f32 1.0, %v4690_v47 }
 0x464   :  { %v4694_v10 = vpop.eup %4693  ;;  %4703 = vrcp.f32 %v1130_v29  ;;  %v1142_v46 = vadd.f32 1.0, %v4692_v22 }
 0x465   :  { %4705 = vrcp.f32 %v1131_v52  ;;  %v1143_v7 = vadd.f32 1.0, %v4694_v10  ;;  %v4696_v49 = vpop.eup %4695 }
 0x466   :  { %4707 = vrcp.f32 %v1142_v46  ;;  %v4698_v50 = vpop.eup %4697 }
 0x467   :  { %4709 = vrcp.f32 %v1143_v7  ;;  %v4700_v23 = vpop.eup %4699 }
 0x468   :  { %v4702_v24 = vpop.eup %4701  ;;  %v1156_v48 = vadd.f32 1.0, %v4700_v23 }
 0x469   :  { %v1157_v20 = vadd.f32 1.0, %v4702_v24 }
 0x46a   :  { %4711 = vrcp.f32 %v1156_v48 }
 0x46b   :  { %4713 = vrcp.f32 %v1157_v20 }
 0x46e   :  { %v4704_v27 = vpop.eup %4703 }
 0x46f   :  { %v4706_v31 = vpop.eup %4705  ;;  %v1170_v35 = vmul.f32 %v4704_v27, %v4696_v49 }
 0x470   :  { %v4708_v32 = vpop.eup %4707  ;;  %v1171_v34 = vmul.f32 %v4706_v31, %v4698_v50 }
 0x471   :  { %v4710_v37 = vpop.eup %4709  ;;  %v1168_v47 = vmul.f32 %v4708_v32, %v1164_v28 }
 0x472   :  { %v1169_v29 = vmul.f32 %v4710_v37, %v1165_v19 }
 0x473   :  { %v5762_v22 = vadd.f32 %v1170_v35, %v1168_v47 }
 0x474   :  { %v5764_v52 = vadd.f32 %v1171_v34, %v1169_v29  ;;  %v4712_v51 = vpop.eup %4711 }
 0x475   :  { %4715 = vtanh.f32 %v5762_v22  ;;  %v4714_v10 = vpop.eup %4713 }
 0x476   :  { %4717 = vtanh.f32 %v5764_v52 }
 0x47f   :  { %v4716_v46 = vpop.eup %4715 }
 0x480   :  { %v4718_v7 = vpop.eup %4717  ;;  %v1176_v30 = vmul.f32 %v4716_v46, %v4712_v51 }
 0x481   :  { %v1177_v49 = vmul.f32 %v4718_v7, %v4714_v10 }
 0x482   :  { %v1178_v50 = vpack.c.bf16 %v1176_v30, %v1176_v30  ;;  %v5769_v23 = vsel %vm1884_vm4, %v5682_v36, %v1176_v30  ;;  %v6725_v36 = vld [vmem:[#allocation11_spill] sm:$0xff] }
 0x483   :  { %v1179_v24 = vpack.c.bf16 %v1177_v49, %v1177_v49  ;;  %v5772_v27 = vsel %vm1884_vm4, %v5685_v38, %v1177_v49  ;;  %v6726_v38 = vld [vmem:[#allocation12_spill] sm:$0xff] }
 0x484   :  { %v1182_v31 = vunpack.c.l.b16 %v1178_v50 }
 0x485   :  { %v1183_v35 = vunpack.c.l.b16 %v1179_v24 }
 0x486   :  { %v1184_v28 = vrot.slane %v1182_v31, 3 }
 0x487   :  { %v1185_v48 = vrot.slane %v1183_v35, 2 }
 0x489   :  { %v1186_v32 = vsel %vm665_vm1, %v1185_v48, %v1184_v28 }
 0x48a   :  { %v1187_v34 = vpack.c.b16 %v1186_v32, %v1186_v32 }
 0x48c   :  { %1222 = vmatmul.mubr.bf16.vlgmr.msra.gmra.mrb[20].mxu0 %v1187_v34  ;;  %1263 = vmatmul.mubr.bf16.vlgmr.msra.gmra.mrb[20].mxu1 %v1187_v34 }
 0x48d   :  { %1365 = vmatpush1.bf16.msra.mxu0 %v5500_v39  ;;  %1406 = vmatpush1.bf16.msra.mxu1 %v5506_v40 }
 0x48e   :  { %1366 = vmatprep.subr.bf16.mxu0 %v5512_v41  ;;  %1407 = vmatprep.subr.bf16.mxu1 %v5518_v42 }
 0x48f   :  { %1396 = vmatprep.mubr.bf16.mxu0 %v6722_v58  ;;  %1437 = vmatprep.mubr.bf16.mxu1 %v6722_v58 }
 0x491   :  { %1367 = vmatpush1.bf16.msra.mxu0 %v5526_v43  ;;  %1408 = vmatpush1.bf16.msra.mxu1 %v5532_v44 }
 0x492   :  { %1368 = vmatprep.subr.bf16.mxu0 %v5538_v45  ;;  %1409 = vmatprep.subr.bf16.mxu1 %v5544_v4 }
 0x495   :  { %1369 = vmatpush1.bf16.msra.mxu0 %v5550_v11  ;;  %1410 = vmatpush1.bf16.msra.mxu1 %v5556_v13 }
 0x496   :  { %1370 = vmatprep.subr.bf16.mxu0 %v5562_v17  ;;  %1411 = vmatprep.subr.bf16.mxu1 %v5568_v63 }
 0x499   :  { %1371 = vmatpush1.bf16.msra.mxu0 %v5574_v18  ;;  %1412 = vmatpush1.bf16.msra.mxu1 %v5580_v55 }
 0x49a   :  { %1372 = vmatprep.subr.bf16.mxu0 %v5586_v0  ;;  %1413 = vmatprep.subr.bf16.mxu1 %v5592_v2 }
 0x49d   :  { %1373 = vmatpush1.bf16.msra.mxu0 %v5598_v53  ;;  %1414 = vmatpush1.bf16.msra.mxu1 %v5604_v14 }
 0x49e   :  { %1374 = vmatprep.subr.bf16.mxu0 %v5610_v8  ;;  %1415 = vmatprep.subr.bf16.mxu1 %v5616_v57 }
 0x4a1   :  { %1375 = vmatpush1.bf16.msra.mxu0 %v5622_v60  ;;  %1416 = vmatpush1.bf16.msra.mxu1 %v5628_v56 }
 0x4a2   :  { %1376 = vmatprep.subr.bf16.mxu0 %v5634_v1  ;;  %1417 = vmatprep.subr.bf16.mxu1 %v5640_v61 }
 0x4a5   :  { %1377 = vmatpush1.bf16.msra.mxu0 %v5717_v16  ;;  %1418 = vmatpush1.bf16.msra.mxu1 %v5723_v54 }
 0x4a6   :  { %1378 = vmatprep.subr.bf16.mxu0 %v5729_v59  ;;  %1419 = vmatprep.subr.bf16.mxu1 %v5735_v33 }
 0x4a9   :  { %1379 = vmatpush1.bf16.msra.mxu0 %v5741_v25  ;;  %1420 = vmatpush1.bf16.msra.mxu1 %v5747_v26 }
 0x4aa   :  { %1539 = vmatprep.subr.bf16.mxu0 %v6725_v36  ;;  %1580 = vmatprep.subr.bf16.mxu1 %v6726_v38 }
 0x55f   :  { %v1223_v19 = vpop.f32.mrb[20].mxu0  ;;  %v1264_v20 = vpop.f32.mrb[20].mxu1 }
 0x560   :  { %v1275_v37 = vrot.slane %v1223_v19, 4  ;;  %v1279_v47 = vrot.slane %v1223_v19, 5  ;;  %v1225_v29 = vpop.f32.mrb[21].mxu0  ;;  %v1266_v51 = vpop.f32.mrb[21].mxu1 }
 0x561   :  { %v1276_v10 = vrot.slane %v1225_v29, 4  ;;  %v1280_v46 = vrot.slane %v1225_v29, 5  ;;  %v1227_v7 = vpop.f32.mrb[22].mxu0  ;;  %v1268_v30 = vpop.f32.mrb[22].mxu1  ;;  %v1278_v38 = vrot.slane %v1266_v51, 4  ;;  %v1282_v36 = vrot.slane %v1266_v51, 5 }
 0x562   :  { %v1291_v49 = vadd.f32 %v1275_v37, %v5396_v5  ;;  %v1295_v50 = vadd.f32 %v1279_v47, %v5400_v9  ;;  %v1228_v24 = vpop.f32.mrb[23].mxu0  ;;  %v1269_v31 = vpop.f32.mrb[23].mxu1  ;;  %v1277_v29 = vrot.slane %v1264_v20, 4  ;;  %v1281_v7 = vrot.slane %v1264_v20, 5 }
 0x563   :  { %v1292_v35 = vadd.f32 %v1276_v10, %v5398_v6  ;;  %v1296_v28 = vadd.f32 %v1280_v46, %v5405_v15  ;;  %v1294_v37 = vadd.f32 %v1278_v38, %v5411_v3  ;;  %v1298_v47 = vadd.f32 %v1282_v36, %v5413_v62 }
 0x564   :  { %v3909_v48 = vmul.f32 -1.442695, %v1291_v49  ;;  %v3910_v32 = vmul.f32 -1.442695, %v1295_v50  ;;  %v1293_v10 = vadd.f32 %v1277_v29, %v5416_v12  ;;  %v1297_v46 = vadd.f32 %v1281_v7, %v5420_v21 }
 0x565   :  { %v3911_v34 = vmul.f32 -1.442695, %v1292_v35  ;;  %v3912_v19 = vmul.f32 -1.442695, %v1296_v28  ;;  %v3913_v30 = vmul.f32 -1.442695, %v1294_v37 }
 0x566   :  { %4719 = vpow2.f32 %v3909_v48  ;;  %v3914_v49 = vmul.f32 -1.442695, %v1298_v47  ;;  %v1339_v37 = vrot.slane %v5762_v22, 7 }
 0x567   :  { %4721 = vpow2.f32 %v3910_v32 }
 0x568   :  { %4723 = vpow2.f32 %v3911_v34 }
 0x569   :  { %4725 = vpow2.f32 %v3912_v19 }
 0x56a   :  { %4727 = vtanh.f32 %v1293_v10 }
 0x56b   :  { %4729 = vtanh.f32 %v1297_v46 }
 0x56c   :  { %4731 = vpow2.f32 %v3913_v30  ;;  %v1340_v30 = vrot.slane %v5764_v52, 7 }
 0x56d   :  { %4733 = vpow2.f32 %v3914_v49 }
 0x570   :  { %v4720_v50 = vpop.eup %4719 }
 0x571   :  { %v4722_v24 = vpop.eup %4721  ;;  %v1305_v51 = vadd.f32 1.0, %v4720_v50 }
 0x572   :  { %v4724_v31 = vpop.eup %4723  ;;  %v1306_v20 = vadd.f32 1.0, %v4722_v24 }
 0x573   :  { %v4726_v35 = vpop.eup %4725  ;;  %4735 = vrcp.f32 %v1305_v51  ;;  %v1317_v38 = vadd.f32 1.0, %v4724_v31 }
 0x574   :  { %4737 = vrcp.f32 %v1306_v20  ;;  %v1318_v36 = vadd.f32 1.0, %v4726_v35  ;;  %v4728_v28 = vpop.eup %4727 }
 0x575   :  { %4739 = vrcp.f32 %v1317_v38  ;;  %v4730_v48 = vpop.eup %4729 }
 0x576   :  { %4741 = vrcp.f32 %v1318_v36  ;;  %v4732_v32 = vpop.eup %4731 }
 0x577   :  { %v4734_v34 = vpop.eup %4733  ;;  %v1331_v47 = vadd.f32 1.0, %v4732_v32 }
 0x578   :  { %v1332_v49 = vadd.f32 1.0, %v4734_v34 }
 0x579   :  { %4743 = vrcp.f32 %v1331_v47 }
 0x57a   :  { %4745 = vrcp.f32 %v1332_v49 }
 0x57d   :  { %v4736_v19 = vpop.eup %4735 }
 0x57e   :  { %v4738_v29 = vpop.eup %4737  ;;  %v1345_v7 = vmul.f32 %v4736_v19, %v4728_v28 }
 0x57f   :  { %v4740_v10 = vpop.eup %4739  ;;  %v1346_v46 = vmul.f32 %v4738_v29, %v4730_v48 }
 0x580   :  { %v4742_v50 = vpop.eup %4741  ;;  %v1343_v24 = vmul.f32 %v4740_v10, %v1339_v37 }
 0x581   :  { %v1344_v51 = vmul.f32 %v4742_v50, %v1340_v30 }
 0x582   :  { %v5819_v31 = vadd.f32 %v1345_v7, %v1343_v24 }
 0x583   :  { %v5821_v20 = vadd.f32 %v1346_v46, %v1344_v51  ;;  %v4744_v22 = vpop.eup %4743 }
 0x584   :  { %4747 = vtanh.f32 %v5819_v31  ;;  %v4746_v35 = vpop.eup %4745 }
 0x585   :  { %4749 = vtanh.f32 %v5821_v20 }
 0x58e   :  { %v4748_v38 = vpop.eup %4747 }
 0x58f   :  { %v4750_v36 = vpop.eup %4749  ;;  %v1351_v52 = vmul.f32 %v4748_v38, %v4744_v22 }
 0x590   :  { %v1352_v28 = vmul.f32 %v4750_v36, %v4746_v35 }
 0x591   :  { %v1353_v48 = vpack.c.bf16 %v1351_v52, %v1351_v52  ;;  %v5826_v32 = vsel %vm1887_vm5, %v5769_v23, %v1351_v52  ;;  %v6727_v23 = vld [vmem:[#allocation11_spill] sm:$0xff] }
 0x592   :  { %v1354_v34 = vpack.c.bf16 %v1352_v28, %v1352_v28  ;;  %v5829_v19 = vsel %vm1887_vm5, %v5772_v27, %v1352_v28  ;;  %v6728_v27 = vld [vmem:[#allocation12_spill] sm:$0xff] }
 0x593   :  { %v1357_v29 = vunpack.c.l.b16 %v1353_v48 }
 0x594   :  { %v1358_v7 = vunpack.c.l.b16 %v1354_v34 }
 0x595   :  { %v1359_v37 = vrot.slane %v1357_v29, 4 }
 0x596   :  { %v1360_v47 = vrot.slane %v1358_v7, 3 }
 0x598   :  { %v1361_v10 = vsel %vm665_vm1, %v1360_v47, %v1359_v37 }
 0x599   :  { %v1362_v46 = vpack.c.b16 %v1361_v10, %v1361_v10 }
 0x59b   :  { %1397 = vmatmul.mubr.bf16.vlgmr.msra.gmra.mrb[24].mxu0 %v1362_v46  ;;  %1438 = vmatmul.mubr.bf16.vlgmr.msra.gmra.mrb[24].mxu1 %v1362_v46 }
 0x59c   :  { %1540 = vmatpush1.bf16.msra.mxu0 %v5500_v39  ;;  %1581 = vmatpush1.bf16.msra.mxu1 %v5506_v40 }
 0x59d   :  { %1541 = vmatprep.subr.bf16.mxu0 %v5512_v41  ;;  %1582 = vmatprep.subr.bf16.mxu1 %v5518_v42 }
 0x59e   :  { %1571 = vmatprep.mubr.bf16.mxu0 %v6722_v58  ;;  %1612 = vmatprep.mubr.bf16.mxu1 %v6722_v58 }
 0x5a0   :  { %1542 = vmatpush1.bf16.msra.mxu0 %v5526_v43  ;;  %1583 = vmatpush1.bf16.msra.mxu1 %v5532_v44 }
 0x5a1   :  { %1543 = vmatprep.subr.bf16.mxu0 %v5538_v45  ;;  %1584 = vmatprep.subr.bf16.mxu1 %v5544_v4 }
 0x5a4   :  { %1544 = vmatpush1.bf16.msra.mxu0 %v5550_v11  ;;  %1585 = vmatpush1.bf16.msra.mxu1 %v5556_v13 }
 0x5a5   :  { %1545 = vmatprep.subr.bf16.mxu0 %v5562_v17  ;;  %1586 = vmatprep.subr.bf16.mxu1 %v5568_v63 }
 0x5a8   :  { %1546 = vmatpush1.bf16.msra.mxu0 %v5574_v18  ;;  %1587 = vmatpush1.bf16.msra.mxu1 %v5580_v55 }
 0x5a9   :  { %1547 = vmatprep.subr.bf16.mxu0 %v5586_v0  ;;  %1588 = vmatprep.subr.bf16.mxu1 %v5592_v2 }
 0x5ac   :  { %1548 = vmatpush1.bf16.msra.mxu0 %v5598_v53  ;;  %1589 = vmatpush1.bf16.msra.mxu1 %v5604_v14 }
 0x5ad   :  { %1549 = vmatprep.subr.bf16.mxu0 %v5610_v8  ;;  %1590 = vmatprep.subr.bf16.mxu1 %v5616_v57 }
 0x5b0   :  { %1550 = vmatpush1.bf16.msra.mxu0 %v5622_v60  ;;  %1591 = vmatpush1.bf16.msra.mxu1 %v5628_v56 }
 0x5b1   :  { %1551 = vmatprep.subr.bf16.mxu0 %v5634_v1  ;;  %1592 = vmatprep.subr.bf16.mxu1 %v5640_v61 }
 0x5b4   :  { %1552 = vmatpush1.bf16.msra.mxu0 %v5717_v16  ;;  %1593 = vmatpush1.bf16.msra.mxu1 %v5723_v54 }
 0x5b5   :  { %1553 = vmatprep.subr.bf16.mxu0 %v5729_v59  ;;  %1594 = vmatprep.subr.bf16.mxu1 %v5735_v33 }
 0x5b8   :  { %1554 = vmatpush1.bf16.msra.mxu0 %v5741_v25  ;;  %1595 = vmatpush1.bf16.msra.mxu1 %v5747_v26 }
 0x5b9   :  { %1714 = vmatprep.subr.bf16.mxu0 %v6727_v23  ;;  %1755 = vmatprep.subr.bf16.mxu1 %v6728_v27 }
 0x66e   :  { %v1398_v30 = vpop.f32.mrb[24].mxu0  ;;  %v1439_v49 = vpop.f32.mrb[24].mxu1 }
 0x66f   :  { %v1450_v50 = vrot.slane %v1398_v30, 3  ;;  %v1454_v24 = vrot.slane %v1398_v30, 4  ;;  %v1400_v51 = vpop.f32.mrb[25].mxu0  ;;  %v1441_v22 = vpop.f32.mrb[25].mxu1 }
 0x670   :  { %v1451_v35 = vrot.slane %v1400_v51, 3  ;;  %v1455_v38 = vrot.slane %v1400_v51, 4  ;;  %v1402_v36 = vpop.f32.mrb[26].mxu0  ;;  %v1443_v52 = vpop.f32.mrb[26].mxu1  ;;  %v1453_v27 = vrot.slane %v1441_v22, 3  ;;  %v1457_v30 = vrot.slane %v1441_v22, 4 }
 0x671   :  { %v1466_v28 = vadd.f32 %v1450_v50, %v5396_v5  ;;  %v1470_v48 = vadd.f32 %v1454_v24, %v5400_v9  ;;  %v1403_v34 = vpop.f32.mrb[27].mxu0  ;;  %v1444_v29 = vpop.f32.mrb[27].mxu1  ;;  %v1452_v51 = vrot.slane %v1439_v49, 3  ;;  %v1456_v36 = vrot.slane %v1439_v49, 4 }
 0x672   :  { %v1467_v7 = vadd.f32 %v1451_v35, %v5398_v6  ;;  %v1471_v37 = vadd.f32 %v1455_v38, %v5405_v15  ;;  %v1469_v50 = vadd.f32 %v1453_v27, %v5411_v3  ;;  %v1473_v24 = vadd.f32 %v1457_v30, %v5413_v62 }
 0x673   :  { %v3915_v47 = vmul.f32 -1.442695, %v1466_v28  ;;  %v3916_v10 = vmul.f32 -1.442695, %v1470_v48  ;;  %v1468_v35 = vadd.f32 %v1452_v51, %v5416_v12  ;;  %v1472_v38 = vadd.f32 %v1456_v36, %v5420_v21 }
 0x674   :  { %v3917_v46 = vmul.f32 -1.442695, %v1467_v7  ;;  %v3918_v23 = vmul.f32 -1.442695, %v1471_v37  ;;  %v3919_v52 = vmul.f32 -1.442695, %v1469_v50 }
 0x675   :  { %4751 = vpow2.f32 %v3915_v47  ;;  %v3920_v28 = vmul.f32 -1.442695, %v1473_v24  ;;  %v1514_v50 = vrot.slane %v5819_v31, 7 }
 0x676   :  { %4753 = vpow2.f32 %v3916_v10 }
 0x677   :  { %4755 = vpow2.f32 %v3917_v46 }
 0x678   :  { %4757 = vpow2.f32 %v3918_v23 }
 0x679   :  { %4759 = vtanh.f32 %v1468_v35 }
 0x67a   :  { %4761 = vtanh.f32 %v1472_v38 }
 0x67b   :  { %4763 = vpow2.f32 %v3919_v52  ;;  %v1515_v52 = vrot.slane %v5821_v20, 7 }
 0x67c   :  { %4765 = vpow2.f32 %v3920_v28 }
 0x67f   :  { %v4752_v48 = vpop.eup %4751 }
 0x680   :  { %v4754_v34 = vpop.eup %4753  ;;  %v1480_v22 = vadd.f32 1.0, %v4752_v48 }
 0x681   :  { %v4756_v29 = vpop.eup %4755  ;;  %v1481_v49 = vadd.f32 1.0, %v4754_v34 }
 0x682   :  { %v4758_v7 = vpop.eup %4757  ;;  %4767 = vrcp.f32 %v1480_v22  ;;  %v1492_v37 = vadd.f32 1.0, %v4756_v29 }
 0x683   :  { %4769 = vrcp.f32 %v1481_v49  ;;  %v1493_v47 = vadd.f32 1.0, %v4758_v7  ;;  %v4760_v10 = vpop.eup %4759 }
 0x684   :  { %4771 = vrcp.f32 %v1492_v37  ;;  %v4762_v46 = vpop.eup %4761 }
 0x685   :  { %4773 = vrcp.f32 %v1493_v47  ;;  %v4764_v23 = vpop.eup %4763 }
 0x686   :  { %v4766_v27 = vpop.eup %4765  ;;  %v1506_v24 = vadd.f32 1.0, %v4764_v23 }
 0x687   :  { %v1507_v28 = vadd.f32 1.0, %v4766_v27 }
 0x688   :  { %4775 = vrcp.f32 %v1506_v24 }
 0x689   :  { %4777 = vrcp.f32 %v1507_v28 }
 0x68c   :  { %v4768_v30 = vpop.eup %4767 }
 0x68d   :  { %v4770_v51 = vpop.eup %4769  ;;  %v1520_v36 = vmul.f32 %v4768_v30, %v4760_v10 }
 0x68e   :  { %v4772_v35 = vpop.eup %4771  ;;  %v1521_v38 = vmul.f32 %v4770_v51, %v4762_v46 }
 0x68f   :  { %v4774_v48 = vpop.eup %4773  ;;  %v1518_v34 = vmul.f32 %v4772_v35, %v1514_v50 }
 0x690   :  { %v1519_v22 = vmul.f32 %v4774_v48, %v1515_v52 }
 0x691   :  { %v5876_v29 = vadd.f32 %v1520_v36, %v1518_v34 }
 0x692   :  { %v5878_v49 = vadd.f32 %v1521_v38, %v1519_v22  ;;  %v4776_v31 = vpop.eup %4775 }
 0x693   :  { %4779 = vtanh.f32 %v5876_v29  ;;  %v4778_v7 = vpop.eup %4777 }
 0x694   :  { %4781 = vtanh.f32 %v5878_v49 }
 0x69d   :  { %v4780_v37 = vpop.eup %4779 }
 0x69e   :  { %v4782_v47 = vpop.eup %4781  ;;  %v1526_v20 = vmul.f32 %v4780_v37, %v4776_v31 }
 0x69f   :  { %v1527_v10 = vmul.f32 %v4782_v47, %v4778_v7 }
 0x6a0   :  { %v1528_v46 = vpack.c.bf16 %v1526_v20, %v1526_v20  ;;  %v5883_v23 = vsel %vm1890_vm6, %v5826_v32, %v1526_v20 }
 0x6a1   :  { %v1529_v27 = vpack.c.bf16 %v1527_v10, %v1527_v10  ;;  %v5886_v30 = vsel %vm1890_vm6, %v5829_v19, %v1527_v10 }
 0x6a2   :  { %v1532_v51 = vunpack.c.l.b16 %v1528_v46 }
 0x6a3   :  { %v1533_v36 = vunpack.c.l.b16 %v1529_v27 }
 0x6a4   :  { %v1534_v50 = vrot.slane %v1532_v51, 5 }
 0x6a5   :  { %v1535_v24 = vrot.slane %v1533_v36, 4  ;;  %v1689_v36 = vrot.slane %v5876_v29, 7 }
 0x6a7   :  { %v1536_v35 = vsel %vm665_vm1, %v1535_v24, %v1534_v50 }
 0x6a8   :  { %v1537_v38 = vpack.c.b16 %v1536_v35, %v1536_v35 }
 0x6aa   :  { %1572 = vmatmul.mubr.bf16.vlgmr.msra.gmra.mrb[28].mxu0 %v1537_v38  ;;  %1613 = vmatmul.mubr.bf16.vlgmr.msra.gmra.mrb[28].mxu1 %v1537_v38  ;;  %v1690_v38 = vrot.slane %v5878_v49, 7 }
 0x6ab   :  { %1715 = vmatpush1.bf16.msra.mxu0 %v5500_v39  ;;  %1756 = vmatpush1.bf16.msra.mxu1 %v5506_v40  ;;  %v4951_v39 = vmov 0.0  }
 0x6ac   :  { %1716 = vmatprep.subr.bf16.mxu0 %v5512_v41  ;;  %1757 = vmatprep.subr.bf16.mxu1 %v5518_v42 }
 0x6ad   :  { %1746 = vmatprep.mubr.bf16.mxu0 %v6722_v58  ;;  %1787 = vmatprep.mubr.bf16.mxu1 %v6722_v58 }
 0x6af   :  { %1717 = vmatpush1.bf16.msra.mxu0 %v5526_v43  ;;  %1758 = vmatpush1.bf16.msra.mxu1 %v5532_v44 }
 0x6b0   :  { %1718 = vmatprep.subr.bf16.mxu0 %v5538_v45  ;;  %1759 = vmatprep.subr.bf16.mxu1 %v5544_v4 }
 0x6b3   :  { %1719 = vmatpush1.bf16.msra.mxu0 %v5550_v11  ;;  %1760 = vmatpush1.bf16.msra.mxu1 %v5556_v13 }
 0x6b4   :  { %1720 = vmatprep.subr.bf16.mxu0 %v5562_v17  ;;  %1761 = vmatprep.subr.bf16.mxu1 %v5568_v63 }
 0x6b7   :  { %1721 = vmatpush1.bf16.msra.mxu0 %v5574_v18  ;;  %1762 = vmatpush1.bf16.msra.mxu1 %v5580_v55 }
 0x6b8   :  { %1722 = vmatprep.subr.bf16.mxu0 %v5586_v0  ;;  %1763 = vmatprep.subr.bf16.mxu1 %v5592_v2 }
 0x6bb   :  { %1723 = vmatpush1.bf16.msra.mxu0 %v5598_v53  ;;  %1764 = vmatpush1.bf16.msra.mxu1 %v5604_v14 }
 0x6bc   :  { %1724 = vmatprep.subr.bf16.mxu0 %v5610_v8  ;;  %1765 = vmatprep.subr.bf16.mxu1 %v5616_v57 }
 0x6bf   :  { %1725 = vmatpush1.bf16.msra.mxu0 %v5622_v60  ;;  %1766 = vmatpush1.bf16.msra.mxu1 %v5628_v56 }
 0x6c0   :  { %1726 = vmatprep.subr.bf16.mxu0 %v5634_v1  ;;  %1767 = vmatprep.subr.bf16.mxu1 %v5640_v61 }
 0x6c3   :  { %1727 = vmatpush1.bf16.msra.mxu0 %v5717_v16  ;;  %1768 = vmatpush1.bf16.msra.mxu1 %v5723_v54 }
 0x6c4   :  { %1728 = vmatprep.subr.bf16.mxu0 %v5729_v59  ;;  %1769 = vmatprep.subr.bf16.mxu1 %v5735_v33 }
 0x6c7   :  { %1729 = vmatpush1.bf16.msra.mxu0 %v5741_v25  ;;  %1770 = vmatpush1.bf16.msra.mxu1 %v5747_v26 }
 0x6c8   :  { %4200 = vmatprep.subr.bf16.mxu0 %v4951_v39  ;;  %4220 = vmatprep.subr.bf16.mxu1 %v4951_v39 }
 0x77d   :  { %v1573_v40 = vpop.f32.mrb[28].mxu0  ;;  %v1614_v41 = vpop.f32.mrb[28].mxu1 }
 0x77e   :  { %v1625_v42 = vrot.slane %v1573_v40, 2  ;;  %v1629_v43 = vrot.slane %v1573_v40, 3  ;;  %v1575_v44 = vpop.f32.mrb[29].mxu0  ;;  %v1616_v45 = vpop.f32.mrb[29].mxu1  ;;  %v1627_v61 = vrot.slane %v1614_v41, 2  ;;  %v1631_v16 = vrot.slane %v1614_v41, 3 }
 0x77f   :  { %v1626_v4 = vrot.slane %v1575_v44, 2  ;;  %v1630_v11 = vrot.slane %v1575_v44, 3  ;;  %v1577_v13 = vpop.f32.mrb[30].mxu0  ;;  %v1618_v17 = vpop.f32.mrb[30].mxu1  ;;  %v1628_v56 = vrot.slane %v1616_v45, 2  ;;  %v1632_v1 = vrot.slane %v1616_v45, 3 }
 0x780   :  { %v1641_v63 = vadd.f32 %v1625_v42, %v5396_v5  ;;  %v1645_v18 = vadd.f32 %v1629_v43, %v5400_v9  ;;  %v1578_v55 = vpop.f32.mrb[31].mxu0  ;;  %v1619_v0 = vpop.f32.mrb[31].mxu1  ;;  %v1643_v33 = vadd.f32 %v1627_v61, %v5416_v12  ;;  %v1647_v25 = vadd.f32 %v1631_v16, %v5420_v21  ;;  %v4393_v61 = vld [vmem:[%s6729_s16 + $0x10] sm:$0xff]  }
 0x781   :  { %v1642_v2 = vadd.f32 %v1626_v4, %v5398_v6  ;;  %v1646_v53 = vadd.f32 %v1630_v11, %v5405_v15  ;;  %v1644_v54 = vadd.f32 %v1628_v56, %v5411_v3  ;;  %v1648_v59 = vadd.f32 %v1632_v1, %v5413_v62  ;;  %v4400_v1 = vld [vmem:[%s6730_s11 + $0x8] sm:$0xff]   ;;  %v4401_v16 = vld [vmem:[%s6730_s11 + $0x10] sm:$0xff]  }
 0x782   :  { %v3921_v14 = vmul.f32 -1.442695, %v1641_v63  ;;  %v3922_v8 = vmul.f32 -1.442695, %v1645_v18 }
 0x783   :  { %v3923_v57 = vmul.f32 -1.442695, %v1642_v2  ;;  %v3924_v60 = vmul.f32 -1.442695, %v1646_v53  ;;  %v3925_v26 = vmul.f32 -1.442695, %v1644_v54 }
 0x784   :  { %4783 = vpow2.f32 %v3921_v14  ;;  %v3926_v32 = vmul.f32 -1.442695, %v1648_v59  ;;  %v4394_v54 = vld [vmem:[%s6729_s16 + $0x18] sm:$0xff]  }
 0x785   :  { %4785 = vpow2.f32 %v3922_v8  ;;  %v4402_v59 = vld [vmem:[%s6730_s11 + $0x18] sm:$0xff]  }
 0x786   :  { %4787 = vpow2.f32 %v3923_v57 }
 0x787   :  { %4789 = vpow2.f32 %v3924_v60  ;;  %v4391_v60 = vld [vmem:[%s6729_s16] sm:$0xff]  }
 0x788   :  { %4791 = vtanh.f32 %v1643_v33  ;;  %v4395_v33 = vld [vmem:[%s6729_s16 + $0x20] sm:$0xff]  }
 0x789   :  { %4793 = vtanh.f32 %v1647_v25  ;;  %v4403_v25 = vld [vmem:[%s6730_s11 + $0x20] sm:$0xff]  }
 0x78a   :  { %4795 = vpow2.f32 %v3925_v26  ;;  %v4396_v26 = vld [vmem:[%s6729_s16 + $0x28] sm:$0xff]  }
 0x78b   :  { %4797 = vpow2.f32 %v3926_v32  ;;  %v4404_v32 = vld [vmem:[%s6730_s11 + $0x28] sm:$0xff]  }
 0x78e   :  { %v4784_v19 = vpop.eup %4783 }
 0x78f   :  { %v4786_v52 = vpop.eup %4785  ;;  %v1655_v28 = vadd.f32 1.0, %v4784_v19  ;;  %v4397_v19 = vld [vmem:[%s6729_s16 + $0x30] sm:$0xff]  }
 0x790   :  { %v4788_v48 = vpop.eup %4787  ;;  %v1656_v34 = vadd.f32 1.0, %v4786_v52  ;;  %v4405_v52 = vld [vmem:[%s6730_s11 + $0x30] sm:$0xff]  }
 0x791   :  { %v4790_v22 = vpop.eup %4789  ;;  %4799 = vrcp.f32 %v1655_v28  ;;  %v1667_v31 = vadd.f32 1.0, %v4788_v48  ;;  %v4398_v28 = vld [vmem:[%s6729_s16 + $0x38] sm:$0xff]   ;;  %v1899_v48 = vld [vmem:[%s6731_s2] sm:$0xff] }
 0x792   :  { %4801 = vrcp.f32 %v1656_v34  ;;  %v1668_v7 = vadd.f32 1.0, %v4790_v22  ;;  %v4792_v37 = vpop.eup %4791  ;;  %v1900_v34 = vld [vmem:[%s6731_s2 + $0x8] sm:$0xff]  ;;  %v4406_v22 = vld [vmem:[%s6730_s11 + $0x38] sm:$0xff]  }
 0x793   :  { %4803 = vrcp.f32 %v1667_v31  ;;  %v4794_v47 = vpop.eup %4793  ;;  %v2014_v31 = vld [vmem:[%s6732_s5] sm:$0xff] }
 0x794   :  { %4805 = vrcp.f32 %v1668_v7  ;;  %v4796_v20 = vpop.eup %4795  ;;  %v2015_v7 = vld [vmem:[%s6732_s5 + $0x8] sm:$0xff] }
 0x795   :  { %v4798_v10 = vpop.eup %4797  ;;  %v1681_v50 = vadd.f32 1.0, %v4796_v20  ;;  %v4407_v20 = vld [vmem:[%s6666_s13 + $0x40] sm:$0xff]  }
 0x796   :  { %v1682_v40 = vadd.f32 1.0, %v4798_v10  ;;  %v4408_v10 = vld [vmem:[%s6666_s13 + $0x48] sm:$0xff]  }
 0x797   :  { %4807 = vrcp.f32 %v1681_v50  ;;  %v4413_v50 = vld [vmem:[%s6666_s13 + $0x8] sm:$0xff]  }
 0x798   :  { %4809 = vrcp.f32 %v1682_v40  ;;  %v4417_v40 = vld [vmem:[%s6666_s13 + $0x18] sm:$0xff]  }
 0x79b   :  { %v4800_v46 = vpop.eup %4799 }
 0x79c   :  { %v4802_v27 = vpop.eup %4801  ;;  %v1695_v51 = vmul.f32 %v4800_v46, %v4792_v37  ;;  %v1901_v37 = vpack.c.bf16 %v1900_v34, %v1899_v48  ;;  %v4409_v46 = vld [vmem:[%s6666_s13 + $0x50] sm:$0xff]  }
 0x79d   :  { %v4804_v24 = vpop.eup %4803  ;;  %v1696_v35 = vmul.f32 %v4802_v27, %v4794_v47  ;;  %v2016_v47 = vpack.c.bf16 %v2015_v7, %v2014_v31  ;;  %v4410_v27 = vld [vmem:[%s6666_s13 + $0x58] sm:$0xff]  }
 0x79e   :  { %v4806_v41 = vpop.eup %4805  ;;  %v1693_v42 = vmul.f32 %v4804_v24, %v1689_v36  ;;  %v4412_v36 = vld [vmem:[%s6666_s13 + $0x60] sm:$0xff]   ;;  %v4414_v24 = vld [vmem:[%s6666_s13 + $0x68] sm:$0xff]  }
 0x79f   :  { %v1694_v43 = vmul.f32 %v4806_v41, %v1690_v38  ;;  %v4416_v38 = vld [vmem:[%s6666_s13 + $0x70] sm:$0xff]   ;;  %v4418_v41 = vld [vmem:[%s6666_s13 + $0x78] sm:$0xff]  }
 0x7a0   :  { %v5933_v44 = vadd.f32 %v1695_v51, %v1693_v42  ;;  %v4411_v51 = vld [vmem:[%s6666_s13] sm:$0xff]  }
 0x7a1   :  { %v5935_v45 = vadd.f32 %v1696_v35, %v1694_v43  ;;  %v4808_v29 = vpop.eup %4807  ;;  %v4415_v35 = vld [vmem:[%s6666_s13 + $0x10] sm:$0xff]   ;;  %v4419_v42 = vld [vmem:[%s6666_s13 + $0x20] sm:$0xff]   ;;  %v4420_v43 = vld [vmem:[%s6666_s13 + $0x28] sm:$0xff]  }
 0x7a2   :  { %4811 = vtanh.f32 %v5933_v44  ;;  %v4810_v4 = vpop.eup %4809 }
 0x7a3   :  { %4813 = vtanh.f32 %v5935_v45 }
 0x7ac   :  { %v4812_v11 = vpop.eup %4811 }
 0x7ad   :  { %v4814_v13 = vpop.eup %4813  ;;  %v1701_v49 = vmul.f32 %v4812_v11, %v4808_v29  ;;  %v4421_v29 = vld [vmem:[%s6666_s13 + $0x30] sm:$0xff]  }
 0x7ae   :  { %v1702_v17 = vmul.f32 %v4814_v13, %v4810_v4  ;;  %v4422_v4 = vld [vmem:[%s6666_s13 + $0x38] sm:$0xff]  }
 0x7af   :  { %v1703_v63 = vpack.c.bf16 %v1701_v49, %v1701_v49  ;;  %v5940_v18 = vsel %vm1893_vm7, %v5883_v23, %v1701_v49  ;;  %v4399_v23 = vld [vmem:[%s6730_s11] sm:$0xff]   ;;  %s6735_s11 = sld [smem:[#allocation16_spill]] }
 0x7b0   :  { %v1704_v55 = vpack.c.bf16 %v1702_v17, %v1702_v17  ;;  %v5943_v0 = vsel %vm1893_vm7, %v5886_v30, %v1702_v17  ;;  %v4392_v30 = vld [vmem:[%s6729_s16 + $0x8] sm:$0xff]  }
 0x7b1   :  { %v1707_v2 = vunpack.c.l.b16 %v1703_v63 }
 0x7b2   :  { %v1708_v53 = vunpack.c.l.b16 %v1704_v55 }
 0x7b3   :  { %v1709_v14 = vrot.slane %v1707_v2, 6 }
 0x7b4   :  { %v1710_v8 = vrot.slane %v1708_v53, 5 }
 0x7b6   :  { %v1711_v57 = vsel %vm665_vm1, %v1710_v8, %v1709_v14 }
 0x7b7   :  { %v1712_v56 = vpack.c.b16 %v1711_v57, %v1711_v57 }
 0x7b9   :  { %1747 = vmatmul.mubr.bf16.vlgmr.msra.gmra.mrb[32].mxu0 %v1712_v56  ;;  %1788 = vmatmul.mubr.bf16.vlgmr.msra.gmra.mrb[32].mxu1 %v1712_v56 }
 0x7ba   :  { %4201 = vmatpush3.bf16.msra.mxu0 %v4391_v60  ;;  %4216 = vmatprep.mubr.msk.bf16.mxu0 %vm4952_vm8, %v4951_v39 }
 0x7bb   :  { %4202 = vmatprep.subr.bf16.mxu0 %v4951_v39  ;;  %4221 = vmatpush3.bf16.msra.mxu1 %v4399_v23 }
 0x7bc   :  { %4222 = vmatprep.subr.bf16.mxu1 %v4951_v39  ;;  %4236 = vmatprep.mubr.msk.bf16.mxu1 %vm4952_vm8, %v4951_v39 }
 0x7be   :  { %4203 = vmatpush3.bf16.msra.mxu0 %v4392_v30 }
 0x7bf   :  { %4204 = vmatprep.subr.bf16.mxu0 %v4951_v39  ;;  %4223 = vmatpush3.bf16.msra.mxu1 %v4400_v1 }
 0x7c0   :  { %4224 = vmatprep.subr.bf16.mxu1 %v4951_v39 }
 0x7c2   :  { %4205 = vmatpush3.bf16.msra.mxu0 %v4393_v61 }
 0x7c3   :  { %4206 = vmatprep.subr.bf16.mxu0 %v4951_v39  ;;  %4225 = vmatpush3.bf16.msra.mxu1 %v4401_v16 }
 0x7c4   :  { %4226 = vmatprep.subr.bf16.mxu1 %v4951_v39 }
 0x7c6   :  { %4207 = vmatpush3.bf16.msra.mxu0 %v4394_v54 }
 0x7c7   :  { %4208 = vmatprep.subr.bf16.mxu0 %v4951_v39  ;;  %4227 = vmatpush3.bf16.msra.mxu1 %v4402_v59 }
 0x7c8   :  { %4228 = vmatprep.subr.bf16.mxu1 %v4951_v39 }
 0x7ca   :  { %4209 = vmatpush3.bf16.msra.mxu0 %v4395_v33 }
 0x7cb   :  { %4210 = vmatprep.subr.bf16.mxu0 %v4951_v39  ;;  %4229 = vmatpush3.bf16.msra.mxu1 %v4403_v25 }
 0x7cc   :  { %4230 = vmatprep.subr.bf16.mxu1 %v4951_v39 }
 0x7ce   :  { %4211 = vmatpush3.bf16.msra.mxu0 %v4396_v26 }
 0x7cf   :  { %4212 = vmatprep.subr.bf16.mxu0 %v4951_v39  ;;  %4231 = vmatpush3.bf16.msra.mxu1 %v4404_v32 }
 0x7d0   :  { %4232 = vmatprep.subr.bf16.mxu1 %v4951_v39 }
 0x7d2   :  { %4213 = vmatpush3.bf16.msra.mxu0 %v4397_v19 }
 0x7d3   :  { %4214 = vmatprep.subr.bf16.mxu0 %v4951_v39  ;;  %4233 = vmatpush3.bf16.msra.mxu1 %v4405_v52 }
 0x7d4   :  { %4234 = vmatprep.subr.bf16.mxu1 %v4951_v39 }
 0x7d6   :  { %4215 = vmatpush3.bf16.msra.mxu0 %v4398_v28 }
 0x7d7   :  { %4235 = vmatpush3.bf16.msra.mxu1 %v4406_v22  ;;  %4240 = vmatprep.subr.bf16.mxu0 %v4951_v39 }
 0x7d8   :  { %4260 = vmatprep.subr.bf16.mxu1 %v4951_v39 }
 0x7d9   :  { %4217 = vmatmul.mubr.bf16.vlgmr.msra.gmra.mrb[36].mxu0 %v1901_v37 }
 0x7da   :  { %4237 = vmatmul.mubr.bf16.vlgmr.msra.gmra.mrb[36].mxu1 %v2016_v47  ;;  %4256 = vmatprep.mubr.msk.bf16.mxu0 %vm4952_vm8, %v4951_v39 }
 0x7db   :  { %4276 = vmatprep.mubr.msk.bf16.mxu1 %vm4952_vm8, %v4951_v39  ;;  %4261 = vmatpush3.bf16.msra.mxu1 %v4407_v20 }
 0x7dc   :  { %4262 = vmatprep.subr.bf16.mxu1 %v4951_v39  ;;  %4241 = vmatpush3.bf16.msra.mxu0 %v4411_v51  ;;  %v1864_v51 = vrot.slane %v5933_v44, 7 }
 0x7dd   :  { %4242 = vmatprep.subr.bf16.mxu0 %v4951_v39 }
 0x7df   :  { %4263 = vmatpush3.bf16.msra.mxu1 %v4408_v10  ;;  %v3933_v10 = vld [vmem:[%s6733_s3] ss:$0 sm:$0xff]  ;;  %s4018_s3 = sld [smem:[#allocation2 + $0x2]] }
 0x7e0   :  { %4264 = vmatprep.subr.bf16.mxu1 %v4951_v39  ;;  %4243 = vmatpush3.bf16.msra.mxu0 %v4413_v50 }
 0x7e1   :  { %4244 = vmatprep.subr.bf16.mxu0 %v4951_v39 }
 0x7e3   :  { %4265 = vmatpush3.bf16.msra.mxu1 %v4409_v46 }
 0x7e4   :  { %4266 = vmatprep.subr.bf16.mxu1 %v4951_v39  ;;  %4245 = vmatpush3.bf16.msra.mxu0 %v4415_v35  ;;  %v1865_v35 = vrot.slane %v5935_v45, 7 }
 0x7e5   :  { %4246 = vmatprep.subr.bf16.mxu0 %v4951_v39 }
 0x7e7   :  { %4267 = vmatpush3.bf16.msra.mxu1 %v4410_v27 }
 0x7e8   :  { %4268 = vmatprep.subr.bf16.mxu1 %v4951_v39  ;;  %4247 = vmatpush3.bf16.msra.mxu0 %v4417_v40 }
 0x7e9   :  { %4248 = vmatprep.subr.bf16.mxu0 %v4951_v39 }
 0x7eb   :  { %4269 = vmatpush3.bf16.msra.mxu1 %v4412_v36 }
 0x7ec   :  { %4270 = vmatprep.subr.bf16.mxu1 %v4951_v39  ;;  %4249 = vmatpush3.bf16.msra.mxu0 %v4419_v42 }
 0x7ed   :  { %4250 = vmatprep.subr.bf16.mxu0 %v4951_v39 }
 0x7ef   :  { %4271 = vmatpush3.bf16.msra.mxu1 %v4414_v24 }
 0x7f0   :  { %4272 = vmatprep.subr.bf16.mxu1 %v4951_v39  ;;  %4251 = vmatpush3.bf16.msra.mxu0 %v4420_v43 }
 0x7f1   :  { %4252 = vmatprep.subr.bf16.mxu0 %v4951_v39 }
 0x7f3   :  { %4273 = vmatpush3.bf16.msra.mxu1 %v4416_v38 }
 0x7f4   :  { %4274 = vmatprep.subr.bf16.mxu1 %v4951_v39  ;;  %4253 = vmatpush3.bf16.msra.mxu0 %v4421_v29 }
 0x7f5   :  { %4254 = vmatprep.subr.bf16.mxu0 %v4951_v39 }
 0x7f7   :  { %4275 = vmatpush3.bf16.msra.mxu1 %v4418_v41 }
 0x7f8   :  { %4255 = vmatpush3.bf16.msra.mxu0 %v4422_v4 }
 0x7f9   :  { %4280 = vmatprep.subr.bf16.mxu0 %v4951_v39 }
 0x88c   :  { %v1748_v11 = vpop.f32.mrb[32].mxu0  ;;  %v1789_v13 = vpop.f32.mrb[32].mxu1 }
 0x88d   :  { %v1800_v49 = vrot.slane %v1748_v11, 1  ;;  %v1804_v17 = vrot.slane %v1748_v11, 2  ;;  %v1750_v63 = vpop.f32.mrb[33].mxu0  ;;  %v1791_v55 = vpop.f32.mrb[33].mxu1  ;;  %v1802_v26 = vrot.slane %v1789_v13, 1  ;;  %v1806_v32 = vrot.slane %v1789_v13, 2 }
 0x88e   :  { %v1801_v2 = vrot.slane %v1750_v63, 1  ;;  %v1805_v53 = vrot.slane %v1750_v63, 2  ;;  %v1752_v14 = vpop.f32.mrb[34].mxu0  ;;  %v1793_v8 = vpop.f32.mrb[34].mxu1  ;;  %v1803_v33 = vrot.slane %v1791_v55, 1  ;;  %v1807_v25 = vrot.slane %v1791_v55, 2 }
 0x88f   :  { %v1816_v57 = vadd.f32 %v1800_v49, %v5396_v5  ;;  %v1820_v60 = vadd.f32 %v1804_v17, %v5400_v9  ;;  %v1753_v56 = vpop.f32.mrb[35].mxu0  ;;  %v1794_v23 = vpop.f32.mrb[35].mxu1 }
 0x890   :  { %v1817_v30 = vadd.f32 %v1801_v2, %v5398_v6  ;;  %v1821_v1 = vadd.f32 %v1805_v53, %v5405_v15  ;;  %v1819_v5 = vadd.f32 %v1803_v33, %v5411_v3  ;;  %v1823_v9 = vadd.f32 %v1807_v25, %v5413_v62  ;;  %v4428_v33 = vld [vmem:[%s6666_s13 + $0xa8] sm:$0xff]   ;;  %v4429_v25 = vld [vmem:[%s6666_s13 + $0xb0] sm:$0xff]  }
 0x891   :  { %v3927_v61 = vmul.f32 -1.442695, %v1816_v57  ;;  %v3928_v16 = vmul.f32 -1.442695, %v1820_v60  ;;  %v1818_v6 = vadd.f32 %v1802_v26, %v5416_v12  ;;  %v1822_v15 = vadd.f32 %v1806_v32, %v5420_v21  ;;  %v3942_v26 = vld [vmem:[%s6665_s12] ss:$0 sm:$0xff] }
 0x892   :  { %v3929_v54 = vmul.f32 -1.442695, %v1817_v30  ;;  %v3930_v59 = vmul.f32 -1.442695, %v1821_v1  ;;  %v3931_v19 = vmul.f32 -1.442695, %v1819_v5 }
 0x893   :  { %4815 = vpow2.f32 %v3927_v61  ;;  %v3932_v52 = vmul.f32 -1.442695, %v1823_v9  ;;  %v4423_v61 = vld [vmem:[%s6666_s13 + $0x80] sm:$0xff]   ;;  %v4430_v32 = vld [vmem:[%s6666_s13 + $0xb8] sm:$0xff]  }
 0x894   :  { %4817 = vpow2.f32 %v3928_v16 }
 0x895   :  { %4819 = vpow2.f32 %v3929_v54  ;;  %v4424_v54 = vld [vmem:[%s6666_s13 + $0x88] sm:$0xff]  }
 0x896   :  { %4821 = vpow2.f32 %v3930_v59  ;;  %v4427_v59 = vld [vmem:[%s6666_s13 + $0xa0] sm:$0xff]  }
 0x897   :  { %4823 = vtanh.f32 %v1818_v6 }
 0x898   :  { %4825 = vtanh.f32 %v1822_v15  ;;  %v3978_v15 = vld [vmem:[%s6667_s14 + $0x1] ss:$0 sm:$0xff] }
 0x899   :  { %4827 = vpow2.f32 %v3931_v19 }
 0x89a   :  { %4829 = vpow2.f32 %v3932_v52 }
 0x89d   :  { %v4816_v28 = vpop.eup %4815 }
 0x89e   :  { %v4818_v48 = vpop.eup %4817  ;;  %v1830_v34 = vadd.f32 1.0, %v4816_v28 }
 0x89f   :  { %v4820_v22 = vpop.eup %4819  ;;  %v1831_v31 = vadd.f32 1.0, %v4818_v48 }
 0x8a0   :  { %v4822_v7 = vpop.eup %4821  ;;  %4831 = vrcp.f32 %v1830_v34  ;;  %v1842_v3 = vadd.f32 1.0, %v4820_v22  ;;  %v3988_v34 = vld [vmem:[%s6668_s15 + $0x1] ss:$0 sm:$0xff] }
 0x8a1   :  { %4833 = vrcp.f32 %v1831_v31  ;;  %v1843_v62 = vadd.f32 1.0, %v4822_v7  ;;  %v4824_v12 = vpop.eup %4823 }
 0x8a2   :  { %4835 = vrcp.f32 %v1842_v3  ;;  %v4826_v21 = vpop.eup %4825 }
 0x8a3   :  { %4837 = vrcp.f32 %v1843_v62  ;;  %v4828_v37 = vpop.eup %4827 }
 0x8a4   :  { %v4830_v47 = vpop.eup %4829  ;;  %v1856_v36 = vadd.f32 1.0, %v4828_v37 }
 0x8a5   :  { %v1857_v38 = vadd.f32 1.0, %v4830_v47 }
 0x8a6   :  { %4839 = vrcp.f32 %v1856_v36 }
 0x8a7   :  { %4841 = vrcp.f32 %v1857_v38 }
 0x8aa   :  { %v4832_v20 = vpop.eup %4831 }
 0x8ab   :  { %v4834_v46 = vpop.eup %4833  ;;  %v1870_v27 = vmul.f32 %v4832_v20, %v4824_v12  ;;  %v3951_v12 = vld [vmem:[%s6667_s14] ss:$0 sm:$0xff] }
 0x8ac   :  { %v4836_v50 = vpop.eup %4835  ;;  %v1871_v24 = vmul.f32 %v4834_v46, %v4826_v21  ;;  %v2007_v40 = vpop.f32.mrb[36].mxu0 }
 0x8ad   :  { %v4838_v41 = vpop.eup %4837  ;;  %v1868_v42 = vmul.f32 %v4836_v50, %v1864_v51  ;;  %v6106_v43 = vadd.f32 %v3933_v10, %v2007_v40  ;;  %v4218_v29 = vpop.f32.mrb[37].mxu0 }
 0x8ae   :  { %v2122_v4 = vpop.f32.mrb[36].mxu1  ;;  %v1869_v11 = vmul.f32 %v4838_v41, %v1865_v35  ;;  %v2010_v13 = vpop.f32.mrb[38].mxu0  ;;  %v4007_v35 = vld [vmem:[%s6667_s14 + $0x2] ss:$0 sm:$0xff] }
 0x8af   :  { %v4238_v49 = vpop.f32.mrb[37].mxu1  ;;  %v1872_v17 = vadd.f32 %v1870_v27, %v1868_v42  ;;  %v6108_v63 = vadd.f32 %v3933_v10, %v2010_v13  ;;  %v4219_v44 = vpop.f32.mrb[39].mxu0  ;;  %v6155_v5 = vadd.f32 %v3942_v26, %v2122_v4  ;;  %v3960_v10 = vld [vmem:[%s6668_s15] ss:$0 sm:$0xff]  ;;  %v4017_v29 = vld [vmem:[%s6668_s15 + $0x2] ss:$0 sm:$0xff] }
 0x8b0   :  { %v2125_v55 = vpop.f32.mrb[38].mxu1  ;;  %v1873_v2 = vadd.f32 %v1871_v24, %v1869_v11  ;;  %v4840_v14 = vpop.eup %4839 }
 0x8b1   :  { %v4239_v45 = vpop.f32.mrb[39].mxu1  ;;  %4843 = vtanh.f32 %v1872_v17  ;;  %v2330_v53 = vpack.c.bf16 %v6108_v63, %v6106_v43  ;;  %v4842_v8 = vpop.eup %4841  ;;  %v6157_v9 = vadd.f32 %v3942_v26, %v2125_v55  ;;  %v4431_v55 = vld [vmem:[%s6670_s17] ss:$8 sps:$4 sm:$0xff]  }
 0x8b2   :  { %4845 = vtanh.f32 %v1873_v2  ;;  %v4433_v2 = vld [vmem:[%s6670_s17 + $0x4] ss:$8 sps:$4 sm:$0xff]   ;;  %v4436_v45 = vld [vmem:[%s6670_s17 + $0x14] ss:$8 sps:$4 sm:$0xff]  }
 0x8b3   :  { %4277 = vmatmul.mubr.bf16.vlgmr.msra.gmra.mrb[40].mxu1 %v2330_v53  ;;  %v2533_v6 = vpack.c.bf16 %v6157_v9, %v6155_v5  ;;  %3051 = vmatprep.subr.bf16.mxu1 %v4433_v2  ;;  %v4434_v53 = vld [vmem:[%s6670_s17 + $0x10] ss:$8 sps:$4 sm:$0xff]  }
 0x8b4   :  { %3052 = vmatpush1.bf16.msra.mxu1 %v4431_v55 }
 0x8b5   :  { %3053 = vmatprep.subr.bf16.mxu1 %v4436_v45 }
 0x8b8   :  { %3054 = vmatpush1.bf16.msra.mxu1 %v4434_v53 }
 0x8bb   :  { %v4844_v57 = vpop.eup %4843 }
 0x8bc   :  { %v4846_v60 = vpop.eup %4845  ;;  %v1876_v56 = vmul.f32 %v4844_v57, %v4840_v14  ;;  %v4439_v14 = vld [vmem:[%s6670_s17 + $0x24] ss:$8 sps:$4 sm:$0xff]   ;;  %v4442_v57 = vld [vmem:[%s6670_s17 + $0x34] ss:$8 sps:$4 sm:$0xff]  }
 0x8bd   :  { %v1877_v23 = vmul.f32 %v4846_v60, %v4842_v8  ;;  %v4437_v8 = vld [vmem:[%s6670_s17 + $0x20] ss:$8 sps:$4 sm:$0xff]   ;;  %3055 = vmatprep.subr.bf16.mxu1 %v4439_v14  ;;  %v4440_v60 = vld [vmem:[%s6670_s17 + $0x30] ss:$8 sps:$4 sm:$0xff]  }
 0x8be   :  { %v6113_v30 = vsel %vm1896_vm9, %v5940_v18, %v1876_v56  ;;  %v4425_v18 = vld [vmem:[%s6666_s13 + $0x90] sm:$0xff]   ;;  %3056 = vmatpush1.bf16.msra.mxu1 %v4437_v8  ;;  %v4445_v56 = vld [vmem:[%s6670_s17 + $0x44] ss:$8 sps:$4 sm:$0xff]  }
 0x8bf   :  { %v6116_v1 = vsel %vm1896_vm9, %v5943_v0, %v1877_v23  ;;  %v4426_v0 = vld [vmem:[%s6666_s13 + $0x98] sm:$0xff]   ;;  %3057 = vmatprep.subr.bf16.mxu1 %v4442_v57  ;;  %v4443_v23 = vld [vmem:[%s6670_s17 + $0x40] ss:$8 sps:$4 sm:$0xff]  }
 0x8c0   :  { %v2129_v16 = vpack.c.bf16 %v6116_v1, %v6113_v30 }
 0x8c2   :  { %4257 = vmatmul.mubr.bf16.vlgmr.msra.gmra.mrb[40].mxu0 %v2129_v16  ;;  %3058 = vmatpush1.bf16.msra.mxu1 %v4440_v60  ;;  %v4448_v16 = vld [vmem:[%s6670_s17 + $0x54] ss:$8 sps:$4 sm:$0xff]  }
 0x8c3   :  { %4281 = vmatpush3.bf16.msra.mxu0 %v4423_v61  ;;  %4296 = vmatprep.mubr.msk.bf16.mxu0 %vm4952_vm8, %v4951_v39  ;;  %v2465_v61 = vld [vmem:[%s6734_s10] sm:$0xff] }
 0x8c4   :  { %4282 = vmatprep.subr.bf16.mxu0 %v4951_v39  ;;  %3059 = vmatprep.subr.bf16.mxu1 %v4445_v56  ;;  %vm2467_vm10 = vcmp.gt.f32.partialorder %v2465_v61, 0.5 }
 0x8c6   :  { %3060 = vmatpush1.bf16.msra.mxu1 %v4443_v23 }
 0x8c7   :  { %4283 = vmatpush3.bf16.msra.mxu0 %v4424_v54  ;;  %v2462_v54 = vstv %s3989_s0  ;;  %3061 = vmatprep.subr.bf16.mxu1 %v4448_v16  ;;  %s6229_s0 = sld [smem:[#allocation2]] }
 0x8c8   :  { %4284 = vmatprep.subr.bf16.mxu0 %v4951_v39 }
 0x8cb   :  { %4285 = vmatpush3.bf16.msra.mxu0 %v4425_v18 }
 0x8cc   :  { %4286 = vmatprep.subr.bf16.mxu0 %v4951_v39 }
 0x8cf   :  { %4287 = vmatpush3.bf16.msra.mxu0 %v4426_v0  ;;  %v4446_v0 = vld [vmem:[%s6670_s17 + $0x50] ss:$8 sps:$4 sm:$0xff]  }
 0x8d0   :  { %4288 = vmatprep.subr.bf16.mxu0 %v4951_v39  ;;  %3062 = vmatpush1.bf16.msra.mxu1 %v4446_v0 }
 0x8d3   :  { %4289 = vmatpush3.bf16.msra.mxu0 %v4427_v59 }
 0x8d4   :  { %4290 = vmatprep.subr.bf16.mxu0 %v4951_v39 }
 0x8d7   :  { %4291 = vmatpush3.bf16.msra.mxu0 %v4428_v33  ;;  %v2466_v33 = vld [vmem:[%s6734_s10 + $0x8] sm:$0xff] }
 0x8d8   :  { %4292 = vmatprep.subr.bf16.mxu0 %v4951_v39  ;;  %vm2468_vm12 = vcmp.gt.f32.partialorder %v2466_v33, 0.5 }
 0x8db   :  { %4293 = vmatpush3.bf16.msra.mxu0 %v4429_v25  ;;  %v4451_v25 = vld [vmem:[%s6670_s17 + $0x64] ss:$8 sps:$4 sm:$0xff]  }
 0x8dc   :  { %4294 = vmatprep.subr.bf16.mxu0 %v4951_v39  ;;  %3063 = vmatprep.subr.bf16.mxu1 %v4451_v25 }
 0x8df   :  { %4295 = vmatpush3.bf16.msra.mxu0 %v4430_v32 }
 0x8e2   :  { %4297 = vmatmul.mubr.bf16.vlgmr.msra.gmra.mrb[44].mxu0 %v2533_v6 }
 0x986   :  { %v2438_v19 = vpop.f32.mrb[40].mxu1 }
 0x987   :  { %v2439_v52 = vadd.f32 %v3978_v15, %v2438_v19  ;;  %v4278_v28 = vpop.f32.mrb[41].mxu1 }
 0x988   :  { %v2441_v48 = vpop.f32.mrb[42].mxu1  ;;  %v4454_v28 = vld [vmem:[%s6670_s17 + $0x74] ss:$8 sps:$4 sm:$0xff]  }
 0x989   :  { %v2445_v22 = vmax.f32 %v2439_v52, 0.0  ;;  %v2442_v31 = vadd.f32 %v3978_v15, %v2441_v48  ;;  %v4279_v39 = vpop.f32.mrb[43].mxu1  ;;  %v4449_v15 = vld [vmem:[%s6670_s17 + $0x60] ss:$8 sps:$4 sm:$0xff]  }
 0x98a   :  { %3064 = vmatpush1.bf16.msra.mxu1 %v4449_v15 }
 0x98b   :  { %v2446_v7 = vmax.f32 %v2442_v31, 0.0  ;;  %v2455_v3 = vmul.f32 %v3988_v34, %v2445_v22  ;;  %v4452_v31 = vld [vmem:[%s6670_s17 + $0x70] ss:$8 sps:$4 sm:$0xff]   ;;  %3065 = vmatprep.subr.bf16.mxu1 %v4454_v28 }
 0x98d   :  { %2457 = vadd.xlane.f32.xlu0 %v2455_v3  ;;  %v2456_v62 = vmul.f32 %v3988_v34, %v2446_v7 }
 0x98e   :  { %3066 = vmatpush1.bf16.msra.mxu1 %v4452_v31  ;;  %v2665_v31 = vstv %s4018_s3 }
 0x991   :  { %2459 = vadd.xlane.f32.xlu0 %v2456_v62 }
 0x995   :  { %v2235_v21 = vpop.f32.mrb[40].mxu0 }
 0x996   :  { %v2236_v37 = vadd.f32 %v3951_v12, %v2235_v21  ;;  %v4258_v47 = vpop.f32.mrb[41].mxu0 }
 0x997   :  { %v2238_v20 = vpop.f32.mrb[42].mxu0  ;;  %v2258_v47 = vstv %s6229_s0 }
 0x998   :  { %v2242_v46 = vmax.f32 %v2236_v37, 0.0  ;;  %v2239_v27 = vadd.f32 %v3951_v12, %v2238_v20  ;;  %v4259_v51 = vpop.f32.mrb[43].mxu0  ;;  %v2261_v12 = vld [vmem:[%s6735_s11] sm:$0xff] }
 0x999   :  { %vm2263_vm13 = vcmp.gt.f32.partialorder %v2261_v12, 0.5  ;;  %v2262_v51 = vld [vmem:[%s6735_s11 + $0x8] sm:$0xff] }
 0x99a   :  { %v2243_v36 = vmax.f32 %v2239_v27, 0.0  ;;  %v2251_v50 = vmul.f32 %v3960_v10, %v2242_v46  ;;  %vm2264_vm14 = vcmp.gt.f32.partialorder %v2262_v51, 0.5 }
 0x99c   :  { %2253 = vadd.xlane.f32.xlu1 %v2251_v50  ;;  %v2252_v24 = vmul.f32 %v3960_v10, %v2243_v36 }
 0x9a0   :  { %2255 = vadd.xlane.f32.xlu1 %v2252_v24 }
 0x9b5   :  { %v2641_v38 = vpop.f32.mrb[44].mxu0 }
 0x9b6   :  { %v2642_v40 = vadd.f32 %v4007_v35, %v2641_v38  ;;  %v4298_v41 = vpop.f32.mrb[45].mxu0 }
 0x9b7   :  { %v2644_v42 = vpop.f32.mrb[46].mxu0 }
 0x9b8   :  { %v2648_v4 = vmax.f32 %v2642_v40, 0.0  ;;  %v2645_v11 = vadd.f32 %v4007_v35, %v2644_v42  ;;  %v4299_v13 = vpop.f32.mrb[47].mxu0 }
 0x9ba   :  { %v2649_v49 = vmax.f32 %v2645_v11, 0.0  ;;  %v2658_v17 = vmul.f32 %v4017_v29, %v2648_v4 }
 0x9bc   :  { %2660 = vadd.xlane.f32.xlu0 %v2658_v17  ;;  %v2659_v44 = vmul.f32 %v4017_v29, %v2649_v49 }
 0x9be   :  { %2662 = vadd.xlane.f32.xlu1 %v2659_v44 }
 0xa1a   :  { %v2458_v18 = vpop.xlane.xlu0 %2457 }
 0xa1b   :  { %v2463_v59 = vadd.f32 %v2462_v54, %v2458_v18 }
 0xa1d   :  { %v2469_v26 = vsel %vm2467_vm10, -1e+09, %v2463_v59 }
 0xa1e   :  { %v2471_v32 = vsel %vm2267_vm11, %v2469_v26, -inf  ;;  %v2460_v6 = vpop.xlane.xlu0 %2459 }
 0xa1f   :  { %v2472_v19 = vrot.slane %v2471_v32, 4  ;;  %v2464_v52 = vadd.f32 %v2462_v54, %v2460_v6 }
 0xa21   :  { %v2473_v48 = vmax.f32 %v2471_v32, %v2472_v19  ;;  %v2470_v34 = vsel %vm2468_vm12, -1e+09, %v2464_v52 }
 0xa22   :  { %v2478_v22 = vsel %vm2267_vm11, %v2470_v34, -inf }
 0xa23   :  { %v2474_v39 = vrot.slane %v2473_v48, 2  ;;  %v2479_v7 = vrot.slane %v2478_v22, 4 }
 0xa25   :  { %v2475_v3 = vmax.f32 %v2473_v48, %v2474_v39  ;;  %v2480_v62 = vmax.f32 %v2478_v22, %v2479_v7  ;;  %v2668_v22 = vld [vmem:[%s6736_s1] sm:$0xff] }
 0xa26   :  { %vm2670_vm15 = vcmp.gt.f32.partialorder %v2668_v22, 0.5  ;;  %v4466_v22 = vld [vmem:[%s6670_s17 + $0xb4] ss:$8 sps:$4 sm:$0xff]  }
 0xa27   :  { %v2476_v21 = vrot.slane %v2475_v3, 1  ;;  %v2481_v37 = vrot.slane %v2480_v62, 2 }
 0xa29   :  { %v2477_v20 = vmax.f32 %v2475_v3, %v2476_v21  ;;  %v2482_v10 = vmax.f32 %v2480_v62, %v2481_v37  ;;  %v2254_v46 = vpop.xlane.xlu1 %2253  ;;  %v2669_v3 = vld [vmem:[%s6736_s1 + $0x8] sm:$0xff] }
 0xa2a   :  { %v2259_v27 = vadd.f32 %v2258_v47, %v2254_v46  ;;  %vm2671_vm0 = vcmp.gt.f32.partialorder %v2669_v3, 0.5 }
 0xa2b   :  { %v2485_v36 = vsub.f32 %v2469_v26, %v2477_v20  ;;  %v2483_v50 = vrot.slane %v2482_v10, 1 }
 0xa2c   :  { %v2265_v24 = vsel %vm2263_vm13, -1e+09, %v2259_v27 }
 0xa2d   :  { %v2487_v35 = vmul.f32 1.442695, %v2485_v36  ;;  %v2484_v38 = vmax.f32 %v2482_v10, %v2483_v50  ;;  %v2268_v40 = vsel %vm2267_vm11, %v2265_v24, -inf  ;;  %v2256_v41 = vpop.xlane.xlu1 %2255 }
 0xa2e   :  { %v2269_v42 = vrot.slane %v2268_v40, 4  ;;  %v2260_v29 = vadd.f32 %v2258_v47, %v2256_v41 }
 0xa2f   :  { %4847 = vpow2.f32 %v2487_v35  ;;  %v2486_v4 = vsub.f32 %v2470_v34, %v2484_v38 }
 0xa30   :  { %v2270_v11 = vmax.f32 %v2268_v40, %v2269_v42  ;;  %v2266_v13 = vsel %vm2264_vm14, -1e+09, %v2260_v29 }
 0xa31   :  { %v2489_v49 = vmul.f32 1.442695, %v2486_v4  ;;  %v2275_v17 = vsel %vm2267_vm11, %v2266_v13, -inf }
 0xa32   :  { %v2271_v44 = vrot.slane %v2270_v11, 2  ;;  %v2276_v55 = vrot.slane %v2275_v17, 4 }
 0xa33   :  { %4849 = vpow2.f32 %v2489_v49 }
 0xa34   :  { %v2272_v2 = vmax.f32 %v2270_v11, %v2271_v44  ;;  %v2277_v45 = vmax.f32 %v2275_v17, %v2276_v55 }
 0xa36   :  { %v2273_v53 = vrot.slane %v2272_v2, 1  ;;  %v2278_v14 = vrot.slane %v2277_v45, 2 }
 0xa38   :  { %v2274_v8 = vmax.f32 %v2272_v2, %v2273_v53  ;;  %v2279_v57 = vmax.f32 %v2277_v45, %v2278_v14 }
 0xa39   :  { %v4848_v60 = vpop.eup %4847 }
 0xa3a   :  { %v2491_v56 = vsel %vm2267_vm11, %v4848_v60, 0.0  ;;  %v2282_v23 = vsub.f32 %v2265_v24, %v2274_v8  ;;  %v2280_v61 = vrot.slane %v2279_v57, 1 }
 0xa3b   :  { %v2492_v16 = vrot.slane %v2491_v56, 4 }
 0xa3c   :  { %v2284_v54 = vmul.f32 1.442695, %v2282_v23  ;;  %v2281_v18 = vmax.f32 %v2279_v57, %v2280_v61 }
 0xa3d   :  { %v4850_v0 = vpop.eup %4849  ;;  %v2493_v59 = vadd.f32 %v2492_v16, %v2491_v56 }
 0xa3e   :  { %v2498_v33 = vsel %vm2267_vm11, %v4850_v0, 0.0  ;;  %4851 = vpow2.f32 %v2284_v54  ;;  %v2283_v25 = vsub.f32 %v2266_v13, %v2281_v18  ;;  %v4457_v54 = vld [vmem:[%s6670_s17 + $0x84] ss:$8 sps:$4 sm:$0xff]  }
 0xa3f   :  { %v2494_v26 = vrot.slane %v2493_v59, 2  ;;  %v2499_v32 = vrot.slane %v2498_v33, 4  ;;  %3067 = vmatprep.subr.bf16.mxu1 %v4457_v54 }
 0xa40   :  { %v2286_v6 = vmul.f32 1.442695, %v2283_v25 }
 0xa41   :  { %v2500_v15 = vadd.f32 %v2499_v32, %v2498_v33  ;;  %v2495_v19 = vadd.f32 %v2494_v26, %v2493_v59  ;;  %v4455_v33 = vld [vmem:[%s6670_s17 + $0x80] ss:$8 sps:$4 sm:$0xff]  }
 0xa42   :  { %4853 = vpow2.f32 %v2286_v6  ;;  %3068 = vmatpush1.bf16.msra.mxu1 %v4455_v33 }
 0xa43   :  { %v2501_v52 = vrot.slane %v2500_v15, 2  ;;  %v2496_v28 = vrot.slane %v2495_v19, 1 }
 0xa45   :  { %v2497_v48 = vadd.f32 %v2496_v28, %v2495_v19  ;;  %v2502_v34 = vadd.f32 %v2501_v52, %v2500_v15  ;;  %v4458_v15 = vld [vmem:[%s6670_s17 + $0x90] ss:$8 sps:$4 sm:$0xff]   ;;  %v4463_v52 = vld [vmem:[%s6670_s17 + $0xa4] ss:$8 sps:$4 sm:$0xff]   ;;  %v4461_v28 = vld [vmem:[%s6670_s17 + $0xa0] ss:$8 sps:$4 sm:$0xff]  }
 0xa47   :  { %4855 = vrcp.f32 %v2497_v48  ;;  %v2503_v39 = vrot.slane %v2502_v34, 1 }
 0xa48   :  { %v6252_v7 = vpop.eup %4851 }
 0xa49   :  { %v2288_v62 = vsel %vm2267_vm11, %v6252_v7, 0.0  ;;  %v2661_v12 = vpop.xlane.xlu0 %2660  ;;  %v2504_v21 = vadd.f32 %v2503_v39, %v2502_v34  ;;  %v4464_v39 = vld [vmem:[%s6670_s17 + $0xb0] ss:$8 sps:$4 sm:$0xff]  }
 0xa4a   :  { %v2289_v37 = vrot.slane %v2288_v62, 4  ;;  %v2666_v47 = vadd.f32 %v2665_v31, %v2661_v12 }
 0xa4b   :  { %v2663_v20 = vpop.xlane.xlu1 %2662  ;;  %4857 = vrcp.f32 %v2504_v21 }
 0xa4c   :  { %v4854_v10 = vpop.eup %4853  ;;  %v2290_v46 = vadd.f32 %v2289_v37, %v2288_v62  ;;  %v2672_v27 = vsel %vm2670_vm15, -1e+09, %v2666_v47  ;;  %v2667_v51 = vadd.f32 %v2665_v31, %v2663_v20  ;;  %v4469_v62 = vld [vmem:[%s6670_s17 + $0xc4] ss:$8 sps:$4 sm:$0xff]  }
 0xa4d   :  { %v2295_v36 = vsel %vm2267_vm11, %v4854_v10, 0.0  ;;  %v2674_v50 = vsel %vm2267_vm11, %v2672_v27, -inf }
 0xa4e   :  { %v2291_v24 = vrot.slane %v2290_v46, 2  ;;  %v2296_v35 = vrot.slane %v2295_v36, 4  ;;  %v2675_v38 = vrot.slane %v2674_v50, 4  ;;  %v2673_v40 = vsel %vm2671_vm0, -1e+09, %v2667_v51 }
 0xa4f   :  { %v2681_v41 = vsel %vm2267_vm11, %v2673_v40, -inf  ;;  %v4470_v51 = vld [vmem:[%s6670_s17 + $0xd0] ss:$8 sps:$4 sm:$0xff]  }
 0xa50   :  { %v2297_v42 = vadd.f32 %v2296_v35, %v2295_v36  ;;  %v2676_v29 = vmax.f32 %v2674_v50, %v2675_v38  ;;  %v2682_v4 = vrot.slane %v2681_v41, 4  ;;  %v2292_v11 = vadd.f32 %v2291_v24, %v2290_v46  ;;  %v4475_v24 = vld [vmem:[%s6670_s17 + $0xe4] ss:$8 sps:$4 sm:$0xff]  }
 0xa51   :  { %v4856_v13 = vpop.eup %4855 }
 0xa52   :  { %v2298_v49 = vrot.slane %v2297_v42, 2  ;;  %v2677_v17 = vrot.slane %v2676_v29, 2  ;;  %v2683_v44 = vmax.f32 %v2681_v41, %v2682_v4  ;;  %v2507_v55 = vmul.f32 %v4856_v13, %v4848_v60  ;;  %v4476_v13 = vld [vmem:[%s6670_s17 + $0xf0] ss:$8 sps:$4 sm:$0xff]  }
 0xa53   :  { %v2293_v2 = vrot.slane %v2292_v11, 1 }
 0xa54   :  { %v2678_v45 = vmax.f32 %v2676_v29, %v2677_v17  ;;  %v2684_v53 = vrot.slane %v2683_v44, 2  ;;  %2511 = vperm.xlu0 %4317, %v2507_v55   ;;  %v2299_v14 = vadd.f32 %v2298_v49, %v2297_v42  ;;  %v4478_v29 = vld [vmem:[%s6670_s17 + $0xf4] ss:$8 sps:$4 sm:$0xff]   ;;  %v4481_v49 = vld [vmem:[%s6670_s17 + $0x104] ss:$8 sps:$4 sm:$0xff]  }
 0xa55   :  { %v4858_v8 = vpop.eup %4857  ;;  %v2294_v57 = vadd.f32 %v2293_v2, %v2292_v11 }
 0xa56   :  { %v2679_v56 = vrot.slane %v2678_v45, 1  ;;  %v2685_v23 = vmax.f32 %v2683_v44, %v2684_v53  ;;  %v2508_v61 = vmul.f32 %v4858_v8, %v4850_v0  ;;  %v2300_v16 = vrot.slane %v2299_v14, 1  ;;  %v4460_v0 = vld [vmem:[%s6670_s17 + $0x94] ss:$8 sps:$4 sm:$0xff]  }
 0xa57   :  { %4859 = vrcp.f32 %v2294_v57  ;;  %3069 = vmatprep.subr.bf16.mxu1 %v4460_v0 }
 0xa58   :  { %v2680_v18 = vmax.f32 %v2678_v45, %v2679_v56  ;;  %v2686_v59 = vrot.slane %v2685_v23, 1  ;;  %2516 = vperm.xlu1 %4318, %v2508_v61   ;;  %v2301_v60 = vadd.f32 %v2300_v16, %v2299_v14  ;;  %3070 = vmatpush1.bf16.msra.mxu1 %v4458_v15 }
 0xa59   :  { %3071 = vmatprep.subr.bf16.mxu1 %v4463_v52 }
 0xa5a   :  { %v2688_v25 = vsub.f32 %v2672_v27, %v2680_v18  ;;  %v2687_v26 = vmax.f32 %v2685_v23, %v2686_v59  ;;  %4861 = vrcp.f32 %v2301_v60 }
 0xa5c   :  { %v2690_v32 = vmul.f32 1.442695, %v2688_v25  ;;  %v2689_v6 = vsub.f32 %v2673_v40, %v2687_v26  ;;  %3072 = vmatpush1.bf16.msra.mxu1 %v4461_v28  ;;  %v4473_v40 = vld [vmem:[%s6670_s17 + $0xe0] ss:$8 sps:$4 sm:$0xff]  }
 0xa5d   :  { %3073 = vmatprep.subr.bf16.mxu1 %v4466_v22 }
 0xa5e   :  { %4863 = vpow2.f32 %v2690_v32  ;;  %v2692_v19 = vmul.f32 1.442695, %v2689_v6 }
 0xa60   :  { %4865 = vpow2.f32 %v2692_v19  ;;  %3074 = vmatpush1.bf16.msra.mxu1 %v4464_v39 }
 0xa61   :  { %v4860_v48 = vpop.eup %4859  ;;  %3075 = vmatprep.subr.bf16.mxu1 %v4469_v62 }
 0xa62   :  { %v2304_v34 = vmul.f32 %v4860_v48, %v6252_v7  ;;  %v4467_v7 = vld [vmem:[%s6670_s17 + $0xc0] ss:$8 sps:$4 sm:$0xff]  }
 0xa64   :  { %v4862_v31 = vpop.eup %4861  ;;  %2308 = vperm.xlu1 %4318, %v2304_v34   ;;  %3076 = vmatpush1.bf16.msra.mxu1 %v4467_v7 }
 0xa65   :  { %v2305_v3 = vmul.f32 %v4862_v31, %v4854_v10  ;;  %v4472_v10 = vld [vmem:[%s6670_s17 + $0xd4] ss:$8 sps:$4 sm:$0xff]  }
 0xa66   :  { %3077 = vmatprep.subr.bf16.mxu1 %v4472_v10  ;;  %v4487_v10 = vld [vmem:[%s6670_s17 + $0x124] ss:$8 sps:$4 sm:$0xff]  }
 0xa68   :  { %v4864_v12 = vpop.eup %4863  ;;  %2313 = vperm.xlu1 %4318, %v2305_v3   ;;  %3078 = vmatpush1.bf16.msra.mxu1 %v4470_v51 }
 0xa69   :  { %v2694_v21 = vsel %vm2267_vm11, %v4864_v12, 0.0  ;;  %3079 = vmatprep.subr.bf16.mxu1 %v4475_v24  ;;  %v4493_v24 = vld [vmem:[%s6670_s17 + $0x144] ss:$8 sps:$4 sm:$0xff]  }
 0xa6a   :  { %v4866_v37 = vpop.eup %4865  ;;  %v2695_v47 = vrot.slane %v2694_v21, 4 }
 0xa6b   :  { %v2701_v20 = vsel %vm2267_vm11, %v4866_v37, 0.0 }
 0xa6c   :  { %v2696_v46 = vadd.f32 %v2695_v47, %v2694_v21  ;;  %v2702_v27 = vrot.slane %v2701_v20, 4  ;;  %3080 = vmatpush1.bf16.msra.mxu1 %v4473_v40  ;;  %v4491_v40 = vld [vmem:[%s6670_s17 + $0x140] ss:$8 sps:$4 sm:$0xff]  }
 0xa6d   :  { %3081 = vmatprep.subr.bf16.mxu1 %v4478_v29 }
 0xa6e   :  { %v2697_v36 = vrot.slane %v2696_v46, 2  ;;  %v2703_v50 = vadd.f32 %v2702_v27, %v2701_v20  ;;  %v4482_v20 = vld [vmem:[%s6670_s17 + $0x110] ss:$8 sps:$4 sm:$0xff]   ;;  %v4490_v27 = vld [vmem:[%s6670_s17 + $0x134] ss:$8 sps:$4 sm:$0xff]  }
 0xa70   :  { %v2704_v35 = vrot.slane %v2703_v50, 2  ;;  %v2698_v38 = vadd.f32 %v2697_v36, %v2696_v46  ;;  %3082 = vmatpush1.bf16.msra.mxu1 %v4476_v13  ;;  %v4485_v46 = vld [vmem:[%s6670_s17 + $0x120] ss:$8 sps:$4 sm:$0xff]   ;;  %v4488_v36 = vld [vmem:[%s6670_s17 + $0x130] ss:$8 sps:$4 sm:$0xff]  }
 0xa71   :  { %3092 = vmatprep.subr.bf16.mxu1 %v4481_v49 }
 0xa72   :  { %v2699_v41 = vrot.slane %v2698_v38, 1  ;;  %v2705_v42 = vadd.f32 %v2704_v35, %v2703_v50 }
 0xa74   :  { %v2700_v4 = vadd.f32 %v2699_v41, %v2698_v38  ;;  %v2706_v11 = vrot.slane %v2705_v42, 1 }
 0xa76   :  { %4867 = vrcp.f32 %v2700_v4  ;;  %v2707_v17 = vadd.f32 %v2706_v11, %v2705_v42  ;;  %v4494_v11 = vld [vmem:[%s6670_s17 + $0x150] ss:$8 sps:$4 sm:$0xff]  }
 0xa78   :  { %4869 = vrcp.f32 %v2707_v17  ;;  %v4499_v17 = vld [vmem:[%s6670_s17 + $0x164] ss:$8 sps:$4 sm:$0xff]  }
 0xa80   :  { %v4868_v44 = vpop.eup %4867 }
 0xa81   :  { %v2710_v55 = vmul.f32 %v4868_v44, %v4864_v12  ;;  %v4497_v44 = vld [vmem:[%s6670_s17 + $0x160] ss:$8 sps:$4 sm:$0xff]  }
 0xa82   :  { %v4870_v2 = vpop.eup %4869 }
 0xa83   :  { %2714 = vperm.xlu1 %4318, %v2710_v55   ;;  %v2711_v45 = vmul.f32 %v4870_v2, %v4866_v37 }
 0xa87   :  { %2719 = vperm.xlu1 %4318, %v2711_v45   ;;  %v4502_v45 = vld [vmem:[%s6670_s17 + $0x174] ss:$8 sps:$4 sm:$0xff]  }
 0xad3   :  { %v2512_v53 = vpop.permute.xlu0 %2511 }
 0xad4   :  { %v2519_v14 = vmul.f32 %v2512_v53, %v6106_v43 }
 0xad6   :  { %v2521_v8 = vrot.slane %v2519_v14, 4 }
 0xad7   :  { %v2517_v57 = vpop.permute.xlu1 %2516 }
 0xad8   :  { %v2522_v56 = vadd.f32 %v2521_v8, %v2519_v14  ;;  %v2520_v23 = vmul.f32 %v2517_v57, %v6108_v63  ;;  %v4500_v14 = vld [vmem:[%s6670_s17 + $0x170] ss:$8 sps:$4 sm:$0xff]  }
 0xada   :  { %v2523_v61 = vrot.slane %v2522_v56, 2  ;;  %v2527_v16 = vrot.slane %v2520_v23, 4 }
 0xadc   :  { %v2524_v54 = vadd.f32 %v2523_v61, %v2522_v56  ;;  %v2528_v18 = vadd.f32 %v2527_v16, %v2520_v23  ;;  %v2799_v61 = vld [vmem:[%s6671_s18] sm:$0x3]  ;;  %v6737_v16 = vld [vmem:[#allocation8_spill] sm:$0xff] }
 0xade   :  { %v2529_v59 = vrot.slane %v2528_v18, 2  ;;  %v2525_v60 = vrot.slane %v2524_v54, 1 }
 0xae0   :  { %v2530_v33 = vadd.f32 %v2529_v59, %v2528_v18  ;;  %v2526_v0 = vadd.f32 %v2525_v60, %v2524_v54  ;;  %v2804_v54 = vrot.slane %v2799_v61, %v6737_v16  ;;  %v6738_v18 = vld [vmem:[#allocation9_spill] sm:$0xff] }
 0xae1   :  { %v2808_v59 = vrot.slane %v2799_v61, %v6738_v18  ;;  %v4542_v61 = vld [vmem:[%s6676_s23 + $0xd0] ss:$8 sps:$4 sm:$0xff]  }
 0xae2   :  { %v2531_v25 = vrot.slane %v2530_v33, 1 }
 0xae3   :  { %v2309_v26 = vpop.permute.xlu1 %2308 }
 0xae4   :  { %v2532_v32 = vadd.f32 %v2531_v25, %v2530_v33  ;;  %v2316_v6 = vmul.f32 %v2309_v26, %v6113_v30  ;;  %v4479_v30 = vld [vmem:[%s6670_s17 + $0x100] ss:$8 sps:$4 sm:$0xff]  }
 0xae6   :  { %v2318_v15 = vrot.slane %v2316_v6, 4  ;;  %v2742_v43 = vsel %vm665_vm1, %v2532_v32, %v2526_v0 }
 0xae7   :  { %v2314_v19 = vpop.permute.xlu1 %2313  ;;  %v2749_v52 = vpack.c.bf16 %v2742_v43, %v2742_v43 }
 0xae8   :  { %v2319_v28 = vadd.f32 %v2318_v15, %v2316_v6  ;;  %v2317_v63 = vmul.f32 %v2314_v19, %v6116_v1  ;;  %v4484_v1 = vld [vmem:[%s6670_s17 + $0x114] ss:$8 sps:$4 sm:$0xff]   ;;  %v4503_v19 = vld [vmem:[%s6676_s23] ss:$8 sps:$4 sm:$0xff]  }
 0xae9   :  { %3083 = vmatprep.mubr.bf16.mxu1 %v2749_v52  ;;  %v4505_v52 = vld [vmem:[%s6676_s23 + $0x4] ss:$8 sps:$4 sm:$0xff]  }
 0xaea   :  { %v2320_v48 = vrot.slane %v2319_v28, 2  ;;  %v2324_v34 = vrot.slane %v2317_v63, 4  ;;  %3549 = vmatprep.subr.bf16.mxu0 %v4505_v52  ;;  %v4582_v52 = vld [vmem:[%s6678_s25 + $0x18] sm:$0xff]  }
 0xaeb   :  { %3550 = vmatpush1.bf16.msra.mxu0 %v4503_v19  ;;  %v4581_v19 = vld [vmem:[%s6678_s25 + $0x58] sm:$0xff]  }
 0xaec   :  { %v2321_v22 = vadd.f32 %v2320_v48, %v2319_v28  ;;  %v2325_v31 = vadd.f32 %v2324_v34, %v2317_v63  ;;  %v4508_v28 = vld [vmem:[%s6676_s23 + $0x14] ss:$8 sps:$4 sm:$0xff]   ;;  %v4506_v63 = vld [vmem:[%s6676_s23 + $0x10] ss:$8 sps:$4 sm:$0xff]   ;;  %v4511_v48 = vld [vmem:[%s6676_s23 + $0x24] ss:$8 sps:$4 sm:$0xff]  }
 0xaed   :  { %3551 = vmatprep.subr.bf16.mxu0 %v4508_v28  ;;  %v4509_v34 = vld [vmem:[%s6676_s23 + $0x20] ss:$8 sps:$4 sm:$0xff]  }
 0xaee   :  { %v2326_v39 = vrot.slane %v2325_v31, 2  ;;  %v2322_v3 = vrot.slane %v2321_v22, 1  ;;  %v4583_v28 = vld [vmem:[%s6678_s25 + $0x60] sm:$0xff]  }
 0xaef   :  { %3552 = vmatpush1.bf16.msra.mxu0 %v4506_v63  ;;  %v4584_v63 = vld [vmem:[%s6678_s25 + $0x20] sm:$0xff]  }
 0xaf0   :  { %v2327_v62 = vadd.f32 %v2326_v39, %v2325_v31  ;;  %v2323_v7 = vadd.f32 %v2322_v3, %v2321_v22  ;;  %3553 = vmatprep.subr.bf16.mxu0 %v4511_v48  ;;  %v4514_v22 = vld [vmem:[%s6676_s23 + $0x34] ss:$8 sps:$4 sm:$0xff]   ;;  %v4512_v31 = vld [vmem:[%s6676_s23 + $0x30] ss:$8 sps:$4 sm:$0xff]   ;;  %v4517_v39 = vld [vmem:[%s6676_s23 + $0x44] ss:$8 sps:$4 sm:$0xff]  }
 0xaf1   :  { %v4515_v3 = vld [vmem:[%s6676_s23 + $0x40] ss:$8 sps:$4 sm:$0xff]  }
 0xaf2   :  { %v2328_v12 = vrot.slane %v2327_v62, 1  ;;  %v4585_v48 = vld [vmem:[%s6678_s25 + $0x68] sm:$0xff]  }
 0xaf3   :  { %3554 = vmatpush1.bf16.msra.mxu0 %v4509_v34 }
 0xaf4   :  { %v2329_v21 = vadd.f32 %v2328_v12, %v2327_v62  ;;  %3555 = vmatprep.subr.bf16.mxu0 %v4514_v22  ;;  %v4520_v62 = vld [vmem:[%s6676_s23 + $0x54] ss:$8 sps:$4 sm:$0xff]   ;;  %v4518_v12 = vld [vmem:[%s6676_s23 + $0x50] ss:$8 sps:$4 sm:$0xff]  }
 0xaf6   :  { %v2738_v37 = vsel %vm665_vm1, %v2329_v21, %v2323_v7  ;;  %v4523_v7 = vld [vmem:[%s6676_s23 + $0x64] ss:$8 sps:$4 sm:$0xff]   ;;  %v4521_v21 = vld [vmem:[%s6676_s23 + $0x60] ss:$8 sps:$4 sm:$0xff]  }
 0xaf7   :  { %v2748_v47 = vpack.c.bf16 %v2738_v37, %v2738_v37  ;;  %3556 = vmatpush1.bf16.msra.mxu0 %v4512_v31  ;;  %v4524_v37 = vld [vmem:[%s6676_s23 + $0x70] ss:$8 sps:$4 sm:$0xff]  }
 0xaf8   :  { %3557 = vmatprep.subr.bf16.mxu0 %v4517_v39  ;;  %v3182_v39 = vld [vmem:[%s6674_s21] sm:$0x7] }
 0xaf9   :  { %3084 = vmatmul.mubr.bf16.vlgmr.msra.gmra.mrb[44].mxu1 %v2748_v47  ;;  %v4529_v47 = vld [vmem:[%s6676_s23 + $0x84] ss:$8 sps:$4 sm:$0xff]  }
 0xafa   :  { %3093 = vmatpush1.bf16.msra.mxu1 %v4479_v30  ;;  %3124 = vmatprep.mubr.bf16.mxu1 %v6722_v58  ;;  %v4526_v30 = vld [vmem:[%s6676_s23 + $0x74] ss:$8 sps:$4 sm:$0xff]  }
 0xafb   :  { %3094 = vmatprep.subr.bf16.mxu1 %v4484_v1  ;;  %3558 = vmatpush1.bf16.msra.mxu0 %v4515_v3  ;;  %v4527_v1 = vld [vmem:[%s6676_s23 + $0x80] ss:$8 sps:$4 sm:$0xff]  }
 0xafc   :  { %3559 = vmatprep.subr.bf16.mxu0 %v4520_v62  ;;  %v3183_v3 = vld [vmem:[%s6675_s22] sm:$0x7]  ;;  %v3216_v62 = vrot.slane %v3182_v39, %v6738_v18 }
 0xafe   :  { %3095 = vmatpush1.bf16.msra.mxu1 %v4482_v20  ;;  %v4532_v20 = vld [vmem:[%s6676_s23 + $0x94] ss:$8 sps:$4 sm:$0xff]  }
 0xaff   :  { %3096 = vmatprep.subr.bf16.mxu1 %v4487_v10  ;;  %3560 = vmatpush1.bf16.msra.mxu0 %v4518_v12  ;;  %v4530_v10 = vld [vmem:[%s6676_s23 + $0x90] ss:$8 sps:$4 sm:$0xff]   ;;  %v3212_v12 = vrot.slane %v3182_v39, %v6737_v16 }
 0xb00   :  { %3561 = vmatprep.subr.bf16.mxu0 %v4523_v7 }
 0xb02   :  { %3097 = vmatpush1.bf16.msra.mxu1 %v4485_v46  ;;  %v2715_v51 = vpop.permute.xlu1 %2714  ;;  %v4535_v46 = vld [vmem:[%s6676_s23 + $0xa4] ss:$8 sps:$4 sm:$0xff]  }
 0xb03   :  { %v2722_v50 = vmul.f32 %v2715_v51, %v6155_v5  ;;  %3098 = vmatprep.subr.bf16.mxu1 %v4490_v27  ;;  %v4496_v5 = vld [vmem:[%s6670_s17 + $0x154] ss:$8 sps:$4 sm:$0xff]   ;;  %3562 = vmatpush1.bf16.msra.mxu0 %v4521_v21  ;;  %v4533_v27 = vld [vmem:[%s6676_s23 + $0xa0] ss:$8 sps:$4 sm:$0xff]  }
 0xb04   :  { %3563 = vmatprep.subr.bf16.mxu0 %v4526_v30  ;;  %v3235_v30 = vrot.slane %v3183_v3, %v6738_v18 }
 0xb05   :  { %v2724_v35 = vrot.slane %v2722_v50, 4 }
 0xb06   :  { %3099 = vmatpush1.bf16.msra.mxu1 %v4488_v36  ;;  %v2720_v38 = vpop.permute.xlu1 %2719 }
 0xb07   :  { %v2725_v41 = vadd.f32 %v2724_v35, %v2722_v50  ;;  %v2723_v42 = vmul.f32 %v2720_v38, %v6157_v9  ;;  %3100 = vmatprep.subr.bf16.mxu1 %v4493_v24  ;;  %3564 = vmatpush1.bf16.msra.mxu0 %v4524_v37 }
 0xb08   :  { %3565 = vmatprep.subr.bf16.mxu0 %v4529_v47  ;;  %v3231_v47 = vrot.slane %v3183_v3, %v6737_v16 }
 0xb09   :  { %v2726_v29 = vrot.slane %v2725_v41, 2  ;;  %v2730_v4 = vrot.slane %v2723_v42, 4 }
 0xb0a   :  { %3101 = vmatpush1.bf16.msra.mxu1 %v4491_v40 }
 0xb0b   :  { %v2727_v13 = vadd.f32 %v2726_v29, %v2725_v41  ;;  %v2731_v49 = vadd.f32 %v2730_v4, %v2723_v42  ;;  %3102 = vmatprep.subr.bf16.mxu1 %v4496_v5  ;;  %3566 = vmatpush1.bf16.msra.mxu0 %v4527_v1 }
 0xb0c   :  { %3567 = vmatprep.subr.bf16.mxu0 %v4532_v20 }
 0xb0d   :  { %v2732_v9 = vrot.slane %v2731_v49, 2  ;;  %v2728_v55 = vrot.slane %v2727_v13, 1 }
 0xb0e   :  { %3103 = vmatpush1.bf16.msra.mxu1 %v4494_v11 }
 0xb0f   :  { %v2733_v2 = vadd.f32 %v2732_v9, %v2731_v49  ;;  %3104 = vmatprep.subr.bf16.mxu1 %v4499_v17  ;;  %v2729_v8 = vadd.f32 %v2728_v55, %v2727_v13  ;;  %3568 = vmatpush1.bf16.msra.mxu0 %v4530_v10 }
 0xb10   :  { %3569 = vmatprep.subr.bf16.mxu0 %v4535_v46 }
 0xb11   :  { %v2734_v53 = vrot.slane %v2733_v2, 1 }
 0xb12   :  { %3105 = vmatpush1.bf16.msra.mxu1 %v4497_v44 }
 0xb13   :  { %v2735_v57 = vadd.f32 %v2734_v53, %v2733_v2  ;;  %3106 = vmatprep.subr.bf16.mxu1 %v4502_v45  ;;  %3570 = vmatpush1.bf16.msra.mxu0 %v4533_v27 }
 0xb15   :  { %v2746_v56 = vsel %vm665_vm1, %v2735_v57, %v2729_v8  ;;  %v4536_v8 = vld [vmem:[%s6676_s23 + $0xb0] ss:$8 sps:$4 sm:$0xff]   ;;  %v4539_v57 = vld [vmem:[%s6676_s23 + $0xc0] ss:$8 sps:$4 sm:$0xff]   ;;  %vm3818_vm1 = vcmask 123904  }
 0xb16   :  { %3107 = vmatpush1.bf16.msra.mxu1 %v4500_v14  ;;  %v2750_v23 = vpack.c.bf16 %v2746_v56, %v2746_v56  ;;  %v4538_v14 = vld [vmem:[%s6676_s23 + $0xb4] ss:$8 sps:$4 sm:$0xff]   ;;  %v4541_v56 = vld [vmem:[%s6676_s23 + $0xc4] ss:$8 sps:$4 sm:$0xff]  }
 0xb17   :  { %3571 = vmatprep.subr.bf16.mxu0 %v4538_v14 }
 0xb18   :  { %3572 = vmatpush1.bf16.msra.mxu0 %v4536_v8 }
 0xb19   :  { %3125 = vmatmul.mubr.bf16.vlgmr.msra.gmra.mrb[44].mxu1 %v2750_v23  ;;  %v4544_v23 = vld [vmem:[%s6676_s23 + $0xd4] ss:$8 sps:$4 sm:$0xff]   ;;  %3573 = vmatprep.subr.bf16.mxu0 %v4541_v56 }
 0xb1a   :  { %v4587_v56 = vld [vmem:[%s6678_s25 + $0x70] sm:$0xff]  }
 0xb1c   :  { %3574 = vmatpush1.bf16.msra.mxu0 %v4539_v57  ;;  %v4586_v57 = vld [vmem:[%s6678_s25 + $0x28] sm:$0xff]  }
 0xb1d   :  { %3575 = vmatprep.subr.bf16.mxu0 %v4544_v23  ;;  %v4588_v23 = vld [vmem:[%s6678_s25 + $0x30] sm:$0xff]  }
 0xb20   :  { %3576 = vmatpush1.bf16.msra.mxu0 %v4542_v61  ;;  %v4589_v61 = vld [vmem:[%s6678_s25 + $0x78] sm:$0xff]  }
 0xbec   :  { %v3126_v60 = vpop.f32.mrb[44].mxu1 }
 0xbed   :  { %v6376_v33 = vadd.f32 %v3126_v60, %v2804_v54  ;;  %v3128_v25 = vpop.f32.mrb[45].mxu1  ;;  %v4547_v54 = vld [vmem:[%s6676_s23 + $0xe4] ss:$8 sps:$4 sm:$0xff]   ;;  %v4550_v60 = vld [vmem:[%s6676_s23 + $0xf4] ss:$8 sps:$4 sm:$0xff]  }
 0xbee   :  { %v6378_v26 = vadd.f32 %v3128_v25, %v2808_v59  ;;  %v3130_v0 = vpop.f32.mrb[46].mxu1  ;;  %v4545_v59 = vld [vmem:[%s6676_s23 + $0xe0] ss:$8 sps:$4 sm:$0xff]   ;;  %3577 = vmatprep.subr.bf16.mxu0 %v4547_v54  ;;  %v4553_v25 = vld [vmem:[%s6676_s23 + $0x104] ss:$8 sps:$4 sm:$0xff]   ;;  %v4590_v54 = vld [vmem:[%s6678_s25 + $0x38] sm:$0xff]  }
 0xbef   :  { %v3131_v32 = vpop.f32.mrb[47].mxu1  ;;  %v3135_v6 = vsel %vm1881_vm3, %v6376_v33, 0.0  ;;  %3578 = vmatpush1.bf16.msra.mxu0 %v4545_v59  ;;  %v4576_v0 = vld [vmem:[%s6678_s25] sm:$0xff]  }
 0xbf0   :  { %v3136_v15 = vsel %vm1881_vm3, %v6378_v26, 0.0  ;;  %3579 = vmatprep.subr.bf16.mxu0 %v4550_v60  ;;  %v4577_v32 = vld [vmem:[%s6678_s25 + $0x48] sm:$0xff]  }
 0xbf1   :  { %v3137_v43 = vadd.f32 %v3136_v15, %v3135_v6  ;;  %v4578_v6 = vld [vmem:[%s6678_s25 + $0x8] sm:$0xff]   ;;  %v4579_v15 = vld [vmem:[%s6678_s25 + $0x50] sm:$0xff]  }
 0xbf3   :  { %3185 = vadd.xlane.f32.xlu1 %v3137_v43 }
 0xbf7   :  { %3138 = vadd.xlane.f32.xlu1 %v3137_v43  ;;  %v4580_v43 = vld [vmem:[%s6678_s25 + $0x10] sm:$0xff]  }
 0xc80   :  { %v3186_v51 = vpop.xlane.xlu1 %3185 }
 0xc81   :  { %v3188_v36 = vmul.f32 0.0026041667, %v3186_v51  ;;  %v4551_v51 = vld [vmem:[%s6676_s23 + $0x100] ss:$8 sps:$4 sm:$0xff]  }
 0xc83   :  { %v6451_v50 = vsub.f32 %v6376_v33, %v3188_v36  ;;  %v6454_v24 = vsub.f32 %v6378_v26, %v3188_v36  ;;  %v6456_v35 = vsub.f32 0.0, %v3188_v36 }
 0xc84   :  { %v3139_v38 = vpop.xlane.xlu1 %3138 }
 0xc85   :  { %v3141_v40 = vmul.f32 0.00390625, %v3139_v38  ;;  %v3192_v41 = vmul.f32 %v6451_v50, %v6451_v50  ;;  %v3193_v42 = vmul.f32 %v6454_v24, %v6454_v24  ;;  %v3194_v5 = vmul.f32 %v6456_v35, %v6456_v35  ;;  %v4559_v38 = vld [vmem:[%s6676_s23 + $0x124] ss:$8 sps:$4 sm:$0xff]  }
 0xc87   :  { %v6465_v29 = vsub.f32 %v6376_v33, %v3141_v40  ;;  %v6468_v4 = vsub.f32 %v6378_v26, %v3141_v40  ;;  %v3195_v11 = vsel %vm1881_vm3, %v3192_v41, 0.0  ;;  %v3196_v13 = vsel %vm1881_vm3, %v3193_v42, 0.0  ;;  %v4548_v33 = vld [vmem:[%s6676_s23 + $0xf0] ss:$8 sps:$4 sm:$0xff]   ;;  %v4575_v26 = vld [vmem:[%s6678_s25 + $0x40] sm:$0xff]  }
 0xc88   :  { %v3197_v49 = vadd.f32 %v3196_v13, %v3195_v11  ;;  %v3198_v17 = vsel %vm1881_vm3, %v3194_v5, 0.0  ;;  %3580 = vmatpush1.bf16.msra.mxu0 %v4548_v33  ;;  %4178 = vmatprep.subr.bf16.mxu1 %v4575_v26  ;;  %v4557_v40 = vld [vmem:[%s6676_s23 + $0x120] ss:$8 sps:$4 sm:$0xff]   ;;  %v4562_v41 = vld [vmem:[%s6676_s23 + $0x134] ss:$8 sps:$4 sm:$0xff]  }
 0xc89   :  { %v3144_v9 = vmul.f32 %v6465_v29, %v6465_v29  ;;  %v3145_v44 = vmul.f32 %v6468_v4, %v6468_v4  ;;  %3590 = vmatprep.subr.bf16.mxu0 %v4553_v25  ;;  %4179 = vmatpush3.bf16.msra.mxu1 %v4576_v0  ;;  %v4565_v42 = vld [vmem:[%s6676_s23 + $0x144] ss:$8 sps:$4 sm:$0xff]   ;;  %v4563_v5 = vld [vmem:[%s6676_s23 + $0x140] ss:$8 sps:$4 sm:$0xff]   ;;  %v4568_v11 = vld [vmem:[%s6676_s23 + $0x154] ss:$8 sps:$4 sm:$0xff]  }
 0xc8a   :  { %v3199_v55 = vadd.f32 %v3198_v17, %v3197_v49  ;;  %4180 = vmatprep.subr.bf16.mxu1 %v4577_v32  ;;  %v4566_v13 = vld [vmem:[%s6676_s23 + $0x150] ss:$8 sps:$4 sm:$0xff]   ;;  %v4571_v49 = vld [vmem:[%s6676_s23 + $0x164] ss:$8 sps:$4 sm:$0xff]   ;;  %v3133_v26 = vld [vmem:[%s6672_s19] sm:$0x3] }
 0xc8b   :  { %v3146_v2 = vsel %vm1881_vm3, %v3144_v9, 0.0  ;;  %v3147_v45 = vsel %vm1881_vm3, %v3145_v44, 0.0  ;;  %v6739_v9 = vld [vmem:[#allocation10_spill] sm:$0xff]  ;;  %v3297_v0 = vld [vmem:[%s6677_s24] sm:$0x3]  ;;  %s4953_s24 = smov [#allocation5]  }
 0xc8c   :  { %3200 = vadd.xlane.f32.xlu0 %v3199_v55  ;;  %v3148_v53 = vadd.f32 %v3147_v45, %v3146_v2  ;;  %v3220_v44 = vrot.slane %v3182_v39, %v6739_v9  ;;  %v4569_v55 = vld [vmem:[%s6676_s23 + $0x160] ss:$8 sps:$4 sm:$0xff]   ;;  %v4574_v2 = vld [vmem:[%s6676_s23 + $0x174] ss:$8 sps:$4 sm:$0xff]   ;;  %s3826_s17 = sshll.u32 %s4953_s24, 4  ;;  %s3827_s17 = int_to_ptr.vmem [resolvable:$true] %s3826_s17 }
 0xc8d   :  { %4181 = vmatpush3.bf16.msra.mxu1 %v4578_v6  ;;  %v3160_v6 = vrot.slane %v3133_v26, %v6737_v16  ;;  %s4923_s18 = scalar_lea.vmem %s3827_s17, 32  ;;  %p4928_p6 = scmp.lt.s32.totalorder %s3827_s17, %s3827_s17 }
 0xc8e   :  { %3149 = vadd.xlane.f32.xlu1 %v3148_v53  ;;  %4182 = vmatprep.subr.bf16.mxu1 %v4579_v15  ;;  %v3239_v53 = vrot.slane %v3183_v3, %v6739_v9  ;;  %v3134_v15 = vld [vmem:[%s6673_s20] sm:$0x3]  ;;  %p4924_p5 = scmp.ne.s32.totalorder %s3827_s17, %s4923_s18  ;;  %p4929_p7 = scmp.lt.s32.totalorder %s4923_s18, %s4923_s18 }
 0xc90   :  { %p4930_p8 = por %p4929_p7, %p4928_p6 }
 0xc91   :  { %4183 = vmatpush3.bf16.msra.mxu1 %v4580_v43 }
 0xc92   :  { %4184 = vmatprep.subr.bf16.mxu1 %v4581_v19  ;;  %v3164_v19 = vrot.slane %v3133_v26, %v6738_v18  ;;  %p4931_p9 = pnand %p4930_p8, %p4924_p5 }
 0xc95   :  { %4185 = vmatpush3.bf16.msra.mxu1 %v4582_v52  ;;  %v3302_v52 = vrot.slane %v3297_v0, %v6737_v16 }
 0xc96   :  { %4186 = vmatprep.subr.bf16.mxu1 %v4583_v28  ;;  %v3306_v28 = vrot.slane %v3297_v0, %v6738_v18 }
 0xc99   :  { %4187 = vmatpush3.bf16.msra.mxu1 %v4584_v63 }
 0xc9a   :  { %4188 = vmatprep.subr.bf16.mxu1 %v4585_v48  ;;  %v3173_v48 = vrot.slane %v3134_v15, %v6737_v16 }
 0xc9d   :  { %4189 = vmatpush3.bf16.msra.mxu1 %v4586_v57 }
 0xc9e   :  { %4190 = vmatprep.subr.bf16.mxu1 %v4587_v56 }
 0xca1   :  { %4191 = vmatpush3.bf16.msra.mxu1 %v4588_v23 }
 0xca2   :  { %4192 = vmatprep.subr.bf16.mxu1 %v4589_v61 }
 0xca5   :  { %4193 = vmatpush3.bf16.msra.mxu1 %v4590_v54 }
 0xd19   :  { %v3201_v34 = vpop.xlane.xlu0 %3200 }
 0xd1a   :  { %v3202_v22 = vmul.f32 0.0026041667, %v3201_v34 }
 0xd1b   :  { %v3150_v59 = vpop.xlane.xlu1 %3149 }
 0xd1c   :  { %v3203_v31 = vadd.f32 1e-05, %v3202_v22  ;;  %v3151_v60 = vmul.f32 0.00390625, %v3150_v59 }
 0xd1e   :  { %4871 = vrsqrt.f32 %v3203_v31  ;;  %v3152_v33 = vadd.f32 1e-05, %v3151_v60 }
 0xd20   :  { %4873 = vrsqrt.f32 %v3152_v33 }
 0xd28   :  { %v4872_v7 = vpop.eup %4871 }
 0xd29   :  { %v3206_v21 = vmul.f32 %v4872_v7, %v6454_v24  ;;  %v3205_v37 = vmul.f32 %v4872_v7, %v6451_v50  ;;  %v4556_v24 = vld [vmem:[%s6676_s23 + $0x114] ss:$8 sps:$4 sm:$0xff]   ;;  %v4554_v50 = vld [vmem:[%s6676_s23 + $0x110] ss:$8 sps:$4 sm:$0xff]   ;;  %v3207_v17 = vmul.f32 %v4872_v7, %v6456_v35 }
 0xd2a   :  { %v4572_v35 = vld [vmem:[%s6676_s23 + $0x170] ss:$8 sps:$4 sm:$0xff]   ;;  %v4874_v25 = vpop.eup %4873 }
 0xd2b   :  { %v3225_v1 = vmul.f32 %v3216_v62, %v3206_v21  ;;  %v3224_v20 = vmul.f32 %v3212_v12, %v3205_v37  ;;  %v3226_v45 = vmul.f32 %v3220_v44, %v3207_v17  ;;  %v3154_v32 = vmul.f32 %v4874_v25, %v6465_v29 }
 0xd2c   :  { %v3155_v43 = vmul.f32 %v4874_v25, %v6468_v4  ;;  %v3177_v29 = vrot.slane %v3134_v15, %v6738_v18  ;;  %v4115_v18 = vld [vmem:[%s6679_s26] ss:$0 sm:$0xff] }
 0xd2d   :  { %v3244_v10 = vadd.f32 %v3235_v30, %v3225_v1  ;;  %v3243_v46 = vadd.f32 %v3231_v47, %v3224_v20  ;;  %v3245_v14 = vadd.f32 %v3239_v53, %v3226_v45  ;;  %v3167_v63 = vmul.f32 %v3160_v6, %v3154_v32 }
 0xd2e   :  { %v3168_v22 = vmul.f32 %v3164_v19, %v3155_v43 }
 0xd2f   :  { %v3247_v27 = vpack.c.bf16 %v3244_v10, %v3244_v10  ;;  %v3246_v36 = vpack.c.bf16 %v3243_v46, %v3243_v46  ;;  %v3248_v8 = vpack.c.bf16 %v3245_v14, %v3245_v14  ;;  %v3180_v12 = vadd.f32 %v3173_v48, %v3167_v63 }
 0xd30   :  { %v3181_v21 = vadd.f32 %v3177_v29, %v3168_v22 }
 0xd31   :  { %3581 = vmatprep.mubr.bf16.mxu0 %v3247_v27 }
 0xd32   :  { %3582 = vmatmul.mubr.bf16.vlgmr.msra.gmra.mrb[48].mxu0 %v3246_v36 }
 0xd33   :  { %3591 = vmatpush1.bf16.msra.mxu0 %v4551_v51  ;;  %3622 = vmatprep.mubr.bf16.mxu0 %v6722_v58  ;;  %v4560_v58 = vld [vmem:[%s6676_s23 + $0x130] ss:$8 sps:$4 sm:$0xff]  }
 0xd34   :  { %3592 = vmatprep.subr.bf16.mxu0 %v4556_v24 }
 0xd37   :  { %3593 = vmatpush1.bf16.msra.mxu0 %v4554_v50 }
 0xd38   :  { %3594 = vmatprep.subr.bf16.mxu0 %v4559_v38 }
 0xd3b   :  { %3595 = vmatpush1.bf16.msra.mxu0 %v4557_v40 }
 0xd3c   :  { %3596 = vmatprep.subr.bf16.mxu0 %v4562_v41 }
 0xd3f   :  { %3597 = vmatpush1.bf16.msra.mxu0 %v4560_v58 }
 0xd40   :  { %3598 = vmatprep.subr.bf16.mxu0 %v4565_v42 }
 0xd43   :  { %3599 = vmatpush1.bf16.msra.mxu0 %v4563_v5 }
 0xd44   :  { %3600 = vmatprep.subr.bf16.mxu0 %v4568_v11 }
 0xd47   :  { %3601 = vmatpush1.bf16.msra.mxu0 %v4566_v13 }
 0xd48   :  { %3602 = vmatprep.subr.bf16.mxu0 %v4571_v49 }
 0xd4b   :  { %3603 = vmatpush1.bf16.msra.mxu0 %v4569_v55 }
 0xd4c   :  { %3604 = vmatprep.subr.bf16.mxu0 %v4574_v2 }
 0xd4f   :  { %3605 = vmatpush1.bf16.msra.mxu0 %v4572_v35 }
 0xd52   :  { %3623 = vmatmul.mubr.bf16.vlgmr.msra.gmra.mrb[48].mxu0 %v3248_v8 }
 0xe25   :  { %v3624_v34 = vpop.f32.mrb[48].mxu0 }
 0xe26   :  { %v4302_v31 = vadd.f32 %v3624_v34, %v3302_v52  ;;  %v3626_v39 = vpop.f32.mrb[49].mxu0 }
 0xe27   :  { %v4303_v3 = vadd.f32 %v3626_v39, %v3306_v28  ;;  %v3628_v62 = vpop.f32.mrb[50].mxu0 }
 0xe28   :  { %v3631_v7 = vmax.f32 %v4302_v31, 0.0  ;;  %v3629_v4 = vpop.f32.mrb[51].mxu0 }
 0xe29   :  { %v3632_v30 = vmax.f32 %v4303_v3, 0.0 }
 0xe2a   :  { %v3633_v37 = vadd.f32 %v3631_v7, %v3180_v12 }
 0xe2b   :  { %v3634_v47 = vadd.f32 %v3632_v30, %v3181_v21 }
 0xe2c   :  { %v3635_v20 = vpack.c.bf16 %v3633_v37, %v3633_v37 }
 0xe2d   :  { %v3636_v1 = vpack.c.bf16 %v3634_v47, %v3634_v47 }
 0xe2f   :  { %3804 = vmatprep.mubr.bf16.mxu1 %v3636_v1 }
 0xe30   :  { %3805 = vmatmul.mubr.bf16.vlgmr.msra.gmra.mrb[48].mxu1 %v3635_v20 }
 0xf03   :  { %v4194_v16 = vpop.f32.mrb[48].mxu1 }
 0xf04   :  { %v4195_v10 = vpop.f32.mrb[49].mxu1 }
 0xf05   :  { %v4196_v46 = vadd.f32 %v4195_v10, %v4194_v16  ;;  %v4197_v27 = vpop.f32.mrb[50].mxu1 }
 0xf06   :  { %v4198_v51 = vpop.f32.mrb[51].mxu1 }
 0xf07   :  { %v3807_v36 = vadd.f32 %v4196_v46, %v4115_v18 }
 0xf09   :  { %v4132_v24 = vmul.f32 -1.442695, %v3807_v36 }
 0xf0b   :  { %4875 = vpow2.f32 %v4132_v24 }
 0xf15   :  { %v4876_v50 = vpop.eup %4875 }
 0xf16   :  { %v3815_v38 = vadd.f32 1.0, %v4876_v50 }
 0xf18   :  { %4877 = vrcp.f32 %v3815_v38 }
 0xf22   :  { %v4878_v40 = vpop.eup %4877 }
 0xf23   :  { %3819 = vst.msk [vmem:[#allocation5] sm:$0x3] %vm3818_vm1, %v4878_v40 }
 0xf24   :  { %4934 = shalt.err (!%p4931_p9)
}
 0xf25   :  { %s4935_s9 = scalar_lea.hbm %s6680_s27, 32 }
 0xf26   :  { %p4936_p10 = scmp.ne.s32.totalorder %s6680_s27, %s4935_s9  ;;  %p4939_p11 = scmp.lt.u32.totalorder %s4935_s9, %s6680_s27 }
 0xf28   :  { %p4941_p12 = pnand %p4939_p11, %p4936_p10 }
 0xf2a   :  { %4944 = shalt.err (!%p4941_p12)
}
 0xf2b   :  { %3829 = dma.vmem_to_hbm [thread:$0]  %s3827_s17, 32, %s6680_s27, [#allocation3]  }
 0xf2c   :  { %4947 = dma.done.wait [#allocation3], 32  }
 0xf2d   :  { %4948 = vsyncadd [#allocation3], 4294967264 }
 0xf2e   :  { %3833 = vsyncpa [#allocation3], 1 }
 0xf2f   :  { %3834 = vsyncpa [#allocation4], 1 }

</bundles_post_ra>
